<compile_context>
chip_gen: v7x
topology: tpu7x:2x2x1
jax: 0.10.0
libtpu: 0.0.40
codegen_flags: <defaults>
</compile_context>

<pallas_src>
import functools

import jax
import jax.numpy as jnp
import numpy as np
from jax.experimental import pallas as pl
from jax.experimental.pallas import tpu as pltpu

KSIZE = 7
PAD = KSIZE // 2
_KK = KSIZE * KSIZE


# ----------------------------- Pallas kernel ------------------------------ #

def spatial_attention_kernel(w_spatial, x_ref, mask_ref, w_ref, b_ref,
                             o_ref, att_ref, pavg_ref, pmax_ref):
    # w_spatial : static spatial width W (bound via functools.partial)
    # x_ref     : [Bn, C, H*W]     lane-dense input block (native dtype)
    # mask_ref  : [KSIZE, H*W]     per-kw column-validity masks (f32 0/1)
    # w_ref     : [2*K*K]          flattened conv weight in SMEM ([in_ch, kh, kw])
    # b_ref     : [1]              conv bias in SMEM
    # o_ref     : [Bn, H*W]        sigmoid attention map (lane-dense)
    # att_ref   : [Bn, C, H*W]     fused attended features = x * sigmoid
    # pavg_ref / pmax_ref : [Bn, H*W + 2*OFF] flat zero-bordered planes (VMEM)
    bn, hw = o_ref.shape
    c = x_ref.shape[1]
    off = PAD * w_spatial + PAD

    # ---- channel mean / max, lane-dense, 4 partial accumulators ----
    npar = min(4, c)
    psum = [x_ref[:, j, :].astype(jnp.float32) for j in range(npar)]
    pmx = [psum[j] for j in range(npar)]
    for ci in range(npar, c):
        j = ci % npar
        xc = x_ref[:, ci, :].astype(jnp.float32)
        psum[j] = psum[j] + xc
        pmx[j] = jnp.maximum(pmx[j], xc)
    csum, cmax = psum[0], pmx[0]
    for j in range(1, npar):
        csum = csum + psum[j]
        cmax = jnp.maximum(cmax, pmx[j])
    avg = csum * (1.0 / c)

    # ---- flat zero-bordered planes: 2 tiny border zeros + 1 interior store ----
    zb = jnp.zeros((bn, off), jnp.float32)
    pavg_ref[:, :off] = zb
    pavg_ref[:, off + hw:off + hw + off] = zb
    pmax_ref[:, :off] = zb
    pmax_ref[:, off + hw:off + hw + off] = zb
    pavg_ref[:, off:off + hw] = avg
    pmax_ref[:, off:off + hw] = cmax

    # ---- 7x7 conv, lane-dense: one (Bn, H*W) lane-offset load per tap ----
    # out[p] = sum_{dy,dx} w[dy,dx] * plane[p + (dy-PAD)*W + (dx-PAD)]
    # (zero borders handle row overflow; col_mask[dx] kills horizontal wrap).
    acc = jnp.full((bn, hw), b_ref[0], dtype=jnp.float32)
    for dx in range(KSIZE):
        col_mask = mask_ref[dx:dx + 1, :]                      # (1, H*W)
        inner = jnp.zeros((bn, hw), jnp.float32)
        for dy in range(KSIZE):
            start = off + (dy - PAD) * w_spatial + (dx - PAD)
            inner = inner + w_ref[dy * KSIZE + dx] * pavg_ref[:, start:start + hw]
            inner = inner + w_ref[_KK + dy * KSIZE + dx] * pmax_ref[:, start:start + hw]
        acc = acc + inner * col_mask

    sig = jax.nn.sigmoid(acc)                                  # (Bn, H*W)
    o_ref[...] = sig.astype(o_ref.dtype)

    # ---- fused attended features: x * sigmoid, one channel at a time
    #      (bounded vreg pressure; input block is already resident in VMEM) ----
    for ci in range(c):
        att_ref[:, ci, :] = (x_ref[:, ci, :].astype(jnp.float32) * sig
                             ).astype(att_ref.dtype)


def _pick_block_n(n):
    """Batch rows per grid step.

    Must be a multiple of 8 (sublane tile) or the full batch.  Capped at 16 so
    the in-kernel vreg working set (acc, partial reductions, tap slabs) stays
    well under 64 vregs; extra batch goes to the grid instead, keeping the
    BlockSpec pipeline busy and giving v7x's two TensorCores >= 2 grid steps
    whenever the batch allows.
    """
    valid = [d for d in range(1, n + 1) if n % d == 0 and (d % 8 == 0 or d == n)]
    preferred = [d for d in valid if d <= 16 and n // d >= 2]
    return max(preferred) if preferred else min(valid)


def spatial_attention(x, weight, bias):
    """x: [N, C, H, W]; weight: [1, 2, K, K]; bias: [1].

    Returns (attention_weights [N, 1, H, W], attended = x * attention [N, C, H, W]).
    """
    n, c, h, w = x.shape
    hw = h * w
    off = PAD * w + PAD

    # Free reshapes (collapse contiguous trailing dims): lane-dense in/out.
    x_flat = x.reshape(n, c, hw)
    w_flat = weight.astype(jnp.float32).reshape(-1)     # [2*K*K]
    b_flat = bias.astype(jnp.float32).reshape(-1)       # [1]

    # Static per-kw column-validity masks for the flat lane-shift conv.
    col = np.arange(hw, dtype=np.int64) % w
    masks = np.stack([((col + dx - PAD >= 0) & (col + dx - PAD < w))
                      for dx in range(KSIZE)]).astype(np.float32)
    masks = jnp.asarray(masks)                           # [KSIZE, H*W]

    block_n = _pick_block_n(n)

    out_flat, att_flat = pl.pallas_call(
        functools.partial(spatial_attention_kernel, w),
        out_shape=(jax.ShapeDtypeStruct((n, hw), x.dtype),
                   jax.ShapeDtypeStruct((n, c, hw), x.dtype)),
        grid=(n // block_n,),
        in_specs=[
            pl.BlockSpec((block_n, c, hw), lambda i: (i, 0, 0)),
            pl.BlockSpec((KSIZE, hw), lambda i: (0, 0)),
            pl.BlockSpec(memory_space=pltpu.MemorySpace.SMEM),
            pl.BlockSpec(memory_space=pltpu.MemorySpace.SMEM),
        ],
        out_specs=(
            pl.BlockSpec((block_n, hw), lambda i: (i, 0)),
            pl.BlockSpec((block_n, c, hw), lambda i: (i, 0, 0)),
        ),
        scratch_shapes=[
            pltpu.VMEM((block_n, hw + 2 * off), jnp.float32),
            pltpu.VMEM((block_n, hw + 2 * off), jnp.float32),
        ],
        compiler_params=pltpu.CompilerParams(
            dimension_semantics=("parallel",)),
    )(x_flat, masks, w_flat, b_flat)
    return out_flat.reshape(n, 1, h, w), att_flat.reshape(n, c, h, w)


def ref_spatial_attention(x, weight, bias):
    """Pure-JAX reference matching the PyTorch SpatialAttention forward."""
    avg = jnp.mean(x, axis=1, keepdims=True)
    mx = jnp.max(x, axis=1, keepdims=True)
    xc = jnp.concatenate([avg, mx], axis=1)
    y = jax.lax.conv_general_dilated(
        xc, weight, window_strides=(1, 1),
        padding=[(PAD, PAD), (PAD, PAD)],
        dimension_numbers=("NCHW", "OIHW", "NCHW"))
    return jax.nn.sigmoid(y + bias.reshape(1, 1, 1, 1))


# ------------------- Full HeadDescriptorExtractor forward ------------------ #
# TODO(synk): the dense 3x3/5x5/1x1 conv + BatchNorm + ReLU stacks are left to
# XLA's convolution emitters (standard dense convolutions, no bespoke Pallas
# win at these sizes); only the SpatialAttention hot path (channel reductions,
# 7x7 conv, sigmoid, attention multiply) runs as Pallas.

def _conv2d(x, w, b, pad):
    y = jax.lax.conv_general_dilated(
        x, w, window_strides=(1, 1), padding=[(pad, pad), (pad, pad)],
        dimension_numbers=("NCHW", "OIHW", "NCHW"))
    return y + b.reshape(1, -1, 1, 1)


def _bn(x, gamma, beta, eps=1e-5):
    # TODO(synk): eval-mode BatchNorm with fresh running stats (mean=0, var=1),
    # matching a freshly-initialized torch module in eval(), not trained stats.
    scale = (gamma / jnp.sqrt(1.0 + eps)).reshape(1, -1, 1, 1)
    return x * scale + beta.reshape(1, -1, 1, 1)


def head_descriptor_forward(p, x):
    h = jax.nn.relu(_bn(_conv2d(x, *p["hl1"], 1), *p["hl1_bn"]))
    h = jax.nn.relu(_bn(_conv2d(h, *p["hl2"], 1), *p["hl2_bn"]))
    head_map = _conv2d(h, *p["hl3"], 0)

    feat1 = _conv2d(x, *p["c1"], 1)
    feat2 = _conv2d(x, *p["c2"], 2)
    multi_scale_feat = jnp.concatenate([feat1, feat2], axis=1)

    # Pallas: attention weights + fused attended features (one HBM pass).
    attention_weights, attended_feat = spatial_attention(multi_scale_feat, *p["sa"])

    fused = jax.nn.relu(_bn(_conv2d(attended_feat, *p["fu"], 0), *p["fu_bn"]))
    f = jax.nn.relu(_bn(_conv2d(fused, *p["hf1"], 1), *p["hf1_bn"]))
    head_features = jax.nn.relu(_bn(_conv2d(f, *p["hf2"], 1), *p["hf2_bn"]))
    return head_map, head_features, attention_weights


def _conv_init(key, cout, cin, k):
    kw_, kb_ = jax.random.split(key)
    bound = 1.0 / (cin * k * k) ** 0.5
    w = jax.random.uniform(kw_, (cout, cin, k, k), minval=-bound, maxval=bound,
                           dtype=jnp.float32)
    b = jax.random.uniform(kb_, (cout,), minval=-bound, maxval=bound,
                           dtype=jnp.float32)
    return w, b


def init_head_descriptor_params(key, in_channels, feature_dim):
    ks = jax.random.split(key, 9)
    half = feature_dim // 2
    bn = lambda ch: (jnp.ones((ch,), jnp.float32), jnp.zeros((ch,), jnp.float32))
    return {
        "hl1": _conv_init(ks[0], 128, in_channels, 3), "hl1_bn": bn(128),
        "hl2": _conv_init(ks[1], 64, 128, 3),          "hl2_bn": bn(64),
        "hl3": _conv_init(ks[2], 1, 64, 1),
        "c1": _conv_init(ks[3], half, in_channels, 3),
        "c2": _conv_init(ks[4], half, in_channels, 5),
        "sa": _conv_init(ks[5], 1, 2, KSIZE),
        "fu": _conv_init(ks[6], feature_dim, feature_dim, 1),  "fu_bn": bn(feature_dim),
        "hf1": _conv_init(ks[7], feature_dim, feature_dim, 3), "hf1_bn": bn(feature_dim),
        "hf2": _conv_init(ks[8], feature_dim, feature_dim, 3), "hf2_bn": bn(feature_dim),
    }


if __name__ == "__main__":
    key = jax.random.PRNGKey(0)
    kx, kp, ka = jax.random.split(key, 3)

    # Small module-consistent shapes: batch=2, in_channels=4, 16x16 spatial,
    # feature_dim=32 (so the attention sees [2, 32, 16, 16]).
    N, C_IN, H, W = 2, 4, 16, 16
    FEATURE_DIM = 32
    x = jax.random.normal(kx, (N, C_IN, H, W), dtype=jnp.float32)
    params = init_head_descriptor_params(kp, C_IN, FEATURE_DIM)

    # 1) Check the Pallas SpatialAttention kernel (attention + fused attended
    #    features) against the conv reference at the shape the module feeds it.
    msf = jax.random.normal(ka, (N, FEATURE_DIM, H, W), dtype=jnp.float32)
    sa_w, sa_b = params["sa"]
    got_attn, got_att = jax.block_until_ready(spatial_attention(msf, sa_w, sa_b))
    want_attn = ref_spatial_attention(msf, sa_w, sa_b)
    want_att = msf * want_attn
    assert got_attn.shape == (N, 1, H, W), got_attn.shape
    assert got_att.shape == (N, FEATURE_DIM, H, W), got_att.shape
    assert jnp.allclose(got_attn, want_attn, atol=1e-5, rtol=1e-5), \
        float(jnp.max(jnp.abs(got_attn - want_attn)))
    assert jnp.allclose(got_att, want_att, atol=1e-5, rtol=1e-5), \
        float(jnp.max(jnp.abs(got_att - want_att)))

    # 2) Run the full HeadDescriptorExtractor forward (attention via Pallas).
    head_map, head_features, attn = jax.block_until_ready(
        head_descriptor_forward(params, x))
    assert head_map.shape == (N, 1, H, W), head_map.shape
    assert head_features.shape == (N, FEATURE_DIM, H, W), head_features.shape
    assert attn.shape == (N, 1, H, W), attn.shape

    print("KERNEL_OK")
</pallas_src>

<mosaic_0001>
module attributes {stable_mosaic.version = 11 : i64} {
  func.func @spatial_attention_kernel(%arg0: i32, %arg1: memref<2x32x256xf32, #tpu.memory_space<vmem>>, %arg2: memref<7x256xf32, #tpu.memory_space<vmem>>, %arg3: memref<98xf32, #tpu.memory_space<smem>>, %arg4: memref<1xf32, #tpu.memory_space<smem>>, %arg5: memref<2x256xf32, #tpu.memory_space<vmem>>, %arg6: memref<2x32x256xf32, #tpu.memory_space<vmem>>, %arg7: memref<2x358xf32, #tpu.memory_space<vmem>>, %arg8: memref<2x358xf32, #tpu.memory_space<vmem>>) attributes {dimension_semantics = [#tpu.dimension_semantics<parallel>], iteration_bounds = array<i64: 1>, scalar_prefetch = 0 : i64, scratch_operands = 2 : i64, tpu.core_type = #tpu.core_type<tc>, window_params = [{transform_indices = @transform_0, window_bounds = array<i64: 2, 32, 256>}, {pipeline_mode = #tpu.pipeline_mode<synchronous>, transform_indices = @transform_1, window_bounds = array<i64: 7, 256>}, {transform_indices = @transform_2, window_bounds = array<i64: 98>}, {transform_indices = @transform_3, window_bounds = array<i64: 1>}, {transform_indices = @transform_4, window_bounds = array<i64: 2, 256>}, {transform_indices = @transform_5, window_bounds = array<i64: 2, 32, 256>}]} {
    %c0 = arith.constant 0 : index
    %c0_0 = arith.constant 0 : index
    %c0_1 = arith.constant 0 : index
    %0 = vector.load %arg1[%c0, %c0_0, %c0_1] : memref<2x32x256xf32, #tpu.memory_space<vmem>>, vector<2x1x256xf32>
    %1 = vector.shape_cast %0 : vector<2x1x256xf32> to vector<2x256xf32>
    %c0_2 = arith.constant 0 : index
    %c1 = arith.constant 1 : index
    %c0_3 = arith.constant 0 : index
    %2 = vector.load %arg1[%c0_2, %c1, %c0_3] : memref<2x32x256xf32, #tpu.memory_space<vmem>>, vector<2x1x256xf32>
    %3 = vector.shape_cast %2 : vector<2x1x256xf32> to vector<2x256xf32>
    %c0_4 = arith.constant 0 : index
    %c2 = arith.constant 2 : index
    %c0_5 = arith.constant 0 : index
    %4 = vector.load %arg1[%c0_4, %c2, %c0_5] : memref<2x32x256xf32, #tpu.memory_space<vmem>>, vector<2x1x256xf32>
    %5 = vector.shape_cast %4 : vector<2x1x256xf32> to vector<2x256xf32>
    %c0_6 = arith.constant 0 : index
    %c3 = arith.constant 3 : index
    %c0_7 = arith.constant 0 : index
    %6 = vector.load %arg1[%c0_6, %c3, %c0_7] : memref<2x32x256xf32, #tpu.memory_space<vmem>>, vector<2x1x256xf32>
    %7 = vector.shape_cast %6 : vector<2x1x256xf32> to vector<2x256xf32>
    %c0_8 = arith.constant 0 : index
    %c4 = arith.constant 4 : index
    %c0_9 = arith.constant 0 : index
    %8 = vector.load %arg1[%c0_8, %c4, %c0_9] : memref<2x32x256xf32, #tpu.memory_space<vmem>>, vector<2x1x256xf32>
    %9 = vector.shape_cast %8 : vector<2x1x256xf32> to vector<2x256xf32>
    %10 = arith.addf %1, %9 : vector<2x256xf32>
    %11 = arith.maximumf %1, %9 : vector<2x256xf32>
    %c0_10 = arith.constant 0 : index
    %c5 = arith.constant 5 : index
    %c0_11 = arith.constant 0 : index
    %12 = vector.load %arg1[%c0_10, %c5, %c0_11] : memref<2x32x256xf32, #tpu.memory_space<vmem>>, vector<2x1x256xf32>
    %13 = vector.shape_cast %12 : vector<2x1x256xf32> to vector<2x256xf32>
    %14 = arith.addf %3, %13 : vector<2x256xf32>
    %15 = arith.maximumf %3, %13 : vector<2x256xf32>
    %c0_12 = arith.constant 0 : index
    %c6 = arith.constant 6 : index
    %c0_13 = arith.constant 0 : index
    %16 = vector.load %arg1[%c0_12, %c6, %c0_13] : memref<2x32x256xf32, #tpu.memory_space<vmem>>, vector<2x1x256xf32>
    %17 = vector.shape_cast %16 : vector<2x1x256xf32> to vector<2x256xf32>
    %18 = arith.addf %5, %17 : vector<2x256xf32>
    %19 = arith.maximumf %5, %17 : vector<2x256xf32>
    %c0_14 = arith.constant 0 : index
    %c7 = arith.constant 7 : index
    %c0_15 = arith.constant 0 : index
    %20 = vector.load %arg1[%c0_14, %c7, %c0_15] : memref<2x32x256xf32, #tpu.memory_space<vmem>>, vector<2x1x256xf32>
    %21 = vector.shape_cast %20 : vector<2x1x256xf32> to vector<2x256xf32>
    %22 = arith.addf %7, %21 : vector<2x256xf32>
    %23 = arith.maximumf %7, %21 : vector<2x256xf32>
    %c0_16 = arith.constant 0 : index
    %c8 = arith.constant 8 : index
    %c0_17 = arith.constant 0 : index
    %24 = vector.load %arg1[%c0_16, %c8, %c0_17] : memref<2x32x256xf32, #tpu.memory_space<vmem>>, vector<2x1x256xf32>
    %25 = vector.shape_cast %24 : vector<2x1x256xf32> to vector<2x256xf32>
    %26 = arith.addf %10, %25 : vector<2x256xf32>
    %27 = arith.maximumf %11, %25 : vector<2x256xf32>
    %c0_18 = arith.constant 0 : index
    %c9 = arith.constant 9 : index
    %c0_19 = arith.constant 0 : index
    %28 = vector.load %arg1[%c0_18, %c9, %c0_19] : memref<2x32x256xf32, #tpu.memory_space<vmem>>, vector<2x1x256xf32>
    %29 = vector.shape_cast %28 : vector<2x1x256xf32> to vector<2x256xf32>
    %30 = arith.addf %14, %29 : vector<2x256xf32>
    %31 = arith.maximumf %15, %29 : vector<2x256xf32>
    %c0_20 = arith.constant 0 : index
    %c10 = arith.constant 10 : index
    %c0_21 = arith.constant 0 : index
    %32 = vector.load %arg1[%c0_20, %c10, %c0_21] : memref<2x32x256xf32, #tpu.memory_space<vmem>>, vector<2x1x256xf32>
    %33 = vector.shape_cast %32 : vector<2x1x256xf32> to vector<2x256xf32>
    %34 = arith.addf %18, %33 : vector<2x256xf32>
    %35 = arith.maximumf %19, %33 : vector<2x256xf32>
    %c0_22 = arith.constant 0 : index
    %c11 = arith.constant 11 : index
    %c0_23 = arith.constant 0 : index
    %36 = vector.load %arg1[%c0_22, %c11, %c0_23] : memref<2x32x256xf32, #tpu.memory_space<vmem>>, vector<2x1x256xf32>
    %37 = vector.shape_cast %36 : vector<2x1x256xf32> to vector<2x256xf32>
    %38 = arith.addf %22, %37 : vector<2x256xf32>
    %39 = arith.maximumf %23, %37 : vector<2x256xf32>
    %c0_24 = arith.constant 0 : index
    %c12 = arith.constant 12 : index
    %c0_25 = arith.constant 0 : index
    %40 = vector.load %arg1[%c0_24, %c12, %c0_25] : memref<2x32x256xf32, #tpu.memory_space<vmem>>, vector<2x1x256xf32>
    %41 = vector.shape_cast %40 : vector<2x1x256xf32> to vector<2x256xf32>
    %42 = arith.addf %26, %41 : vector<2x256xf32>
    %43 = arith.maximumf %27, %41 : vector<2x256xf32>
    %c0_26 = arith.constant 0 : index
    %c13 = arith.constant 13 : index
    %c0_27 = arith.constant 0 : index
    %44 = vector.load %arg1[%c0_26, %c13, %c0_27] : memref<2x32x256xf32, #tpu.memory_space<vmem>>, vector<2x1x256xf32>
    %45 = vector.shape_cast %44 : vector<2x1x256xf32> to vector<2x256xf32>
    %46 = arith.addf %30, %45 : vector<2x256xf32>
    %47 = arith.maximumf %31, %45 : vector<2x256xf32>
    %c0_28 = arith.constant 0 : index
    %c14 = arith.constant 14 : index
    %c0_29 = arith.constant 0 : index
    %48 = vector.load %arg1[%c0_28, %c14, %c0_29] : memref<2x32x256xf32, #tpu.memory_space<vmem>>, vector<2x1x256xf32>
    %49 = vector.shape_cast %48 : vector<2x1x256xf32> to vector<2x256xf32>
    %50 = arith.addf %34, %49 : vector<2x256xf32>
    %51 = arith.maximumf %35, %49 : vector<2x256xf32>
    %c0_30 = arith.constant 0 : index
    %c15 = arith.constant 15 : index
    %c0_31 = arith.constant 0 : index
    %52 = vector.load %arg1[%c0_30, %c15, %c0_31] : memref<2x32x256xf32, #tpu.memory_space<vmem>>, vector<2x1x256xf32>
    %53 = vector.shape_cast %52 : vector<2x1x256xf32> to vector<2x256xf32>
    %54 = arith.addf %38, %53 : vector<2x256xf32>
    %55 = arith.maximumf %39, %53 : vector<2x256xf32>
    %c0_32 = arith.constant 0 : index
    %c16 = arith.constant 16 : index
    %c0_33 = arith.constant 0 : index
    %56 = vector.load %arg1[%c0_32, %c16, %c0_33] : memref<2x32x256xf32, #tpu.memory_space<vmem>>, vector<2x1x256xf32>
    %57 = vector.shape_cast %56 : vector<2x1x256xf32> to vector<2x256xf32>
    %58 = arith.addf %42, %57 : vector<2x256xf32>
    %59 = arith.maximumf %43, %57 : vector<2x256xf32>
    %c0_34 = arith.constant 0 : index
    %c17 = arith.constant 17 : index
    %c0_35 = arith.constant 0 : index
    %60 = vector.load %arg1[%c0_34, %c17, %c0_35] : memref<2x32x256xf32, #tpu.memory_space<vmem>>, vector<2x1x256xf32>
    %61 = vector.shape_cast %60 : vector<2x1x256xf32> to vector<2x256xf32>
    %62 = arith.addf %46, %61 : vector<2x256xf32>
    %63 = arith.maximumf %47, %61 : vector<2x256xf32>
    %c0_36 = arith.constant 0 : index
    %c18 = arith.constant 18 : index
    %c0_37 = arith.constant 0 : index
    %64 = vector.load %arg1[%c0_36, %c18, %c0_37] : memref<2x32x256xf32, #tpu.memory_space<vmem>>, vector<2x1x256xf32>
    %65 = vector.shape_cast %64 : vector<2x1x256xf32> to vector<2x256xf32>
    %66 = arith.addf %50, %65 : vector<2x256xf32>
    %67 = arith.maximumf %51, %65 : vector<2x256xf32>
    %c0_38 = arith.constant 0 : index
    %c19 = arith.constant 19 : index
    %c0_39 = arith.constant 0 : index
    %68 = vector.load %arg1[%c0_38, %c19, %c0_39] : memref<2x32x256xf32, #tpu.memory_space<vmem>>, vector<2x1x256xf32>
    %69 = vector.shape_cast %68 : vector<2x1x256xf32> to vector<2x256xf32>
    %70 = arith.addf %54, %69 : vector<2x256xf32>
    %71 = arith.maximumf %55, %69 : vector<2x256xf32>
    %c0_40 = arith.constant 0 : index
    %c20 = arith.constant 20 : index
    %c0_41 = arith.constant 0 : index
    %72 = vector.load %arg1[%c0_40, %c20, %c0_41] : memref<2x32x256xf32, #tpu.memory_space<vmem>>, vector<2x1x256xf32>
    %73 = vector.shape_cast %72 : vector<2x1x256xf32> to vector<2x256xf32>
    %74 = arith.addf %58, %73 : vector<2x256xf32>
    %75 = arith.maximumf %59, %73 : vector<2x256xf32>
    %c0_42 = arith.constant 0 : index
    %c21 = arith.constant 21 : index
    %c0_43 = arith.constant 0 : index
    %76 = vector.load %arg1[%c0_42, %c21, %c0_43] : memref<2x32x256xf32, #tpu.memory_space<vmem>>, vector<2x1x256xf32>
    %77 = vector.shape_cast %76 : vector<2x1x256xf32> to vector<2x256xf32>
    %78 = arith.addf %62, %77 : vector<2x256xf32>
    %79 = arith.maximumf %63, %77 : vector<2x256xf32>
    %c0_44 = arith.constant 0 : index
    %c22 = arith.constant 22 : index
    %c0_45 = arith.constant 0 : index
    %80 = vector.load %arg1[%c0_44, %c22, %c0_45] : memref<2x32x256xf32, #tpu.memory_space<vmem>>, vector<2x1x256xf32>
    %81 = vector.shape_cast %80 : vector<2x1x256xf32> to vector<2x256xf32>
    %82 = arith.addf %66, %81 : vector<2x256xf32>
    %83 = arith.maximumf %67, %81 : vector<2x256xf32>
    %c0_46 = arith.constant 0 : index
    %c23 = arith.constant 23 : index
    %c0_47 = arith.constant 0 : index
    %84 = vector.load %arg1[%c0_46, %c23, %c0_47] : memref<2x32x256xf32, #tpu.memory_space<vmem>>, vector<2x1x256xf32>
    %85 = vector.shape_cast %84 : vector<2x1x256xf32> to vector<2x256xf32>
    %86 = arith.addf %70, %85 : vector<2x256xf32>
    %87 = arith.maximumf %71, %85 : vector<2x256xf32>
    %c0_48 = arith.constant 0 : index
    %c24 = arith.constant 24 : index
    %c0_49 = arith.constant 0 : index
    %88 = vector.load %arg1[%c0_48, %c24, %c0_49] : memref<2x32x256xf32, #tpu.memory_space<vmem>>, vector<2x1x256xf32>
    %89 = vector.shape_cast %88 : vector<2x1x256xf32> to vector<2x256xf32>
    %90 = arith.addf %74, %89 : vector<2x256xf32>
    %91 = arith.maximumf %75, %89 : vector<2x256xf32>
    %c0_50 = arith.constant 0 : index
    %c25 = arith.constant 25 : index
    %c0_51 = arith.constant 0 : index
    %92 = vector.load %arg1[%c0_50, %c25, %c0_51] : memref<2x32x256xf32, #tpu.memory_space<vmem>>, vector<2x1x256xf32>
    %93 = vector.shape_cast %92 : vector<2x1x256xf32> to vector<2x256xf32>
    %94 = arith.addf %78, %93 : vector<2x256xf32>
    %95 = arith.maximumf %79, %93 : vector<2x256xf32>
    %c0_52 = arith.constant 0 : index
    %c26 = arith.constant 26 : index
    %c0_53 = arith.constant 0 : index
    %96 = vector.load %arg1[%c0_52, %c26, %c0_53] : memref<2x32x256xf32, #tpu.memory_space<vmem>>, vector<2x1x256xf32>
    %97 = vector.shape_cast %96 : vector<2x1x256xf32> to vector<2x256xf32>
    %98 = arith.addf %82, %97 : vector<2x256xf32>
    %99 = arith.maximumf %83, %97 : vector<2x256xf32>
    %c0_54 = arith.constant 0 : index
    %c27 = arith.constant 27 : index
    %c0_55 = arith.constant 0 : index
    %100 = vector.load %arg1[%c0_54, %c27, %c0_55] : memref<2x32x256xf32, #tpu.memory_space<vmem>>, vector<2x1x256xf32>
    %101 = vector.shape_cast %100 : vector<2x1x256xf32> to vector<2x256xf32>
    %102 = arith.addf %86, %101 : vector<2x256xf32>
    %103 = arith.maximumf %87, %101 : vector<2x256xf32>
    %c0_56 = arith.constant 0 : index
    %c28 = arith.constant 28 : index
    %c0_57 = arith.constant 0 : index
    %104 = vector.load %arg1[%c0_56, %c28, %c0_57] : memref<2x32x256xf32, #tpu.memory_space<vmem>>, vector<2x1x256xf32>
    %105 = vector.shape_cast %104 : vector<2x1x256xf32> to vector<2x256xf32>
    %106 = arith.addf %90, %105 : vector<2x256xf32>
    %107 = arith.maximumf %91, %105 : vector<2x256xf32>
    %c0_58 = arith.constant 0 : index
    %c29 = arith.constant 29 : index
    %c0_59 = arith.constant 0 : index
    %108 = vector.load %arg1[%c0_58, %c29, %c0_59] : memref<2x32x256xf32, #tpu.memory_space<vmem>>, vector<2x1x256xf32>
    %109 = vector.shape_cast %108 : vector<2x1x256xf32> to vector<2x256xf32>
    %110 = arith.addf %94, %109 : vector<2x256xf32>
    %111 = arith.maximumf %95, %109 : vector<2x256xf32>
    %c0_60 = arith.constant 0 : index
    %c30 = arith.constant 30 : index
    %c0_61 = arith.constant 0 : index
    %112 = vector.load %arg1[%c0_60, %c30, %c0_61] : memref<2x32x256xf32, #tpu.memory_space<vmem>>, vector<2x1x256xf32>
    %113 = vector.shape_cast %112 : vector<2x1x256xf32> to vector<2x256xf32>
    %114 = arith.addf %98, %113 : vector<2x256xf32>
    %115 = arith.maximumf %99, %113 : vector<2x256xf32>
    %c0_62 = arith.constant 0 : index
    %c31 = arith.constant 31 : index
    %c0_63 = arith.constant 0 : index
    %116 = vector.load %arg1[%c0_62, %c31, %c0_63] : memref<2x32x256xf32, #tpu.memory_space<vmem>>, vector<2x1x256xf32>
    %117 = vector.shape_cast %116 : vector<2x1x256xf32> to vector<2x256xf32>
    %118 = arith.addf %102, %117 : vector<2x256xf32>
    %119 = arith.maximumf %103, %117 : vector<2x256xf32>
    %120 = arith.addf %106, %110 : vector<2x256xf32>
    %121 = arith.maximumf %107, %111 : vector<2x256xf32>
    %122 = arith.addf %120, %114 : vector<2x256xf32>
    %123 = arith.maximumf %121, %115 : vector<2x256xf32>
    %124 = arith.addf %122, %118 : vector<2x256xf32>
    %125 = arith.maximumf %123, %119 : vector<2x256xf32>
    %cst = arith.constant 3.125000e-02 : f32
    %126 = vector.broadcast %cst : f32 to vector<2x256xf32>
    %127 = arith.mulf %124, %126 : vector<2x256xf32>
    %cst_64 = arith.constant 0.000000e+00 : f32
    %128 = vector.broadcast %cst_64 : f32 to vector<2x51xf32>
    %c0_65 = arith.constant 0 : index
    %c0_66 = arith.constant 0 : index
    %129 = vector.load %arg7[%c0_65, %c0_66] : memref<2x358xf32, #tpu.memory_space<vmem>>, vector<2x51xf32>
    tpu.vector_store %arg7[%c0_65, %c0_66], %128 {strides = array<i32>} : memref<2x358xf32, #tpu.memory_space<vmem>>, vector<2x51xf32>,
    %c0_67 = arith.constant 0 : index
    %c307 = arith.constant 307 : index
    %130 = vector.load %arg7[%c0_67, %c307] : memref<2x358xf32, #tpu.memory_space<vmem>>, vector<2x51xf32>
    tpu.vector_store %arg7[%c0_67, %c307], %128 {strides = array<i32>} : memref<2x358xf32, #tpu.memory_space<vmem>>, vector<2x51xf32>,
    %c0_68 = arith.constant 0 : index
    %c0_69 = arith.constant 0 : index
    %131 = vector.load %arg8[%c0_68, %c0_69] : memref<2x358xf32, #tpu.memory_space<vmem>>, vector<2x51xf32>
    tpu.vector_store %arg8[%c0_68, %c0_69], %128 {strides = array<i32>} : memref<2x358xf32, #tpu.memory_space<vmem>>, vector<2x51xf32>,
    %c0_70 = arith.constant 0 : index
    %c307_71 = arith.constant 307 : index
    %132 = vector.load %arg8[%c0_70, %c307_71] : memref<2x358xf32, #tpu.memory_space<vmem>>, vector<2x51xf32>
    tpu.vector_store %arg8[%c0_70, %c307_71], %128 {strides = array<i32>} : memref<2x358xf32, #tpu.memory_space<vmem>>, vector<2x51xf32>,
    %c0_72 = arith.constant 0 : index
    %c51 = arith.constant 51 : index
    %133 = vector.load %arg7[%c0_72, %c51] : memref<2x358xf32, #tpu.memory_space<vmem>>, vector<2x256xf32>
    tpu.vector_store %arg7[%c0_72, %c51], %127 {strides = array<i32>} : memref<2x358xf32, #tpu.memory_space<vmem>>, vector<2x256xf32>,
    %c0_73 = arith.constant 0 : index
    %c51_74 = arith.constant 51 : index
    %134 = vector.load %arg8[%c0_73, %c51_74] : memref<2x358xf32, #tpu.memory_space<vmem>>, vector<2x256xf32>
    tpu.vector_store %arg8[%c0_73, %c51_74], %125 {strides = array<i32>} : memref<2x358xf32, #tpu.memory_space<vmem>>, vector<2x256xf32>,
    %c0_75 = arith.constant 0 : index
    %135 = memref.load %arg4[%c0_75] : memref<1xf32, #tpu.memory_space<smem>>
    %136 = vector.broadcast %135 : f32 to vector<2x256xf32>
    %c0_76 = arith.constant 0 : index
    %c0_77 = arith.constant 0 : index
    %137 = vector.load %arg2[%c0_76, %c0_77] : memref<7x256xf32, #tpu.memory_space<vmem>>, vector<1x256xf32>
    %cst_78 = arith.constant 0.000000e+00 : f32
    %138 = vector.broadcast %cst_78 : f32 to vector<2x256xf32>
    %c0_79 = arith.constant 0 : index
    %139 = memref.load %arg3[%c0_79] : memref<98xf32, #tpu.memory_space<smem>>
    %c0_80 = arith.constant 0 : index
    %c0_81 = arith.constant 0 : index
    %140 = vector.load %arg7[%c0_80, %c0_81] : memref<2x358xf32, #tpu.memory_space<vmem>>, vector<2x256xf32>
    %141 = vector.broadcast %139 : f32 to vector<2x256xf32>
    %142 = arith.mulf %141, %140 : vector<2x256xf32>
    %143 = arith.addf %138, %142 : vector<2x256xf32>
    %c49 = arith.constant 49 : index
    %144 = memref.load %arg3[%c49] : memref<98xf32, #tpu.memory_space<smem>>
    %c0_82 = arith.constant 0 : index
    %c0_83 = arith.constant 0 : index
    %145 = vector.load %arg8[%c0_82, %c0_83] : memref<2x358xf32, #tpu.memory_space<vmem>>, vector<2x256xf32>
    %146 = vector.broadcast %144 : f32 to vector<2x256xf32>
    %147 = arith.mulf %146, %145 : vector<2x256xf32>
    %148 = arith.addf %143, %147 : vector<2x256xf32>
    %c7_84 = arith.constant 7 : index
    %149 = memref.load %arg3[%c7_84] : memref<98xf32, #tpu.memory_space<smem>>
    %c0_85 = arith.constant 0 : index
    %c16_86 = arith.constant 16 : index
    %150 = vector.load %arg7[%c0_85, %c16_86] : memref<2x358xf32, #tpu.memory_space<vmem>>, vector<2x256xf32>
    %151 = vector.broadcast %149 : f32 to vector<2x256xf32>
    %152 = arith.mulf %151, %150 : vector<2x256xf32>
    %153 = arith.addf %148, %152 : vector<2x256xf32>
    %c56 = arith.constant 56 : index
    %154 = memref.load %arg3[%c56] : memref<98xf32, #tpu.memory_space<smem>>
    %c0_87 = arith.constant 0 : index
    %c16_88 = arith.constant 16 : index
    %155 = vector.load %arg8[%c0_87, %c16_88] : memref<2x358xf32, #tpu.memory_space<vmem>>, vector<2x256xf32>
    %156 = vector.broadcast %154 : f32 to vector<2x256xf32>
    %157 = arith.mulf %156, %155 : vector<2x256xf32>
    %158 = arith.addf %153, %157 : vector<2x256xf32>
    %c14_89 = arith.constant 14 : index
    %159 = memref.load %arg3[%c14_89] : memref<98xf32, #tpu.memory_space<smem>>
    %c0_90 = arith.constant 0 : index
    %c32 = arith.constant 32 : index
    %160 = vector.load %arg7[%c0_90, %c32] : memref<2x358xf32, #tpu.memory_space<vmem>>, vector<2x256xf32>
    %161 = vector.broadcast %159 : f32 to vector<2x256xf32>
    %162 = arith.mulf %161, %160 : vector<2x256xf32>
    %163 = arith.addf %158, %162 : vector<2x256xf32>
    %c63 = arith.constant 63 : index
    %164 = memref.load %arg3[%c63] : memref<98xf32, #tpu.memory_space<smem>>
    %c0_91 = arith.constant 0 : index
    %c32_92 = arith.constant 32 : index
    %165 = vector.load %arg8[%c0_91, %c32_92] : memref<2x358xf32, #tpu.memory_space<vmem>>, vector<2x256xf32>
    %166 = vector.broadcast %164 : f32 to vector<2x256xf32>
    %167 = arith.mulf %166, %165 : vector<2x256xf32>
    %168 = arith.addf %163, %167 : vector<2x256xf32>
    %c21_93 = arith.constant 21 : index
    %169 = memref.load %arg3[%c21_93] : memref<98xf32, #tpu.memory_space<smem>>
    %c0_94 = arith.constant 0 : index
    %c48 = arith.constant 48 : index
    %170 = vector.load %arg7[%c0_94, %c48] : memref<2x358xf32, #tpu.memory_space<vmem>>, vector<2x256xf32>
    %171 = vector.broadcast %169 : f32 to vector<2x256xf32>
    %172 = arith.mulf %171, %170 : vector<2x256xf32>
    %173 = arith.addf %168, %172 : vector<2x256xf32>
    %c70 = arith.constant 70 : index
    %174 = memref.load %arg3[%c70] : memref<98xf32, #tpu.memory_space<smem>>
    %c0_95 = arith.constant 0 : index
    %c48_96 = arith.constant 48 : index
    %175 = vector.load %arg8[%c0_95, %c48_96] : memref<2x358xf32, #tpu.memory_space<vmem>>, vector<2x256xf32>
    %176 = vector.broadcast %174 : f32 to vector<2x256xf32>
    %177 = arith.mulf %176, %175 : vector<2x256xf32>
    %178 = arith.addf %173, %177 : vector<2x256xf32>
    %c28_97 = arith.constant 28 : index
    %179 = memref.load %arg3[%c28_97] : memref<98xf32, #tpu.memory_space<smem>>
    %c0_98 = arith.constant 0 : index
    %c64 = arith.constant 64 : index
    %180 = vector.load %arg7[%c0_98, %c64] : memref<2x358xf32, #tpu.memory_space<vmem>>, vector<2x256xf32>
    %181 = vector.broadcast %179 : f32 to vector<2x256xf32>
    %182 = arith.mulf %181, %180 : vector<2x256xf32>
    %183 = arith.addf %178, %182 : vector<2x256xf32>
    %c77 = arith.constant 77 : index
    %184 = memref.load %arg3[%c77] : memref<98xf32, #tpu.memory_space<smem>>
    %c0_99 = arith.constant 0 : index
    %c64_100 = arith.constant 64 : index
    %185 = vector.load %arg8[%c0_99, %c64_100] : memref<2x358xf32, #tpu.memory_space<vmem>>, vector<2x256xf32>
    %186 = vector.broadcast %184 : f32 to vector<2x256xf32>
    %187 = arith.mulf %186, %185 : vector<2x256xf32>
    %188 = arith.addf %183, %187 : vector<2x256xf32>
    %c35 = arith.constant 35 : index
    %189 = memref.load %arg3[%c35] : memref<98xf32, #tpu.memory_space<smem>>
    %c0_101 = arith.constant 0 : index
    %c80 = arith.constant 80 : index
    %190 = vector.load %arg7[%c0_101, %c80] : memref<2x358xf32, #tpu.memory_space<vmem>>, vector<2x256xf32>
    %191 = vector.broadcast %189 : f32 to vector<2x256xf32>
    %192 = arith.mulf %191, %190 : vector<2x256xf32>
    %193 = arith.addf %188, %192 : vector<2x256xf32>
    %c84 = arith.constant 84 : index
    %194 = memref.load %arg3[%c84] : memref<98xf32, #tpu.memory_space<smem>>
    %c0_102 = arith.constant 0 : index
    %c80_103 = arith.constant 80 : index
    %195 = vector.load %arg8[%c0_102, %c80_103] : memref<2x358xf32, #tpu.memory_space<vmem>>, vector<2x256xf32>
    %196 = vector.broadcast %194 : f32 to vector<2x256xf32>
    %197 = arith.mulf %196, %195 : vector<2x256xf32>
    %198 = arith.addf %193, %197 : vector<2x256xf32>
    %c42 = arith.constant 42 : index
    %199 = memref.load %arg3[%c42] : memref<98xf32, #tpu.memory_space<smem>>
    %c0_104 = arith.constant 0 : index
    %c96 = arith.constant 96 : index
    %200 = vector.load %arg7[%c0_104, %c96] : memref<2x358xf32, #tpu.memory_space<vmem>>, vector<2x256xf32>
    %201 = vector.broadcast %199 : f32 to vector<2x256xf32>
    %202 = arith.mulf %201, %200 : vector<2x256xf32>
    %203 = arith.addf %198, %202 : vector<2x256xf32>
    %c91 = arith.constant 91 : index
    %204 = memref.load %arg3[%c91] : memref<98xf32, #tpu.memory_space<smem>>
    %c0_105 = arith.constant 0 : index
    %c96_106 = arith.constant 96 : index
    %205 = vector.load %arg8[%c0_105, %c96_106] : memref<2x358xf32, #tpu.memory_space<vmem>>, vector<2x256xf32>
    %206 = vector.broadcast %204 : f32 to vector<2x256xf32>
    %207 = arith.mulf %206, %205 : vector<2x256xf32>
    %208 = arith.addf %203, %207 : vector<2x256xf32>
    %209 = vector.broadcast %137 : vector<1x256xf32> to vector<2x256xf32>
    %210 = arith.mulf %208, %209 : vector<2x256xf32>
    %211 = arith.addf %136, %210 : vector<2x256xf32>
    %c1_107 = arith.constant 1 : index
    %c0_108 = arith.constant 0 : index
    %212 = vector.load %arg2[%c1_107, %c0_108] : memref<7x256xf32, #tpu.memory_space<vmem>>, vector<1x256xf32>
    %cst_109 = arith.constant 0.000000e+00 : f32
    %213 = vector.broadcast %cst_109 : f32 to vector<2x256xf32>
    %c1_110 = arith.constant 1 : index
    %214 = memref.load %arg3[%c1_110] : memref<98xf32, #tpu.memory_space<smem>>
    %c0_111 = arith.constant 0 : index
    %c1_112 = arith.constant 1 : index
    %215 = vector.load %arg7[%c0_111, %c1_112] : memref<2x358xf32, #tpu.memory_space<vmem>>, vector<2x256xf32>
    %216 = vector.broadcast %214 : f32 to vector<2x256xf32>
    %217 = arith.mulf %216, %215 : vector<2x256xf32>
    %218 = arith.addf %213, %217 : vector<2x256xf32>
    %c50 = arith.constant 50 : index
    %219 = memref.load %arg3[%c50] : memref<98xf32, #tpu.memory_space<smem>>
    %c0_113 = arith.constant 0 : index
    %c1_114 = arith.constant 1 : index
    %220 = vector.load %arg8[%c0_113, %c1_114] : memref<2x358xf32, #tpu.memory_space<vmem>>, vector<2x256xf32>
    %221 = vector.broadcast %219 : f32 to vector<2x256xf32>
    %222 = arith.mulf %221, %220 : vector<2x256xf32>
    %223 = arith.addf %218, %222 : vector<2x256xf32>
    %c8_115 = arith.constant 8 : index
    %224 = memref.load %arg3[%c8_115] : memref<98xf32, #tpu.memory_space<smem>>
    %c0_116 = arith.constant 0 : index
    %c17_117 = arith.constant 17 : index
    %225 = vector.load %arg7[%c0_116, %c17_117] : memref<2x358xf32, #tpu.memory_space<vmem>>, vector<2x256xf32>
    %226 = vector.broadcast %224 : f32 to vector<2x256xf32>
    %227 = arith.mulf %226, %225 : vector<2x256xf32>
    %228 = arith.addf %223, %227 : vector<2x256xf32>
    %c57 = arith.constant 57 : index
    %229 = memref.load %arg3[%c57] : memref<98xf32, #tpu.memory_space<smem>>
    %c0_118 = arith.constant 0 : index
    %c17_119 = arith.constant 17 : index
    %230 = vector.load %arg8[%c0_118, %c17_119] : memref<2x358xf32, #tpu.memory_space<vmem>>, vector<2x256xf32>
    %231 = vector.broadcast %229 : f32 to vector<2x256xf32>
    %232 = arith.mulf %231, %230 : vector<2x256xf32>
    %233 = arith.addf %228, %232 : vector<2x256xf32>
    %c15_120 = arith.constant 15 : index
    %234 = memref.load %arg3[%c15_120] : memref<98xf32, #tpu.memory_space<smem>>
    %c0_121 = arith.constant 0 : index
    %c33 = arith.constant 33 : index
    %235 = vector.load %arg7[%c0_121, %c33] : memref<2x358xf32, #tpu.memory_space<vmem>>, vector<2x256xf32>
    %236 = vector.broadcast %234 : f32 to vector<2x256xf32>
    %237 = arith.mulf %236, %235 : vector<2x256xf32>
    %238 = arith.addf %233, %237 : vector<2x256xf32>
    %c64_122 = arith.constant 64 : index
    %239 = memref.load %arg3[%c64_122] : memref<98xf32, #tpu.memory_space<smem>>
    %c0_123 = arith.constant 0 : index
    %c33_124 = arith.constant 33 : index
    %240 = vector.load %arg8[%c0_123, %c33_124] : memref<2x358xf32, #tpu.memory_space<vmem>>, vector<2x256xf32>
    %241 = vector.broadcast %239 : f32 to vector<2x256xf32>
    %242 = arith.mulf %241, %240 : vector<2x256xf32>
    %243 = arith.addf %238, %242 : vector<2x256xf32>
    %c22_125 = arith.constant 22 : index
    %244 = memref.load %arg3[%c22_125] : memref<98xf32, #tpu.memory_space<smem>>
    %c0_126 = arith.constant 0 : index
    %c49_127 = arith.constant 49 : index
    %245 = vector.load %arg7[%c0_126, %c49_127] : memref<2x358xf32, #tpu.memory_space<vmem>>, vector<2x256xf32>
    %246 = vector.broadcast %244 : f32 to vector<2x256xf32>
    %247 = arith.mulf %246, %245 : vector<2x256xf32>
    %248 = arith.addf %243, %247 : vector<2x256xf32>
    %c71 = arith.constant 71 : index
    %249 = memref.load %arg3[%c71] : memref<98xf32, #tpu.memory_space<smem>>
    %c0_128 = arith.constant 0 : index
    %c49_129 = arith.constant 49 : index
    %250 = vector.load %arg8[%c0_128, %c49_129] : memref<2x358xf32, #tpu.memory_space<vmem>>, vector<2x256xf32>
    %251 = vector.broadcast %249 : f32 to vector<2x256xf32>
    %252 = arith.mulf %251, %250 : vector<2x256xf32>
    %253 = arith.addf %248, %252 : vector<2x256xf32>
    %c29_130 = arith.constant 29 : index
    %254 = memref.load %arg3[%c29_130] : memref<98xf32, #tpu.memory_space<smem>>
    %c0_131 = arith.constant 0 : index
    %c65 = arith.constant 65 : index
    %255 = vector.load %arg7[%c0_131, %c65] : memref<2x358xf32, #tpu.memory_space<vmem>>, vector<2x256xf32>
    %256 = vector.broadcast %254 : f32 to vector<2x256xf32>
    %257 = arith.mulf %256, %255 : vector<2x256xf32>
    %258 = arith.addf %253, %257 : vector<2x256xf32>
    %c78 = arith.constant 78 : index
    %259 = memref.load %arg3[%c78] : memref<98xf32, #tpu.memory_space<smem>>
    %c0_132 = arith.constant 0 : index
    %c65_133 = arith.constant 65 : index
    %260 = vector.load %arg8[%c0_132, %c65_133] : memref<2x358xf32, #tpu.memory_space<vmem>>, vector<2x256xf32>
    %261 = vector.broadcast %259 : f32 to vector<2x256xf32>
    %262 = arith.mulf %261, %260 : vector<2x256xf32>
    %263 = arith.addf %258, %262 : vector<2x256xf32>
    %c36 = arith.constant 36 : index
    %264 = memref.load %arg3[%c36] : memref<98xf32, #tpu.memory_space<smem>>
    %c0_134 = arith.constant 0 : index
    %c81 = arith.constant 81 : index
    %265 = vector.load %arg7[%c0_134, %c81] : memref<2x358xf32, #tpu.memory_space<vmem>>, vector<2x256xf32>
    %266 = vector.broadcast %264 : f32 to vector<2x256xf32>
    %267 = arith.mulf %266, %265 : vector<2x256xf32>
    %268 = arith.addf %263, %267 : vector<2x256xf32>
    %c85 = arith.constant 85 : index
    %269 = memref.load %arg3[%c85] : memref<98xf32, #tpu.memory_space<smem>>
    %c0_135 = arith.constant 0 : index
    %c81_136 = arith.constant 81 : index
    %270 = vector.load %arg8[%c0_135, %c81_136] : memref<2x358xf32, #tpu.memory_space<vmem>>, vector<2x256xf32>
    %271 = vector.broadcast %269 : f32 to vector<2x256xf32>
    %272 = arith.mulf %271, %270 : vector<2x256xf32>
    %273 = arith.addf %268, %272 : vector<2x256xf32>
    %c43 = arith.constant 43 : index
    %274 = memref.load %arg3[%c43] : memref<98xf32, #tpu.memory_space<smem>>
    %c0_137 = arith.constant 0 : index
    %c97 = arith.constant 97 : index
    %275 = vector.load %arg7[%c0_137, %c97] : memref<2x358xf32, #tpu.memory_space<vmem>>, vector<2x256xf32>
    %276 = vector.broadcast %274 : f32 to vector<2x256xf32>
    %277 = arith.mulf %276, %275 : vector<2x256xf32>
    %278 = arith.addf %273, %277 : vector<2x256xf32>
    %c92 = arith.constant 92 : index
    %279 = memref.load %arg3[%c92] : memref<98xf32, #tpu.memory_space<smem>>
    %c0_138 = arith.constant 0 : index
    %c97_139 = arith.constant 97 : index
    %280 = vector.load %arg8[%c0_138, %c97_139] : memref<2x358xf32, #tpu.memory_space<vmem>>, vector<2x256xf32>
    %281 = vector.broadcast %279 : f32 to vector<2x256xf32>
    %282 = arith.mulf %281, %280 : vector<2x256xf32>
    %283 = arith.addf %278, %282 : vector<2x256xf32>
    %284 = vector.broadcast %212 : vector<1x256xf32> to vector<2x256xf32>
    %285 = arith.mulf %283, %284 : vector<2x256xf32>
    %286 = arith.addf %211, %285 : vector<2x256xf32>
    %c2_140 = arith.constant 2 : index
    %c0_141 = arith.constant 0 : index
    %287 = vector.load %arg2[%c2_140, %c0_141] : memref<7x256xf32, #tpu.memory_space<vmem>>, vector<1x256xf32>
    %cst_142 = arith.constant 0.000000e+00 : f32
    %288 = vector.broadcast %cst_142 : f32 to vector<2x256xf32>
    %c2_143 = arith.constant 2 : index
    %289 = memref.load %arg3[%c2_143] : memref<98xf32, #tpu.memory_space<smem>>
    %c0_144 = arith.constant 0 : index
    %c2_145 = arith.constant 2 : index
    %290 = vector.load %arg7[%c0_144, %c2_145] : memref<2x358xf32, #tpu.memory_space<vmem>>, vector<2x256xf32>
    %291 = vector.broadcast %289 : f32 to vector<2x256xf32>
    %292 = arith.mulf %291, %290 : vector<2x256xf32>
    %293 = arith.addf %288, %292 : vector<2x256xf32>
    %c51_146 = arith.constant 51 : index
    %294 = memref.load %arg3[%c51_146] : memref<98xf32, #tpu.memory_space<smem>>
    %c0_147 = arith.constant 0 : index
    %c2_148 = arith.constant 2 : index
    %295 = vector.load %arg8[%c0_147, %c2_148] : memref<2x358xf32, #tpu.memory_space<vmem>>, vector<2x256xf32>
    %296 = vector.broadcast %294 : f32 to vector<2x256xf32>
    %297 = arith.mulf %296, %295 : vector<2x256xf32>
    %298 = arith.addf %293, %297 : vector<2x256xf32>
    %c9_149 = arith.constant 9 : index
    %299 = memref.load %arg3[%c9_149] : memref<98xf32, #tpu.memory_space<smem>>
    %c0_150 = arith.constant 0 : index
    %c18_151 = arith.constant 18 : index
    %300 = vector.load %arg7[%c0_150, %c18_151] : memref<2x358xf32, #tpu.memory_space<vmem>>, vector<2x256xf32>
    %301 = vector.broadcast %299 : f32 to vector<2x256xf32>
    %302 = arith.mulf %301, %300 : vector<2x256xf32>
    %303 = arith.addf %298, %302 : vector<2x256xf32>
    %c58 = arith.constant 58 : index
    %304 = memref.load %arg3[%c58] : memref<98xf32, #tpu.memory_space<smem>>
    %c0_152 = arith.constant 0 : index
    %c18_153 = arith.constant 18 : index
    %305 = vector.load %arg8[%c0_152, %c18_153] : memref<2x358xf32, #tpu.memory_space<vmem>>, vector<2x256xf32>
    %306 = vector.broadcast %304 : f32 to vector<2x256xf32>
    %307 = arith.mulf %306, %305 : vector<2x256xf32>
    %308 = arith.addf %303, %307 : vector<2x256xf32>
    %c16_154 = arith.constant 16 : index
    %309 = memref.load %arg3[%c16_154] : memref<98xf32, #tpu.memory_space<smem>>
    %c0_155 = arith.constant 0 : index
    %c34 = arith.constant 34 : index
    %310 = vector.load %arg7[%c0_155, %c34] : memref<2x358xf32, #tpu.memory_space<vmem>>, vector<2x256xf32>
    %311 = vector.broadcast %309 : f32 to vector<2x256xf32>
    %312 = arith.mulf %311, %310 : vector<2x256xf32>
    %313 = arith.addf %308, %312 : vector<2x256xf32>
    %c65_156 = arith.constant 65 : index
    %314 = memref.load %arg3[%c65_156] : memref<98xf32, #tpu.memory_space<smem>>
    %c0_157 = arith.constant 0 : index
    %c34_158 = arith.constant 34 : index
    %315 = vector.load %arg8[%c0_157, %c34_158] : memref<2x358xf32, #tpu.memory_space<vmem>>, vector<2x256xf32>
    %316 = vector.broadcast %314 : f32 to vector<2x256xf32>
    %317 = arith.mulf %316, %315 : vector<2x256xf32>
    %318 = arith.addf %313, %317 : vector<2x256xf32>
    %c23_159 = arith.constant 23 : index
    %319 = memref.load %arg3[%c23_159] : memref<98xf32, #tpu.memory_space<smem>>
    %c0_160 = arith.constant 0 : index
    %c50_161 = arith.constant 50 : index
    %320 = vector.load %arg7[%c0_160, %c50_161] : memref<2x358xf32, #tpu.memory_space<vmem>>, vector<2x256xf32>
    %321 = vector.broadcast %319 : f32 to vector<2x256xf32>
    %322 = arith.mulf %321, %320 : vector<2x256xf32>
    %323 = arith.addf %318, %322 : vector<2x256xf32>
    %c72 = arith.constant 72 : index
    %324 = memref.load %arg3[%c72] : memref<98xf32, #tpu.memory_space<smem>>
    %c0_162 = arith.constant 0 : index
    %c50_163 = arith.constant 50 : index
    %325 = vector.load %arg8[%c0_162, %c50_163] : memref<2x358xf32, #tpu.memory_space<vmem>>, vector<2x256xf32>
    %326 = vector.broadcast %324 : f32 to vector<2x256xf32>
    %327 = arith.mulf %326, %325 : vector<2x256xf32>
    %328 = arith.addf %323, %327 : vector<2x256xf32>
    %c30_164 = arith.constant 30 : index
    %329 = memref.load %arg3[%c30_164] : memref<98xf32, #tpu.memory_space<smem>>
    %c0_165 = arith.constant 0 : index
    %c66 = arith.constant 66 : index
    %330 = vector.load %arg7[%c0_165, %c66] : memref<2x358xf32, #tpu.memory_space<vmem>>, vector<2x256xf32>
    %331 = vector.broadcast %329 : f32 to vector<2x256xf32>
    %332 = arith.mulf %331, %330 : vector<2x256xf32>
    %333 = arith.addf %328, %332 : vector<2x256xf32>
    %c79 = arith.constant 79 : index
    %334 = memref.load %arg3[%c79] : memref<98xf32, #tpu.memory_space<smem>>
    %c0_166 = arith.constant 0 : index
    %c66_167 = arith.constant 66 : index
    %335 = vector.load %arg8[%c0_166, %c66_167] : memref<2x358xf32, #tpu.memory_space<vmem>>, vector<2x256xf32>
    %336 = vector.broadcast %334 : f32 to vector<2x256xf32>
    %337 = arith.mulf %336, %335 : vector<2x256xf32>
    %338 = arith.addf %333, %337 : vector<2x256xf32>
    %c37 = arith.constant 37 : index
    %339 = memref.load %arg3[%c37] : memref<98xf32, #tpu.memory_space<smem>>
    %c0_168 = arith.constant 0 : index
    %c82 = arith.constant 82 : index
    %340 = vector.load %arg7[%c0_168, %c82] : memref<2x358xf32, #tpu.memory_space<vmem>>, vector<2x256xf32>
    %341 = vector.broadcast %339 : f32 to vector<2x256xf32>
    %342 = arith.mulf %341, %340 : vector<2x256xf32>
    %343 = arith.addf %338, %342 : vector<2x256xf32>
    %c86 = arith.constant 86 : index
    %344 = memref.load %arg3[%c86] : memref<98xf32, #tpu.memory_space<smem>>
    %c0_169 = arith.constant 0 : index
    %c82_170 = arith.constant 82 : index
    %345 = vector.load %arg8[%c0_169, %c82_170] : memref<2x358xf32, #tpu.memory_space<vmem>>, vector<2x256xf32>
    %346 = vector.broadcast %344 : f32 to vector<2x256xf32>
    %347 = arith.mulf %346, %345 : vector<2x256xf32>
    %348 = arith.addf %343, %347 : vector<2x256xf32>
    %c44 = arith.constant 44 : index
    %349 = memref.load %arg3[%c44] : memref<98xf32, #tpu.memory_space<smem>>
    %c0_171 = arith.constant 0 : index
    %c98 = arith.constant 98 : index
    %350 = vector.load %arg7[%c0_171, %c98] : memref<2x358xf32, #tpu.memory_space<vmem>>, vector<2x256xf32>
    %351 = vector.broadcast %349 : f32 to vector<2x256xf32>
    %352 = arith.mulf %351, %350 : vector<2x256xf32>
    %353 = arith.addf %348, %352 : vector<2x256xf32>
    %c93 = arith.constant 93 : index
    %354 = memref.load %arg3[%c93] : memref<98xf32, #tpu.memory_space<smem>>
    %c0_172 = arith.constant 0 : index
    %c98_173 = arith.constant 98 : index
    %355 = vector.load %arg8[%c0_172, %c98_173] : memref<2x358xf32, #tpu.memory_space<vmem>>, vector<2x256xf32>
    %356 = vector.broadcast %354 : f32 to vector<2x256xf32>
    %357 = arith.mulf %356, %355 : vector<2x256xf32>
    %358 = arith.addf %353, %357 : vector<2x256xf32>
    %359 = vector.broadcast %287 : vector<1x256xf32> to vector<2x256xf32>
    %360 = arith.mulf %358, %359 : vector<2x256xf32>
    %361 = arith.addf %286, %360 : vector<2x256xf32>
    %c3_174 = arith.constant 3 : index
    %c0_175 = arith.constant 0 : index
    %362 = vector.load %arg2[%c3_174, %c0_175] : memref<7x256xf32, #tpu.memory_space<vmem>>, vector<1x256xf32>
    %cst_176 = arith.constant 0.000000e+00 : f32
    %363 = vector.broadcast %cst_176 : f32 to vector<2x256xf32>
    %c3_177 = arith.constant 3 : index
    %364 = memref.load %arg3[%c3_177] : memref<98xf32, #tpu.memory_space<smem>>
    %c0_178 = arith.constant 0 : index
    %c3_179 = arith.constant 3 : index
    %365 = vector.load %arg7[%c0_178, %c3_179] : memref<2x358xf32, #tpu.memory_space<vmem>>, vector<2x256xf32>
    %366 = vector.broadcast %364 : f32 to vector<2x256xf32>
    %367 = arith.mulf %366, %365 : vector<2x256xf32>
    %368 = arith.addf %363, %367 : vector<2x256xf32>
    %c52 = arith.constant 52 : index
    %369 = memref.load %arg3[%c52] : memref<98xf32, #tpu.memory_space<smem>>
    %c0_180 = arith.constant 0 : index
    %c3_181 = arith.constant 3 : index
    %370 = vector.load %arg8[%c0_180, %c3_181] : memref<2x358xf32, #tpu.memory_space<vmem>>, vector<2x256xf32>
    %371 = vector.broadcast %369 : f32 to vector<2x256xf32>
    %372 = arith.mulf %371, %370 : vector<2x256xf32>
    %373 = arith.addf %368, %372 : vector<2x256xf32>
    %c10_182 = arith.constant 10 : index
    %374 = memref.load %arg3[%c10_182] : memref<98xf32, #tpu.memory_space<smem>>
    %c0_183 = arith.constant 0 : index
    %c19_184 = arith.constant 19 : index
    %375 = vector.load %arg7[%c0_183, %c19_184] : memref<2x358xf32, #tpu.memory_space<vmem>>, vector<2x256xf32>
    %376 = vector.broadcast %374 : f32 to vector<2x256xf32>
    %377 = arith.mulf %376, %375 : vector<2x256xf32>
    %378 = arith.addf %373, %377 : vector<2x256xf32>
    %c59 = arith.constant 59 : index
    %379 = memref.load %arg3[%c59] : memref<98xf32, #tpu.memory_space<smem>>
    %c0_185 = arith.constant 0 : index
    %c19_186 = arith.constant 19 : index
    %380 = vector.load %arg8[%c0_185, %c19_186] : memref<2x358xf32, #tpu.memory_space<vmem>>, vector<2x256xf32>
    %381 = vector.broadcast %379 : f32 to vector<2x256xf32>
    %382 = arith.mulf %381, %380 : vector<2x256xf32>
    %383 = arith.addf %378, %382 : vector<2x256xf32>
    %c17_187 = arith.constant 17 : index
    %384 = memref.load %arg3[%c17_187] : memref<98xf32, #tpu.memory_space<smem>>
    %c0_188 = arith.constant 0 : index
    %c35_189 = arith.constant 35 : index
    %385 = vector.load %arg7[%c0_188, %c35_189] : memref<2x358xf32, #tpu.memory_space<vmem>>, vector<2x256xf32>
    %386 = vector.broadcast %384 : f32 to vector<2x256xf32>
    %387 = arith.mulf %386, %385 : vector<2x256xf32>
    %388 = arith.addf %383, %387 : vector<2x256xf32>
    %c66_190 = arith.constant 66 : index
    %389 = memref.load %arg3[%c66_190] : memref<98xf32, #tpu.memory_space<smem>>
    %c0_191 = arith.constant 0 : index
    %c35_192 = arith.constant 35 : index
    %390 = vector.load %arg8[%c0_191, %c35_192] : memref<2x358xf32, #tpu.memory_space<vmem>>, vector<2x256xf32>
    %391 = vector.broadcast %389 : f32 to vector<2x256xf32>
    %392 = arith.mulf %391, %390 : vector<2x256xf32>
    %393 = arith.addf %388, %392 : vector<2x256xf32>
    %c24_193 = arith.constant 24 : index
    %394 = memref.load %arg3[%c24_193] : memref<98xf32, #tpu.memory_space<smem>>
    %c0_194 = arith.constant 0 : index
    %c51_195 = arith.constant 51 : index
    %395 = vector.load %arg7[%c0_194, %c51_195] : memref<2x358xf32, #tpu.memory_space<vmem>>, vector<2x256xf32>
    %396 = vector.broadcast %394 : f32 to vector<2x256xf32>
    %397 = arith.mulf %396, %395 : vector<2x256xf32>
    %398 = arith.addf %393, %397 : vector<2x256xf32>
    %c73 = arith.constant 73 : index
    %399 = memref.load %arg3[%c73] : memref<98xf32, #tpu.memory_space<smem>>
    %c0_196 = arith.constant 0 : index
    %c51_197 = arith.constant 51 : index
    %400 = vector.load %arg8[%c0_196, %c51_197] : memref<2x358xf32, #tpu.memory_space<vmem>>, vector<2x256xf32>
    %401 = vector.broadcast %399 : f32 to vector<2x256xf32>
    %402 = arith.mulf %401, %400 : vector<2x256xf32>
    %403 = arith.addf %398, %402 : vector<2x256xf32>
    %c31_198 = arith.constant 31 : index
    %404 = memref.load %arg3[%c31_198] : memref<98xf32, #tpu.memory_space<smem>>
    %c0_199 = arith.constant 0 : index
    %c67 = arith.constant 67 : index
    %405 = vector.load %arg7[%c0_199, %c67] : memref<2x358xf32, #tpu.memory_space<vmem>>, vector<2x256xf32>
    %406 = vector.broadcast %404 : f32 to vector<2x256xf32>
    %407 = arith.mulf %406, %405 : vector<2x256xf32>
    %408 = arith.addf %403, %407 : vector<2x256xf32>
    %c80_200 = arith.constant 80 : index
    %409 = memref.load %arg3[%c80_200] : memref<98xf32, #tpu.memory_space<smem>>
    %c0_201 = arith.constant 0 : index
    %c67_202 = arith.constant 67 : index
    %410 = vector.load %arg8[%c0_201, %c67_202] : memref<2x358xf32, #tpu.memory_space<vmem>>, vector<2x256xf32>
    %411 = vector.broadcast %409 : f32 to vector<2x256xf32>
    %412 = arith.mulf %411, %410 : vector<2x256xf32>
    %413 = arith.addf %408, %412 : vector<2x256xf32>
    %c38 = arith.constant 38 : index
    %414 = memref.load %arg3[%c38] : memref<98xf32, #tpu.memory_space<smem>>
    %c0_203 = arith.constant 0 : index
    %c83 = arith.constant 83 : index
    %415 = vector.load %arg7[%c0_203, %c83] : memref<2x358xf32, #tpu.memory_space<vmem>>, vector<2x256xf32>
    %416 = vector.broadcast %414 : f32 to vector<2x256xf32>
    %417 = arith.mulf %416, %415 : vector<2x256xf32>
    %418 = arith.addf %413, %417 : vector<2x256xf32>
    %c87 = arith.constant 87 : index
    %419 = memref.load %arg3[%c87] : memref<98xf32, #tpu.memory_space<smem>>
    %c0_204 = arith.constant 0 : index
    %c83_205 = arith.constant 83 : index
    %420 = vector.load %arg8[%c0_204, %c83_205] : memref<2x358xf32, #tpu.memory_space<vmem>>, vector<2x256xf32>
    %421 = vector.broadcast %419 : f32 to vector<2x256xf32>
    %422 = arith.mulf %421, %420 : vector<2x256xf32>
    %423 = arith.addf %418, %422 : vector<2x256xf32>
    %c45 = arith.constant 45 : index
    %424 = memref.load %arg3[%c45] : memref<98xf32, #tpu.memory_space<smem>>
    %c0_206 = arith.constant 0 : index
    %c99 = arith.constant 99 : index
    %425 = vector.load %arg7[%c0_206, %c99] : memref<2x358xf32, #tpu.memory_space<vmem>>, vector<2x256xf32>
    %426 = vector.broadcast %424 : f32 to vector<2x256xf32>
    %427 = arith.mulf %426, %425 : vector<2x256xf32>
    %428 = arith.addf %423, %427 : vector<2x256xf32>
    %c94 = arith.constant 94 : index
    %429 = memref.load %arg3[%c94] : memref<98xf32, #tpu.memory_space<smem>>
    %c0_207 = arith.constant 0 : index
    %c99_208 = arith.constant 99 : index
    %430 = vector.load %arg8[%c0_207, %c99_208] : memref<2x358xf32, #tpu.memory_space<vmem>>, vector<2x256xf32>
    %431 = vector.broadcast %429 : f32 to vector<2x256xf32>
    %432 = arith.mulf %431, %430 : vector<2x256xf32>
    %433 = arith.addf %428, %432 : vector<2x256xf32>
    %434 = vector.broadcast %362 : vector<1x256xf32> to vector<2x256xf32>
    %435 = arith.mulf %433, %434 : vector<2x256xf32>
    %436 = arith.addf %361, %435 : vector<2x256xf32>
    %c4_209 = arith.constant 4 : index
    %c0_210 = arith.constant 0 : index
    %437 = vector.load %arg2[%c4_209, %c0_210] : memref<7x256xf32, #tpu.memory_space<vmem>>, vector<1x256xf32>
    %cst_211 = arith.constant 0.000000e+00 : f32
    %438 = vector.broadcast %cst_211 : f32 to vector<2x256xf32>
    %c4_212 = arith.constant 4 : index
    %439 = memref.load %arg3[%c4_212] : memref<98xf32, #tpu.memory_space<smem>>
    %c0_213 = arith.constant 0 : index
    %c4_214 = arith.constant 4 : index
    %440 = vector.load %arg7[%c0_213, %c4_214] : memref<2x358xf32, #tpu.memory_space<vmem>>, vector<2x256xf32>
    %441 = vector.broadcast %439 : f32 to vector<2x256xf32>
    %442 = arith.mulf %441, %440 : vector<2x256xf32>
    %443 = arith.addf %438, %442 : vector<2x256xf32>
    %c53 = arith.constant 53 : index
    %444 = memref.load %arg3[%c53] : memref<98xf32, #tpu.memory_space<smem>>
    %c0_215 = arith.constant 0 : index
    %c4_216 = arith.constant 4 : index
    %445 = vector.load %arg8[%c0_215, %c4_216] : memref<2x358xf32, #tpu.memory_space<vmem>>, vector<2x256xf32>
    %446 = vector.broadcast %444 : f32 to vector<2x256xf32>
    %447 = arith.mulf %446, %445 : vector<2x256xf32>
    %448 = arith.addf %443, %447 : vector<2x256xf32>
    %c11_217 = arith.constant 11 : index
    %449 = memref.load %arg3[%c11_217] : memref<98xf32, #tpu.memory_space<smem>>
    %c0_218 = arith.constant 0 : index
    %c20_219 = arith.constant 20 : index
    %450 = vector.load %arg7[%c0_218, %c20_219] : memref<2x358xf32, #tpu.memory_space<vmem>>, vector<2x256xf32>
    %451 = vector.broadcast %449 : f32 to vector<2x256xf32>
    %452 = arith.mulf %451, %450 : vector<2x256xf32>
    %453 = arith.addf %448, %452 : vector<2x256xf32>
    %c60 = arith.constant 60 : index
    %454 = memref.load %arg3[%c60] : memref<98xf32, #tpu.memory_space<smem>>
    %c0_220 = arith.constant 0 : index
    %c20_221 = arith.constant 20 : index
    %455 = vector.load %arg8[%c0_220, %c20_221] : memref<2x358xf32, #tpu.memory_space<vmem>>, vector<2x256xf32>
    %456 = vector.broadcast %454 : f32 to vector<2x256xf32>
    %457 = arith.mulf %456, %455 : vector<2x256xf32>
    %458 = arith.addf %453, %457 : vector<2x256xf32>
    %c18_222 = arith.constant 18 : index
    %459 = memref.load %arg3[%c18_222] : memref<98xf32, #tpu.memory_space<smem>>
    %c0_223 = arith.constant 0 : index
    %c36_224 = arith.constant 36 : index
    %460 = vector.load %arg7[%c0_223, %c36_224] : memref<2x358xf32, #tpu.memory_space<vmem>>, vector<2x256xf32>
    %461 = vector.broadcast %459 : f32 to vector<2x256xf32>
    %462 = arith.mulf %461, %460 : vector<2x256xf32>
    %463 = arith.addf %458, %462 : vector<2x256xf32>
    %c67_225 = arith.constant 67 : index
    %464 = memref.load %arg3[%c67_225] : memref<98xf32, #tpu.memory_space<smem>>
    %c0_226 = arith.constant 0 : index
    %c36_227 = arith.constant 36 : index
    %465 = vector.load %arg8[%c0_226, %c36_227] : memref<2x358xf32, #tpu.memory_space<vmem>>, vector<2x256xf32>
    %466 = vector.broadcast %464 : f32 to vector<2x256xf32>
    %467 = arith.mulf %466, %465 : vector<2x256xf32>
    %468 = arith.addf %463, %467 : vector<2x256xf32>
    %c25_228 = arith.constant 25 : index
    %469 = memref.load %arg3[%c25_228] : memref<98xf32, #tpu.memory_space<smem>>
    %c0_229 = arith.constant 0 : index
    %c52_230 = arith.constant 52 : index
    %470 = vector.load %arg7[%c0_229, %c52_230] : memref<2x358xf32, #tpu.memory_space<vmem>>, vector<2x256xf32>
    %471 = vector.broadcast %469 : f32 to vector<2x256xf32>
    %472 = arith.mulf %471, %470 : vector<2x256xf32>
    %473 = arith.addf %468, %472 : vector<2x256xf32>
    %c74 = arith.constant 74 : index
    %474 = memref.load %arg3[%c74] : memref<98xf32, #tpu.memory_space<smem>>
    %c0_231 = arith.constant 0 : index
    %c52_232 = arith.constant 52 : index
    %475 = vector.load %arg8[%c0_231, %c52_232] : memref<2x358xf32, #tpu.memory_space<vmem>>, vector<2x256xf32>
    %476 = vector.broadcast %474 : f32 to vector<2x256xf32>
    %477 = arith.mulf %476, %475 : vector<2x256xf32>
    %478 = arith.addf %473, %477 : vector<2x256xf32>
    %c32_233 = arith.constant 32 : index
    %479 = memref.load %arg3[%c32_233] : memref<98xf32, #tpu.memory_space<smem>>
    %c0_234 = arith.constant 0 : index
    %c68 = arith.constant 68 : index
    %480 = vector.load %arg7[%c0_234, %c68] : memref<2x358xf32, #tpu.memory_space<vmem>>, vector<2x256xf32>
    %481 = vector.broadcast %479 : f32 to vector<2x256xf32>
    %482 = arith.mulf %481, %480 : vector<2x256xf32>
    %483 = arith.addf %478, %482 : vector<2x256xf32>
    %c81_235 = arith.constant 81 : index
    %484 = memref.load %arg3[%c81_235] : memref<98xf32, #tpu.memory_space<smem>>
    %c0_236 = arith.constant 0 : index
    %c68_237 = arith.constant 68 : index
    %485 = vector.load %arg8[%c0_236, %c68_237] : memref<2x358xf32, #tpu.memory_space<vmem>>, vector<2x256xf32>
    %486 = vector.broadcast %484 : f32 to vector<2x256xf32>
    %487 = arith.mulf %486, %485 : vector<2x256xf32>
    %488 = arith.addf %483, %487 : vector<2x256xf32>
    %c39 = arith.constant 39 : index
    %489 = memref.load %arg3[%c39] : memref<98xf32, #tpu.memory_space<smem>>
    %c0_238 = arith.constant 0 : index
    %c84_239 = arith.constant 84 : index
    %490 = vector.load %arg7[%c0_238, %c84_239] : memref<2x358xf32, #tpu.memory_space<vmem>>, vector<2x256xf32>
    %491 = vector.broadcast %489 : f32 to vector<2x256xf32>
    %492 = arith.mulf %491, %490 : vector<2x256xf32>
    %493 = arith.addf %488, %492 : vector<2x256xf32>
    %c88 = arith.constant 88 : index
    %494 = memref.load %arg3[%c88] : memref<98xf32, #tpu.memory_space<smem>>
    %c0_240 = arith.constant 0 : index
    %c84_241 = arith.constant 84 : index
    %495 = vector.load %arg8[%c0_240, %c84_241] : memref<2x358xf32, #tpu.memory_space<vmem>>, vector<2x256xf32>
    %496 = vector.broadcast %494 : f32 to vector<2x256xf32>
    %497 = arith.mulf %496, %495 : vector<2x256xf32>
    %498 = arith.addf %493, %497 : vector<2x256xf32>
    %c46 = arith.constant 46 : index
    %499 = memref.load %arg3[%c46] : memref<98xf32, #tpu.memory_space<smem>>
    %c0_242 = arith.constant 0 : index
    %c100 = arith.constant 100 : index
    %500 = vector.load %arg7[%c0_242, %c100] : memref<2x358xf32, #tpu.memory_space<vmem>>, vector<2x256xf32>
    %501 = vector.broadcast %499 : f32 to vector<2x256xf32>
    %502 = arith.mulf %501, %500 : vector<2x256xf32>
    %503 = arith.addf %498, %502 : vector<2x256xf32>
    %c95 = arith.constant 95 : index
    %504 = memref.load %arg3[%c95] : memref<98xf32, #tpu.memory_space<smem>>
    %c0_243 = arith.constant 0 : index
    %c100_244 = arith.constant 100 : index
    %505 = vector.load %arg8[%c0_243, %c100_244] : memref<2x358xf32, #tpu.memory_space<vmem>>, vector<2x256xf32>
    %506 = vector.broadcast %504 : f32 to vector<2x256xf32>
    %507 = arith.mulf %506, %505 : vector<2x256xf32>
    %508 = arith.addf %503, %507 : vector<2x256xf32>
    %509 = vector.broadcast %437 : vector<1x256xf32> to vector<2x256xf32>
    %510 = arith.mulf %508, %509 : vector<2x256xf32>
    %511 = arith.addf %436, %510 : vector<2x256xf32>
    %c5_245 = arith.constant 5 : index
    %c0_246 = arith.constant 0 : index
    %512 = vector.load %arg2[%c5_245, %c0_246] : memref<7x256xf32, #tpu.memory_space<vmem>>, vector<1x256xf32>
    %cst_247 = arith.constant 0.000000e+00 : f32
    %513 = vector.broadcast %cst_247 : f32 to vector<2x256xf32>
    %c5_248 = arith.constant 5 : index
    %514 = memref.load %arg3[%c5_248] : memref<98xf32, #tpu.memory_space<smem>>
    %c0_249 = arith.constant 0 : index
    %c5_250 = arith.constant 5 : index
    %515 = vector.load %arg7[%c0_249, %c5_250] : memref<2x358xf32, #tpu.memory_space<vmem>>, vector<2x256xf32>
    %516 = vector.broadcast %514 : f32 to vector<2x256xf32>
    %517 = arith.mulf %516, %515 : vector<2x256xf32>
    %518 = arith.addf %513, %517 : vector<2x256xf32>
    %c54 = arith.constant 54 : index
    %519 = memref.load %arg3[%c54] : memref<98xf32, #tpu.memory_space<smem>>
    %c0_251 = arith.constant 0 : index
    %c5_252 = arith.constant 5 : index
    %520 = vector.load %arg8[%c0_251, %c5_252] : memref<2x358xf32, #tpu.memory_space<vmem>>, vector<2x256xf32>
    %521 = vector.broadcast %519 : f32 to vector<2x256xf32>
    %522 = arith.mulf %521, %520 : vector<2x256xf32>
    %523 = arith.addf %518, %522 : vector<2x256xf32>
    %c12_253 = arith.constant 12 : index
    %524 = memref.load %arg3[%c12_253] : memref<98xf32, #tpu.memory_space<smem>>
    %c0_254 = arith.constant 0 : index
    %c21_255 = arith.constant 21 : index
    %525 = vector.load %arg7[%c0_254, %c21_255] : memref<2x358xf32, #tpu.memory_space<vmem>>, vector<2x256xf32>
    %526 = vector.broadcast %524 : f32 to vector<2x256xf32>
    %527 = arith.mulf %526, %525 : vector<2x256xf32>
    %528 = arith.addf %523, %527 : vector<2x256xf32>
    %c61 = arith.constant 61 : index
    %529 = memref.load %arg3[%c61] : memref<98xf32, #tpu.memory_space<smem>>
    %c0_256 = arith.constant 0 : index
    %c21_257 = arith.constant 21 : index
    %530 = vector.load %arg8[%c0_256, %c21_257] : memref<2x358xf32, #tpu.memory_space<vmem>>, vector<2x256xf32>
    %531 = vector.broadcast %529 : f32 to vector<2x256xf32>
    %532 = arith.mulf %531, %530 : vector<2x256xf32>
    %533 = arith.addf %528, %532 : vector<2x256xf32>
    %c19_258 = arith.constant 19 : index
    %534 = memref.load %arg3[%c19_258] : memref<98xf32, #tpu.memory_space<smem>>
    %c0_259 = arith.constant 0 : index
    %c37_260 = arith.constant 37 : index
    %535 = vector.load %arg7[%c0_259, %c37_260] : memref<2x358xf32, #tpu.memory_space<vmem>>, vector<2x256xf32>
    %536 = vector.broadcast %534 : f32 to vector<2x256xf32>
    %537 = arith.mulf %536, %535 : vector<2x256xf32>
    %538 = arith.addf %533, %537 : vector<2x256xf32>
    %c68_261 = arith.constant 68 : index
    %539 = memref.load %arg3[%c68_261] : memref<98xf32, #tpu.memory_space<smem>>
    %c0_262 = arith.constant 0 : index
    %c37_263 = arith.constant 37 : index
    %540 = vector.load %arg8[%c0_262, %c37_263] : memref<2x358xf32, #tpu.memory_space<vmem>>, vector<2x256xf32>
    %541 = vector.broadcast %539 : f32 to vector<2x256xf32>
    %542 = arith.mulf %541, %540 : vector<2x256xf32>
    %543 = arith.addf %538, %542 : vector<2x256xf32>
    %c26_264 = arith.constant 26 : index
    %544 = memref.load %arg3[%c26_264] : memref<98xf32, #tpu.memory_space<smem>>
    %c0_265 = arith.constant 0 : index
    %c53_266 = arith.constant 53 : index
    %545 = vector.load %arg7[%c0_265, %c53_266] : memref<2x358xf32, #tpu.memory_space<vmem>>, vector<2x256xf32>
    %546 = vector.broadcast %544 : f32 to vector<2x256xf32>
    %547 = arith.mulf %546, %545 : vector<2x256xf32>
    %548 = arith.addf %543, %547 : vector<2x256xf32>
    %c75 = arith.constant 75 : index
    %549 = memref.load %arg3[%c75] : memref<98xf32, #tpu.memory_space<smem>>
    %c0_267 = arith.constant 0 : index
    %c53_268 = arith.constant 53 : index
    %550 = vector.load %arg8[%c0_267, %c53_268] : memref<2x358xf32, #tpu.memory_space<vmem>>, vector<2x256xf32>
    %551 = vector.broadcast %549 : f32 to vector<2x256xf32>
    %552 = arith.mulf %551, %550 : vector<2x256xf32>
    %553 = arith.addf %548, %552 : vector<2x256xf32>
    %c33_269 = arith.constant 33 : index
    %554 = memref.load %arg3[%c33_269] : memref<98xf32, #tpu.memory_space<smem>>
    %c0_270 = arith.constant 0 : index
    %c69 = arith.constant 69 : index
    %555 = vector.load %arg7[%c0_270, %c69] : memref<2x358xf32, #tpu.memory_space<vmem>>, vector<2x256xf32>
    %556 = vector.broadcast %554 : f32 to vector<2x256xf32>
    %557 = arith.mulf %556, %555 : vector<2x256xf32>
    %558 = arith.addf %553, %557 : vector<2x256xf32>
    %c82_271 = arith.constant 82 : index
    %559 = memref.load %arg3[%c82_271] : memref<98xf32, #tpu.memory_space<smem>>
    %c0_272 = arith.constant 0 : index
    %c69_273 = arith.constant 69 : index
    %560 = vector.load %arg8[%c0_272, %c69_273] : memref<2x358xf32, #tpu.memory_space<vmem>>, vector<2x256xf32>
    %561 = vector.broadcast %559 : f32 to vector<2x256xf32>
    %562 = arith.mulf %561, %560 : vector<2x256xf32>
    %563 = arith.addf %558, %562 : vector<2x256xf32>
    %c40 = arith.constant 40 : index
    %564 = memref.load %arg3[%c40] : memref<98xf32, #tpu.memory_space<smem>>
    %c0_274 = arith.constant 0 : index
    %c85_275 = arith.constant 85 : index
    %565 = vector.load %arg7[%c0_274, %c85_275] : memref<2x358xf32, #tpu.memory_space<vmem>>, vector<2x256xf32>
    %566 = vector.broadcast %564 : f32 to vector<2x256xf32>
    %567 = arith.mulf %566, %565 : vector<2x256xf32>
    %568 = arith.addf %563, %567 : vector<2x256xf32>
    %c89 = arith.constant 89 : index
    %569 = memref.load %arg3[%c89] : memref<98xf32, #tpu.memory_space<smem>>
    %c0_276 = arith.constant 0 : index
    %c85_277 = arith.constant 85 : index
    %570 = vector.load %arg8[%c0_276, %c85_277] : memref<2x358xf32, #tpu.memory_space<vmem>>, vector<2x256xf32>
    %571 = vector.broadcast %569 : f32 to vector<2x256xf32>
    %572 = arith.mulf %571, %570 : vector<2x256xf32>
    %573 = arith.addf %568, %572 : vector<2x256xf32>
    %c47 = arith.constant 47 : index
    %574 = memref.load %arg3[%c47] : memref<98xf32, #tpu.memory_space<smem>>
    %c0_278 = arith.constant 0 : index
    %c101 = arith.constant 101 : index
    %575 = vector.load %arg7[%c0_278, %c101] : memref<2x358xf32, #tpu.memory_space<vmem>>, vector<2x256xf32>
    %576 = vector.broadcast %574 : f32 to vector<2x256xf32>
    %577 = arith.mulf %576, %575 : vector<2x256xf32>
    %578 = arith.addf %573, %577 : vector<2x256xf32>
    %c96_279 = arith.constant 96 : index
    %579 = memref.load %arg3[%c96_279] : memref<98xf32, #tpu.memory_space<smem>>
    %c0_280 = arith.constant 0 : index
    %c101_281 = arith.constant 101 : index
    %580 = vector.load %arg8[%c0_280, %c101_281] : memref<2x358xf32, #tpu.memory_space<vmem>>, vector<2x256xf32>
    %581 = vector.broadcast %579 : f32 to vector<2x256xf32>
    %582 = arith.mulf %581, %580 : vector<2x256xf32>
    %583 = arith.addf %578, %582 : vector<2x256xf32>
    %584 = vector.broadcast %512 : vector<1x256xf32> to vector<2x256xf32>
    %585 = arith.mulf %583, %584 : vector<2x256xf32>
    %586 = arith.addf %511, %585 : vector<2x256xf32>
    %c6_282 = arith.constant 6 : index
    %c0_283 = arith.constant 0 : index
    %587 = vector.load %arg2[%c6_282, %c0_283] : memref<7x256xf32, #tpu.memory_space<vmem>>, vector<1x256xf32>
    %cst_284 = arith.constant 0.000000e+00 : f32
    %588 = vector.broadcast %cst_284 : f32 to vector<2x256xf32>
    %c6_285 = arith.constant 6 : index
    %589 = memref.load %arg3[%c6_285] : memref<98xf32, #tpu.memory_space<smem>>
    %c0_286 = arith.constant 0 : index
    %c6_287 = arith.constant 6 : index
    %590 = vector.load %arg7[%c0_286, %c6_287] : memref<2x358xf32, #tpu.memory_space<vmem>>, vector<2x256xf32>
    %591 = vector.broadcast %589 : f32 to vector<2x256xf32>
    %592 = arith.mulf %591, %590 : vector<2x256xf32>
    %593 = arith.addf %588, %592 : vector<2x256xf32>
    %c55 = arith.constant 55 : index
    %594 = memref.load %arg3[%c55] : memref<98xf32, #tpu.memory_space<smem>>
    %c0_288 = arith.constant 0 : index
    %c6_289 = arith.constant 6 : index
    %595 = vector.load %arg8[%c0_288, %c6_289] : memref<2x358xf32, #tpu.memory_space<vmem>>, vector<2x256xf32>
    %596 = vector.broadcast %594 : f32 to vector<2x256xf32>
    %597 = arith.mulf %596, %595 : vector<2x256xf32>
    %598 = arith.addf %593, %597 : vector<2x256xf32>
    %c13_290 = arith.constant 13 : index
    %599 = memref.load %arg3[%c13_290] : memref<98xf32, #tpu.memory_space<smem>>
    %c0_291 = arith.constant 0 : index
    %c22_292 = arith.constant 22 : index
    %600 = vector.load %arg7[%c0_291, %c22_292] : memref<2x358xf32, #tpu.memory_space<vmem>>, vector<2x256xf32>
    %601 = vector.broadcast %599 : f32 to vector<2x256xf32>
    %602 = arith.mulf %601, %600 : vector<2x256xf32>
    %603 = arith.addf %598, %602 : vector<2x256xf32>
    %c62 = arith.constant 62 : index
    %604 = memref.load %arg3[%c62] : memref<98xf32, #tpu.memory_space<smem>>
    %c0_293 = arith.constant 0 : index
    %c22_294 = arith.constant 22 : index
    %605 = vector.load %arg8[%c0_293, %c22_294] : memref<2x358xf32, #tpu.memory_space<vmem>>, vector<2x256xf32>
    %606 = vector.broadcast %604 : f32 to vector<2x256xf32>
    %607 = arith.mulf %606, %605 : vector<2x256xf32>
    %608 = arith.addf %603, %607 : vector<2x256xf32>
    %c20_295 = arith.constant 20 : index
    %609 = memref.load %arg3[%c20_295] : memref<98xf32, #tpu.memory_space<smem>>
    %c0_296 = arith.constant 0 : index
    %c38_297 = arith.constant 38 : index
    %610 = vector.load %arg7[%c0_296, %c38_297] : memref<2x358xf32, #tpu.memory_space<vmem>>, vector<2x256xf32>
    %611 = vector.broadcast %609 : f32 to vector<2x256xf32>
    %612 = arith.mulf %611, %610 : vector<2x256xf32>
    %613 = arith.addf %608, %612 : vector<2x256xf32>
    %c69_298 = arith.constant 69 : index
    %614 = memref.load %arg3[%c69_298] : memref<98xf32, #tpu.memory_space<smem>>
    %c0_299 = arith.constant 0 : index
    %c38_300 = arith.constant 38 : index
    %615 = vector.load %arg8[%c0_299, %c38_300] : memref<2x358xf32, #tpu.memory_space<vmem>>, vector<2x256xf32>
    %616 = vector.broadcast %614 : f32 to vector<2x256xf32>
    %617 = arith.mulf %616, %615 : vector<2x256xf32>
    %618 = arith.addf %613, %617 : vector<2x256xf32>
    %c27_301 = arith.constant 27 : index
    %619 = memref.load %arg3[%c27_301] : memref<98xf32, #tpu.memory_space<smem>>
    %c0_302 = arith.constant 0 : index
    %c54_303 = arith.constant 54 : index
    %620 = vector.load %arg7[%c0_302, %c54_303] : memref<2x358xf32, #tpu.memory_space<vmem>>, vector<2x256xf32>
    %621 = vector.broadcast %619 : f32 to vector<2x256xf32>
    %622 = arith.mulf %621, %620 : vector<2x256xf32>
    %623 = arith.addf %618, %622 : vector<2x256xf32>
    %c76 = arith.constant 76 : index
    %624 = memref.load %arg3[%c76] : memref<98xf32, #tpu.memory_space<smem>>
    %c0_304 = arith.constant 0 : index
    %c54_305 = arith.constant 54 : index
    %625 = vector.load %arg8[%c0_304, %c54_305] : memref<2x358xf32, #tpu.memory_space<vmem>>, vector<2x256xf32>
    %626 = vector.broadcast %624 : f32 to vector<2x256xf32>
    %627 = arith.mulf %626, %625 : vector<2x256xf32>
    %628 = arith.addf %623, %627 : vector<2x256xf32>
    %c34_306 = arith.constant 34 : index
    %629 = memref.load %arg3[%c34_306] : memref<98xf32, #tpu.memory_space<smem>>
    %c0_307 = arith.constant 0 : index
    %c70_308 = arith.constant 70 : index
    %630 = vector.load %arg7[%c0_307, %c70_308] : memref<2x358xf32, #tpu.memory_space<vmem>>, vector<2x256xf32>
    %631 = vector.broadcast %629 : f32 to vector<2x256xf32>
    %632 = arith.mulf %631, %630 : vector<2x256xf32>
    %633 = arith.addf %628, %632 : vector<2x256xf32>
    %c83_309 = arith.constant 83 : index
    %634 = memref.load %arg3[%c83_309] : memref<98xf32, #tpu.memory_space<smem>>
    %c0_310 = arith.constant 0 : index
    %c70_311 = arith.constant 70 : index
    %635 = vector.load %arg8[%c0_310, %c70_311] : memref<2x358xf32, #tpu.memory_space<vmem>>, vector<2x256xf32>
    %636 = vector.broadcast %634 : f32 to vector<2x256xf32>
    %637 = arith.mulf %636, %635 : vector<2x256xf32>
    %638 = arith.addf %633, %637 : vector<2x256xf32>
    %c41 = arith.constant 41 : index
    %639 = memref.load %arg3[%c41] : memref<98xf32, #tpu.memory_space<smem>>
    %c0_312 = arith.constant 0 : index
    %c86_313 = arith.constant 86 : index
    %640 = vector.load %arg7[%c0_312, %c86_313] : memref<2x358xf32, #tpu.memory_space<vmem>>, vector<2x256xf32>
    %641 = vector.broadcast %639 : f32 to vector<2x256xf32>
    %642 = arith.mulf %641, %640 : vector<2x256xf32>
    %643 = arith.addf %638, %642 : vector<2x256xf32>
    %c90 = arith.constant 90 : index
    %644 = memref.load %arg3[%c90] : memref<98xf32, #tpu.memory_space<smem>>
    %c0_314 = arith.constant 0 : index
    %c86_315 = arith.constant 86 : index
    %645 = vector.load %arg8[%c0_314, %c86_315] : memref<2x358xf32, #tpu.memory_space<vmem>>, vector<2x256xf32>
    %646 = vector.broadcast %644 : f32 to vector<2x256xf32>
    %647 = arith.mulf %646, %645 : vector<2x256xf32>
    %648 = arith.addf %643, %647 : vector<2x256xf32>
    %c48_316 = arith.constant 48 : index
    %649 = memref.load %arg3[%c48_316] : memref<98xf32, #tpu.memory_space<smem>>
    %c0_317 = arith.constant 0 : index
    %c102 = arith.constant 102 : index
    %650 = vector.load %arg7[%c0_317, %c102] : memref<2x358xf32, #tpu.memory_space<vmem>>, vector<2x256xf32>
    %651 = vector.broadcast %649 : f32 to vector<2x256xf32>
    %652 = arith.mulf %651, %650 : vector<2x256xf32>
    %653 = arith.addf %648, %652 : vector<2x256xf32>
    %c97_318 = arith.constant 97 : index
    %654 = memref.load %arg3[%c97_318] : memref<98xf32, #tpu.memory_space<smem>>
    %c0_319 = arith.constant 0 : index
    %c102_320 = arith.constant 102 : index
    %655 = vector.load %arg8[%c0_319, %c102_320] : memref<2x358xf32, #tpu.memory_space<vmem>>, vector<2x256xf32>
    %656 = vector.broadcast %654 : f32 to vector<2x256xf32>
    %657 = arith.mulf %656, %655 : vector<2x256xf32>
    %658 = arith.addf %653, %657 : vector<2x256xf32>
    %659 = vector.broadcast %587 : vector<1x256xf32> to vector<2x256xf32>
    %660 = arith.mulf %658, %659 : vector<2x256xf32>
    %661 = arith.addf %586, %660 : vector<2x256xf32>
    %662 = arith.negf %661 : vector<2x256xf32>
    %663 = math.exp %662 : vector<2x256xf32>
    %cst_321 = arith.constant 1.000000e+00 : f32
    %664 = vector.broadcast %cst_321 : f32 to vector<2x256xf32>
    %665 = arith.addf %664, %663 : vector<2x256xf32>
    %666 = arith.divf %664, %665 : vector<2x256xf32>
    %c0_322 = arith.constant 0 : index
    %c0_323 = arith.constant 0 : index
    %667 = vector.load %arg5[%c0_322, %c0_323] : memref<2x256xf32, #tpu.memory_space<vmem>>, vector<2x256xf32>
    tpu.vector_store %arg5[%c0_322, %c0_323], %666 {strides = array<i32>} : memref<2x256xf32, #tpu.memory_space<vmem>>, vector<2x256xf32>,
    %c0_324 = arith.constant 0 : index
    %c0_325 = arith.constant 0 : index
    %c0_326 = arith.constant 0 : index
    %668 = vector.load %arg1[%c0_324, %c0_325, %c0_326] : memref<2x32x256xf32, #tpu.memory_space<vmem>>, vector<2x1x256xf32>
    %669 = vector.shape_cast %668 : vector<2x1x256xf32> to vector<2x256xf32>
    %670 = arith.mulf %669, %666 : vector<2x256xf32>
    %c0_327 = arith.constant 0 : index
    %c0_328 = arith.constant 0 : index
    %c0_329 = arith.constant 0 : index
    %671 = vector.load %arg6[%c0_327, %c0_328, %c0_329] : memref<2x32x256xf32, #tpu.memory_space<vmem>>, vector<2x1x256xf32>
    %672 = vector.shape_cast %671 : vector<2x1x256xf32> to vector<2x256xf32>
    %673 = vector.shape_cast %670 : vector<2x256xf32> to vector<2x1x256xf32>
    tpu.vector_store %arg6[%c0_327, %c0_328, %c0_329], %673 {strides = array<i32>} : memref<2x32x256xf32, #tpu.memory_space<vmem>>, vector<2x1x256xf32>,
    %c0_330 = arith.constant 0 : index
    %c1_331 = arith.constant 1 : index
    %c0_332 = arith.constant 0 : index
    %674 = vector.load %arg1[%c0_330, %c1_331, %c0_332] : memref<2x32x256xf32, #tpu.memory_space<vmem>>, vector<2x1x256xf32>
    %675 = vector.shape_cast %674 : vector<2x1x256xf32> to vector<2x256xf32>
    %676 = arith.mulf %675, %666 : vector<2x256xf32>
    %c0_333 = arith.constant 0 : index
    %c1_334 = arith.constant 1 : index
    %c0_335 = arith.constant 0 : index
    %677 = vector.load %arg6[%c0_333, %c1_334, %c0_335] : memref<2x32x256xf32, #tpu.memory_space<vmem>>, vector<2x1x256xf32>
    %678 = vector.shape_cast %677 : vector<2x1x256xf32> to vector<2x256xf32>
    %679 = vector.shape_cast %676 : vector<2x256xf32> to vector<2x1x256xf32>
    tpu.vector_store %arg6[%c0_333, %c1_334, %c0_335], %679 {strides = array<i32>} : memref<2x32x256xf32, #tpu.memory_space<vmem>>, vector<2x1x256xf32>,
    %c0_336 = arith.constant 0 : index
    %c2_337 = arith.constant 2 : index
    %c0_338 = arith.constant 0 : index
    %680 = vector.load %arg1[%c0_336, %c2_337, %c0_338] : memref<2x32x256xf32, #tpu.memory_space<vmem>>, vector<2x1x256xf32>
    %681 = vector.shape_cast %680 : vector<2x1x256xf32> to vector<2x256xf32>
    %682 = arith.mulf %681, %666 : vector<2x256xf32>
    %c0_339 = arith.constant 0 : index
    %c2_340 = arith.constant 2 : index
    %c0_341 = arith.constant 0 : index
    %683 = vector.load %arg6[%c0_339, %c2_340, %c0_341] : memref<2x32x256xf32, #tpu.memory_space<vmem>>, vector<2x1x256xf32>
    %684 = vector.shape_cast %683 : vector<2x1x256xf32> to vector<2x256xf32>
    %685 = vector.shape_cast %682 : vector<2x256xf32> to vector<2x1x256xf32>
    tpu.vector_store %arg6[%c0_339, %c2_340, %c0_341], %685 {strides = array<i32>} : memref<2x32x256xf32, #tpu.memory_space<vmem>>, vector<2x1x256xf32>,
    %c0_342 = arith.constant 0 : index
    %c3_343 = arith.constant 3 : index
    %c0_344 = arith.constant 0 : index
    %686 = vector.load %arg1[%c0_342, %c3_343, %c0_344] : memref<2x32x256xf32, #tpu.memory_space<vmem>>, vector<2x1x256xf32>
    %687 = vector.shape_cast %686 : vector<2x1x256xf32> to vector<2x256xf32>
    %688 = arith.mulf %687, %666 : vector<2x256xf32>
    %c0_345 = arith.constant 0 : index
    %c3_346 = arith.constant 3 : index
    %c0_347 = arith.constant 0 : index
    %689 = vector.load %arg6[%c0_345, %c3_346, %c0_347] : memref<2x32x256xf32, #tpu.memory_space<vmem>>, vector<2x1x256xf32>
    %690 = vector.shape_cast %689 : vector<2x1x256xf32> to vector<2x256xf32>
    %691 = vector.shape_cast %688 : vector<2x256xf32> to vector<2x1x256xf32>
    tpu.vector_store %arg6[%c0_345, %c3_346, %c0_347], %691 {strides = array<i32>} : memref<2x32x256xf32, #tpu.memory_space<vmem>>, vector<2x1x256xf32>,
    %c0_348 = arith.constant 0 : index
    %c4_349 = arith.constant 4 : index
    %c0_350 = arith.constant 0 : index
    %692 = vector.load %arg1[%c0_348, %c4_349, %c0_350] : memref<2x32x256xf32, #tpu.memory_space<vmem>>, vector<2x1x256xf32>
    %693 = vector.shape_cast %692 : vector<2x1x256xf32> to vector<2x256xf32>
    %694 = arith.mulf %693, %666 : vector<2x256xf32>
    %c0_351 = arith.constant 0 : index
    %c4_352 = arith.constant 4 : index
    %c0_353 = arith.constant 0 : index
    %695 = vector.load %arg6[%c0_351, %c4_352, %c0_353] : memref<2x32x256xf32, #tpu.memory_space<vmem>>, vector<2x1x256xf32>
    %696 = vector.shape_cast %695 : vector<2x1x256xf32> to vector<2x256xf32>
    %697 = vector.shape_cast %694 : vector<2x256xf32> to vector<2x1x256xf32>
    tpu.vector_store %arg6[%c0_351, %c4_352, %c0_353], %697 {strides = array<i32>} : memref<2x32x256xf32, #tpu.memory_space<vmem>>, vector<2x1x256xf32>,
    %c0_354 = arith.constant 0 : index
    %c5_355 = arith.constant 5 : index
    %c0_356 = arith.constant 0 : index
    %698 = vector.load %arg1[%c0_354, %c5_355, %c0_356] : memref<2x32x256xf32, #tpu.memory_space<vmem>>, vector<2x1x256xf32>
    %699 = vector.shape_cast %698 : vector<2x1x256xf32> to vector<2x256xf32>
    %700 = arith.mulf %699, %666 : vector<2x256xf32>
    %c0_357 = arith.constant 0 : index
    %c5_358 = arith.constant 5 : index
    %c0_359 = arith.constant 0 : index
    %701 = vector.load %arg6[%c0_357, %c5_358, %c0_359] : memref<2x32x256xf32, #tpu.memory_space<vmem>>, vector<2x1x256xf32>
    %702 = vector.shape_cast %701 : vector<2x1x256xf32> to vector<2x256xf32>
    %703 = vector.shape_cast %700 : vector<2x256xf32> to vector<2x1x256xf32>
    tpu.vector_store %arg6[%c0_357, %c5_358, %c0_359], %703 {strides = array<i32>} : memref<2x32x256xf32, #tpu.memory_space<vmem>>, vector<2x1x256xf32>,
    %c0_360 = arith.constant 0 : index
    %c6_361 = arith.constant 6 : index
    %c0_362 = arith.constant 0 : index
    %704 = vector.load %arg1[%c0_360, %c6_361, %c0_362] : memref<2x32x256xf32, #tpu.memory_space<vmem>>, vector<2x1x256xf32>
    %705 = vector.shape_cast %704 : vector<2x1x256xf32> to vector<2x256xf32>
    %706 = arith.mulf %705, %666 : vector<2x256xf32>
    %c0_363 = arith.constant 0 : index
    %c6_364 = arith.constant 6 : index
    %c0_365 = arith.constant 0 : index
    %707 = vector.load %arg6[%c0_363, %c6_364, %c0_365] : memref<2x32x256xf32, #tpu.memory_space<vmem>>, vector<2x1x256xf32>
    %708 = vector.shape_cast %707 : vector<2x1x256xf32> to vector<2x256xf32>
    %709 = vector.shape_cast %706 : vector<2x256xf32> to vector<2x1x256xf32>
    tpu.vector_store %arg6[%c0_363, %c6_364, %c0_365], %709 {strides = array<i32>} : memref<2x32x256xf32, #tpu.memory_space<vmem>>, vector<2x1x256xf32>,
    %c0_366 = arith.constant 0 : index
    %c7_367 = arith.constant 7 : index
    %c0_368 = arith.constant 0 : index
    %710 = vector.load %arg1[%c0_366, %c7_367, %c0_368] : memref<2x32x256xf32, #tpu.memory_space<vmem>>, vector<2x1x256xf32>
    %711 = vector.shape_cast %710 : vector<2x1x256xf32> to vector<2x256xf32>
    %712 = arith.mulf %711, %666 : vector<2x256xf32>
    %c0_369 = arith.constant 0 : index
    %c7_370 = arith.constant 7 : index
    %c0_371 = arith.constant 0 : index
    %713 = vector.load %arg6[%c0_369, %c7_370, %c0_371] : memref<2x32x256xf32, #tpu.memory_space<vmem>>, vector<2x1x256xf32>
    %714 = vector.shape_cast %713 : vector<2x1x256xf32> to vector<2x256xf32>
    %715 = vector.shape_cast %712 : vector<2x256xf32> to vector<2x1x256xf32>
    tpu.vector_store %arg6[%c0_369, %c7_370, %c0_371], %715 {strides = array<i32>} : memref<2x32x256xf32, #tpu.memory_space<vmem>>, vector<2x1x256xf32>,
    %c0_372 = arith.constant 0 : index
    %c8_373 = arith.constant 8 : index
    %c0_374 = arith.constant 0 : index
    %716 = vector.load %arg1[%c0_372, %c8_373, %c0_374] : memref<2x32x256xf32, #tpu.memory_space<vmem>>, vector<2x1x256xf32>
    %717 = vector.shape_cast %716 : vector<2x1x256xf32> to vector<2x256xf32>
    %718 = arith.mulf %717, %666 : vector<2x256xf32>
    %c0_375 = arith.constant 0 : index
    %c8_376 = arith.constant 8 : index
    %c0_377 = arith.constant 0 : index
    %719 = vector.load %arg6[%c0_375, %c8_376, %c0_377] : memref<2x32x256xf32, #tpu.memory_space<vmem>>, vector<2x1x256xf32>
    %720 = vector.shape_cast %719 : vector<2x1x256xf32> to vector<2x256xf32>
    %721 = vector.shape_cast %718 : vector<2x256xf32> to vector<2x1x256xf32>
    tpu.vector_store %arg6[%c0_375, %c8_376, %c0_377], %721 {strides = array<i32>} : memref<2x32x256xf32, #tpu.memory_space<vmem>>, vector<2x1x256xf32>,
    %c0_378 = arith.constant 0 : index
    %c9_379 = arith.constant 9 : index
    %c0_380 = arith.constant 0 : index
    %722 = vector.load %arg1[%c0_378, %c9_379, %c0_380] : memref<2x32x256xf32, #tpu.memory_space<vmem>>, vector<2x1x256xf32>
    %723 = vector.shape_cast %722 : vector<2x1x256xf32> to vector<2x256xf32>
    %724 = arith.mulf %723, %666 : vector<2x256xf32>
    %c0_381 = arith.constant 0 : index
    %c9_382 = arith.constant 9 : index
    %c0_383 = arith.constant 0 : index
    %725 = vector.load %arg6[%c0_381, %c9_382, %c0_383] : memref<2x32x256xf32, #tpu.memory_space<vmem>>, vector<2x1x256xf32>
    %726 = vector.shape_cast %725 : vector<2x1x256xf32> to vector<2x256xf32>
    %727 = vector.shape_cast %724 : vector<2x256xf32> to vector<2x1x256xf32>
    tpu.vector_store %arg6[%c0_381, %c9_382, %c0_383], %727 {strides = array<i32>} : memref<2x32x256xf32, #tpu.memory_space<vmem>>, vector<2x1x256xf32>,
    %c0_384 = arith.constant 0 : index
    %c10_385 = arith.constant 10 : index
    %c0_386 = arith.constant 0 : index
    %728 = vector.load %arg1[%c0_384, %c10_385, %c0_386] : memref<2x32x256xf32, #tpu.memory_space<vmem>>, vector<2x1x256xf32>
    %729 = vector.shape_cast %728 : vector<2x1x256xf32> to vector<2x256xf32>
    %730 = arith.mulf %729, %666 : vector<2x256xf32>
    %c0_387 = arith.constant 0 : index
    %c10_388 = arith.constant 10 : index
    %c0_389 = arith.constant 0 : index
    %731 = vector.load %arg6[%c0_387, %c10_388, %c0_389] : memref<2x32x256xf32, #tpu.memory_space<vmem>>, vector<2x1x256xf32>
    %732 = vector.shape_cast %731 : vector<2x1x256xf32> to vector<2x256xf32>
    %733 = vector.shape_cast %730 : vector<2x256xf32> to vector<2x1x256xf32>
    tpu.vector_store %arg6[%c0_387, %c10_388, %c0_389], %733 {strides = array<i32>} : memref<2x32x256xf32, #tpu.memory_space<vmem>>, vector<2x1x256xf32>,
    %c0_390 = arith.constant 0 : index
    %c11_391 = arith.constant 11 : index
    %c0_392 = arith.constant 0 : index
    %734 = vector.load %arg1[%c0_390, %c11_391, %c0_392] : memref<2x32x256xf32, #tpu.memory_space<vmem>>, vector<2x1x256xf32>
    %735 = vector.shape_cast %734 : vector<2x1x256xf32> to vector<2x256xf32>
    %736 = arith.mulf %735, %666 : vector<2x256xf32>
    %c0_393 = arith.constant 0 : index
    %c11_394 = arith.constant 11 : index
    %c0_395 = arith.constant 0 : index
    %737 = vector.load %arg6[%c0_393, %c11_394, %c0_395] : memref<2x32x256xf32, #tpu.memory_space<vmem>>, vector<2x1x256xf32>
    %738 = vector.shape_cast %737 : vector<2x1x256xf32> to vector<2x256xf32>
    %739 = vector.shape_cast %736 : vector<2x256xf32> to vector<2x1x256xf32>
    tpu.vector_store %arg6[%c0_393, %c11_394, %c0_395], %739 {strides = array<i32>} : memref<2x32x256xf32, #tpu.memory_space<vmem>>, vector<2x1x256xf32>,
    %c0_396 = arith.constant 0 : index
    %c12_397 = arith.constant 12 : index
    %c0_398 = arith.constant 0 : index
    %740 = vector.load %arg1[%c0_396, %c12_397, %c0_398] : memref<2x32x256xf32, #tpu.memory_space<vmem>>, vector<2x1x256xf32>
    %741 = vector.shape_cast %740 : vector<2x1x256xf32> to vector<2x256xf32>
    %742 = arith.mulf %741, %666 : vector<2x256xf32>
    %c0_399 = arith.constant 0 : index
    %c12_400 = arith.constant 12 : index
    %c0_401 = arith.constant 0 : index
    %743 = vector.load %arg6[%c0_399, %c12_400, %c0_401] : memref<2x32x256xf32, #tpu.memory_space<vmem>>, vector<2x1x256xf32>
    %744 = vector.shape_cast %743 : vector<2x1x256xf32> to vector<2x256xf32>
    %745 = vector.shape_cast %742 : vector<2x256xf32> to vector<2x1x256xf32>
    tpu.vector_store %arg6[%c0_399, %c12_400, %c0_401], %745 {strides = array<i32>} : memref<2x32x256xf32, #tpu.memory_space<vmem>>, vector<2x1x256xf32>,
    %c0_402 = arith.constant 0 : index
    %c13_403 = arith.constant 13 : index
    %c0_404 = arith.constant 0 : index
    %746 = vector.load %arg1[%c0_402, %c13_403, %c0_404] : memref<2x32x256xf32, #tpu.memory_space<vmem>>, vector<2x1x256xf32>
    %747 = vector.shape_cast %746 : vector<2x1x256xf32> to vector<2x256xf32>
    %748 = arith.mulf %747, %666 : vector<2x256xf32>
    %c0_405 = arith.constant 0 : index
    %c13_406 = arith.constant 13 : index
    %c0_407 = arith.constant 0 : index
    %749 = vector.load %arg6[%c0_405, %c13_406, %c0_407] : memref<2x32x256xf32, #tpu.memory_space<vmem>>, vector<2x1x256xf32>
    %750 = vector.shape_cast %749 : vector<2x1x256xf32> to vector<2x256xf32>
    %751 = vector.shape_cast %748 : vector<2x256xf32> to vector<2x1x256xf32>
    tpu.vector_store %arg6[%c0_405, %c13_406, %c0_407], %751 {strides = array<i32>} : memref<2x32x256xf32, #tpu.memory_space<vmem>>, vector<2x1x256xf32>,
    %c0_408 = arith.constant 0 : index
    %c14_409 = arith.constant 14 : index
    %c0_410 = arith.constant 0 : index
    %752 = vector.load %arg1[%c0_408, %c14_409, %c0_410] : memref<2x32x256xf32, #tpu.memory_space<vmem>>, vector<2x1x256xf32>
    %753 = vector.shape_cast %752 : vector<2x1x256xf32> to vector<2x256xf32>
    %754 = arith.mulf %753, %666 : vector<2x256xf32>
    %c0_411 = arith.constant 0 : index
    %c14_412 = arith.constant 14 : index
    %c0_413 = arith.constant 0 : index
    %755 = vector.load %arg6[%c0_411, %c14_412, %c0_413] : memref<2x32x256xf32, #tpu.memory_space<vmem>>, vector<2x1x256xf32>
    %756 = vector.shape_cast %755 : vector<2x1x256xf32> to vector<2x256xf32>
    %757 = vector.shape_cast %754 : vector<2x256xf32> to vector<2x1x256xf32>
    tpu.vector_store %arg6[%c0_411, %c14_412, %c0_413], %757 {strides = array<i32>} : memref<2x32x256xf32, #tpu.memory_space<vmem>>, vector<2x1x256xf32>,
    %c0_414 = arith.constant 0 : index
    %c15_415 = arith.constant 15 : index
    %c0_416 = arith.constant 0 : index
    %758 = vector.load %arg1[%c0_414, %c15_415, %c0_416] : memref<2x32x256xf32, #tpu.memory_space<vmem>>, vector<2x1x256xf32>
    %759 = vector.shape_cast %758 : vector<2x1x256xf32> to vector<2x256xf32>
    %760 = arith.mulf %759, %666 : vector<2x256xf32>
    %c0_417 = arith.constant 0 : index
    %c15_418 = arith.constant 15 : index
    %c0_419 = arith.constant 0 : index
    %761 = vector.load %arg6[%c0_417, %c15_418, %c0_419] : memref<2x32x256xf32, #tpu.memory_space<vmem>>, vector<2x1x256xf32>
    %762 = vector.shape_cast %761 : vector<2x1x256xf32> to vector<2x256xf32>
    %763 = vector.shape_cast %760 : vector<2x256xf32> to vector<2x1x256xf32>
    tpu.vector_store %arg6[%c0_417, %c15_418, %c0_419], %763 {strides = array<i32>} : memref<2x32x256xf32, #tpu.memory_space<vmem>>, vector<2x1x256xf32>,
    %c0_420 = arith.constant 0 : index
    %c16_421 = arith.constant 16 : index
    %c0_422 = arith.constant 0 : index
    %764 = vector.load %arg1[%c0_420, %c16_421, %c0_422] : memref<2x32x256xf32, #tpu.memory_space<vmem>>, vector<2x1x256xf32>
    %765 = vector.shape_cast %764 : vector<2x1x256xf32> to vector<2x256xf32>
    %766 = arith.mulf %765, %666 : vector<2x256xf32>
    %c0_423 = arith.constant 0 : index
    %c16_424 = arith.constant 16 : index
    %c0_425 = arith.constant 0 : index
    %767 = vector.load %arg6[%c0_423, %c16_424, %c0_425] : memref<2x32x256xf32, #tpu.memory_space<vmem>>, vector<2x1x256xf32>
    %768 = vector.shape_cast %767 : vector<2x1x256xf32> to vector<2x256xf32>
    %769 = vector.shape_cast %766 : vector<2x256xf32> to vector<2x1x256xf32>
    tpu.vector_store %arg6[%c0_423, %c16_424, %c0_425], %769 {strides = array<i32>} : memref<2x32x256xf32, #tpu.memory_space<vmem>>, vector<2x1x256xf32>,
    %c0_426 = arith.constant 0 : index
    %c17_427 = arith.constant 17 : index
    %c0_428 = arith.constant 0 : index
    %770 = vector.load %arg1[%c0_426, %c17_427, %c0_428] : memref<2x32x256xf32, #tpu.memory_space<vmem>>, vector<2x1x256xf32>
    %771 = vector.shape_cast %770 : vector<2x1x256xf32> to vector<2x256xf32>
    %772 = arith.mulf %771, %666 : vector<2x256xf32>
    %c0_429 = arith.constant 0 : index
    %c17_430 = arith.constant 17 : index
    %c0_431 = arith.constant 0 : index
    %773 = vector.load %arg6[%c0_429, %c17_430, %c0_431] : memref<2x32x256xf32, #tpu.memory_space<vmem>>, vector<2x1x256xf32>
    %774 = vector.shape_cast %773 : vector<2x1x256xf32> to vector<2x256xf32>
    %775 = vector.shape_cast %772 : vector<2x256xf32> to vector<2x1x256xf32>
    tpu.vector_store %arg6[%c0_429, %c17_430, %c0_431], %775 {strides = array<i32>} : memref<2x32x256xf32, #tpu.memory_space<vmem>>, vector<2x1x256xf32>,
    %c0_432 = arith.constant 0 : index
    %c18_433 = arith.constant 18 : index
    %c0_434 = arith.constant 0 : index
    %776 = vector.load %arg1[%c0_432, %c18_433, %c0_434] : memref<2x32x256xf32, #tpu.memory_space<vmem>>, vector<2x1x256xf32>
    %777 = vector.shape_cast %776 : vector<2x1x256xf32> to vector<2x256xf32>
    %778 = arith.mulf %777, %666 : vector<2x256xf32>
    %c0_435 = arith.constant 0 : index
    %c18_436 = arith.constant 18 : index
    %c0_437 = arith.constant 0 : index
    %779 = vector.load %arg6[%c0_435, %c18_436, %c0_437] : memref<2x32x256xf32, #tpu.memory_space<vmem>>, vector<2x1x256xf32>
    %780 = vector.shape_cast %779 : vector<2x1x256xf32> to vector<2x256xf32>
    %781 = vector.shape_cast %778 : vector<2x256xf32> to vector<2x1x256xf32>
    tpu.vector_store %arg6[%c0_435, %c18_436, %c0_437], %781 {strides = array<i32>} : memref<2x32x256xf32, #tpu.memory_space<vmem>>, vector<2x1x256xf32>,
    %c0_438 = arith.constant 0 : index
    %c19_439 = arith.constant 19 : index
    %c0_440 = arith.constant 0 : index
    %782 = vector.load %arg1[%c0_438, %c19_439, %c0_440] : memref<2x32x256xf32, #tpu.memory_space<vmem>>, vector<2x1x256xf32>
    %783 = vector.shape_cast %782 : vector<2x1x256xf32> to vector<2x256xf32>
    %784 = arith.mulf %783, %666 : vector<2x256xf32>
    %c0_441 = arith.constant 0 : index
    %c19_442 = arith.constant 19 : index
    %c0_443 = arith.constant 0 : index
    %785 = vector.load %arg6[%c0_441, %c19_442, %c0_443] : memref<2x32x256xf32, #tpu.memory_space<vmem>>, vector<2x1x256xf32>
    %786 = vector.shape_cast %785 : vector<2x1x256xf32> to vector<2x256xf32>
    %787 = vector.shape_cast %784 : vector<2x256xf32> to vector<2x1x256xf32>
    tpu.vector_store %arg6[%c0_441, %c19_442, %c0_443], %787 {strides = array<i32>} : memref<2x32x256xf32, #tpu.memory_space<vmem>>, vector<2x1x256xf32>,
    %c0_444 = arith.constant 0 : index
    %c20_445 = arith.constant 20 : index
    %c0_446 = arith.constant 0 : index
    %788 = vector.load %arg1[%c0_444, %c20_445, %c0_446] : memref<2x32x256xf32, #tpu.memory_space<vmem>>, vector<2x1x256xf32>
    %789 = vector.shape_cast %788 : vector<2x1x256xf32> to vector<2x256xf32>
    %790 = arith.mulf %789, %666 : vector<2x256xf32>
    %c0_447 = arith.constant 0 : index
    %c20_448 = arith.constant 20 : index
    %c0_449 = arith.constant 0 : index
    %791 = vector.load %arg6[%c0_447, %c20_448, %c0_449] : memref<2x32x256xf32, #tpu.memory_space<vmem>>, vector<2x1x256xf32>
    %792 = vector.shape_cast %791 : vector<2x1x256xf32> to vector<2x256xf32>
    %793 = vector.shape_cast %790 : vector<2x256xf32> to vector<2x1x256xf32>
    tpu.vector_store %arg6[%c0_447, %c20_448, %c0_449], %793 {strides = array<i32>} : memref<2x32x256xf32, #tpu.memory_space<vmem>>, vector<2x1x256xf32>,
    %c0_450 = arith.constant 0 : index
    %c21_451 = arith.constant 21 : index
    %c0_452 = arith.constant 0 : index
    %794 = vector.load %arg1[%c0_450, %c21_451, %c0_452] : memref<2x32x256xf32, #tpu.memory_space<vmem>>, vector<2x1x256xf32>
    %795 = vector.shape_cast %794 : vector<2x1x256xf32> to vector<2x256xf32>
    %796 = arith.mulf %795, %666 : vector<2x256xf32>
    %c0_453 = arith.constant 0 : index
    %c21_454 = arith.constant 21 : index
    %c0_455 = arith.constant 0 : index
    %797 = vector.load %arg6[%c0_453, %c21_454, %c0_455] : memref<2x32x256xf32, #tpu.memory_space<vmem>>, vector<2x1x256xf32>
    %798 = vector.shape_cast %797 : vector<2x1x256xf32> to vector<2x256xf32>
    %799 = vector.shape_cast %796 : vector<2x256xf32> to vector<2x1x256xf32>
    tpu.vector_store %arg6[%c0_453, %c21_454, %c0_455], %799 {strides = array<i32>} : memref<2x32x256xf32, #tpu.memory_space<vmem>>, vector<2x1x256xf32>,
    %c0_456 = arith.constant 0 : index
    %c22_457 = arith.constant 22 : index
    %c0_458 = arith.constant 0 : index
    %800 = vector.load %arg1[%c0_456, %c22_457, %c0_458] : memref<2x32x256xf32, #tpu.memory_space<vmem>>, vector<2x1x256xf32>
    %801 = vector.shape_cast %800 : vector<2x1x256xf32> to vector<2x256xf32>
    %802 = arith.mulf %801, %666 : vector<2x256xf32>
    %c0_459 = arith.constant 0 : index
    %c22_460 = arith.constant 22 : index
    %c0_461 = arith.constant 0 : index
    %803 = vector.load %arg6[%c0_459, %c22_460, %c0_461] : memref<2x32x256xf32, #tpu.memory_space<vmem>>, vector<2x1x256xf32>
    %804 = vector.shape_cast %803 : vector<2x1x256xf32> to vector<2x256xf32>
    %805 = vector.shape_cast %802 : vector<2x256xf32> to vector<2x1x256xf32>
    tpu.vector_store %arg6[%c0_459, %c22_460, %c0_461], %805 {strides = array<i32>} : memref<2x32x256xf32, #tpu.memory_space<vmem>>, vector<2x1x256xf32>,
    %c0_462 = arith.constant 0 : index
    %c23_463 = arith.constant 23 : index
    %c0_464 = arith.constant 0 : index
    %806 = vector.load %arg1[%c0_462, %c23_463, %c0_464] : memref<2x32x256xf32, #tpu.memory_space<vmem>>, vector<2x1x256xf32>
    %807 = vector.shape_cast %806 : vector<2x1x256xf32> to vector<2x256xf32>
    %808 = arith.mulf %807, %666 : vector<2x256xf32>
    %c0_465 = arith.constant 0 : index
    %c23_466 = arith.constant 23 : index
    %c0_467 = arith.constant 0 : index
    %809 = vector.load %arg6[%c0_465, %c23_466, %c0_467] : memref<2x32x256xf32, #tpu.memory_space<vmem>>, vector<2x1x256xf32>
    %810 = vector.shape_cast %809 : vector<2x1x256xf32> to vector<2x256xf32>
    %811 = vector.shape_cast %808 : vector<2x256xf32> to vector<2x1x256xf32>
    tpu.vector_store %arg6[%c0_465, %c23_466, %c0_467], %811 {strides = array<i32>} : memref<2x32x256xf32, #tpu.memory_space<vmem>>, vector<2x1x256xf32>,
    %c0_468 = arith.constant 0 : index
    %c24_469 = arith.constant 24 : index
    %c0_470 = arith.constant 0 : index
    %812 = vector.load %arg1[%c0_468, %c24_469, %c0_470] : memref<2x32x256xf32, #tpu.memory_space<vmem>>, vector<2x1x256xf32>
    %813 = vector.shape_cast %812 : vector<2x1x256xf32> to vector<2x256xf32>
    %814 = arith.mulf %813, %666 : vector<2x256xf32>
    %c0_471 = arith.constant 0 : index
    %c24_472 = arith.constant 24 : index
    %c0_473 = arith.constant 0 : index
    %815 = vector.load %arg6[%c0_471, %c24_472, %c0_473] : memref<2x32x256xf32, #tpu.memory_space<vmem>>, vector<2x1x256xf32>
    %816 = vector.shape_cast %815 : vector<2x1x256xf32> to vector<2x256xf32>
    %817 = vector.shape_cast %814 : vector<2x256xf32> to vector<2x1x256xf32>
    tpu.vector_store %arg6[%c0_471, %c24_472, %c0_473], %817 {strides = array<i32>} : memref<2x32x256xf32, #tpu.memory_space<vmem>>, vector<2x1x256xf32>,
    %c0_474 = arith.constant 0 : index
    %c25_475 = arith.constant 25 : index
    %c0_476 = arith.constant 0 : index
    %818 = vector.load %arg1[%c0_474, %c25_475, %c0_476] : memref<2x32x256xf32, #tpu.memory_space<vmem>>, vector<2x1x256xf32>
    %819 = vector.shape_cast %818 : vector<2x1x256xf32> to vector<2x256xf32>
    %820 = arith.mulf %819, %666 : vector<2x256xf32>
    %c0_477 = arith.constant 0 : index
    %c25_478 = arith.constant 25 : index
    %c0_479 = arith.constant 0 : index
    %821 = vector.load %arg6[%c0_477, %c25_478, %c0_479] : memref<2x32x256xf32, #tpu.memory_space<vmem>>, vector<2x1x256xf32>
    %822 = vector.shape_cast %821 : vector<2x1x256xf32> to vector<2x256xf32>
    %823 = vector.shape_cast %820 : vector<2x256xf32> to vector<2x1x256xf32>
    tpu.vector_store %arg6[%c0_477, %c25_478, %c0_479], %823 {strides = array<i32>} : memref<2x32x256xf32, #tpu.memory_space<vmem>>, vector<2x1x256xf32>,
    %c0_480 = arith.constant 0 : index
    %c26_481 = arith.constant 26 : index
    %c0_482 = arith.constant 0 : index
    %824 = vector.load %arg1[%c0_480, %c26_481, %c0_482] : memref<2x32x256xf32, #tpu.memory_space<vmem>>, vector<2x1x256xf32>
    %825 = vector.shape_cast %824 : vector<2x1x256xf32> to vector<2x256xf32>
    %826 = arith.mulf %825, %666 : vector<2x256xf32>
    %c0_483 = arith.constant 0 : index
    %c26_484 = arith.constant 26 : index
    %c0_485 = arith.constant 0 : index
    %827 = vector.load %arg6[%c0_483, %c26_484, %c0_485] : memref<2x32x256xf32, #tpu.memory_space<vmem>>, vector<2x1x256xf32>
    %828 = vector.shape_cast %827 : vector<2x1x256xf32> to vector<2x256xf32>
    %829 = vector.shape_cast %826 : vector<2x256xf32> to vector<2x1x256xf32>
    tpu.vector_store %arg6[%c0_483, %c26_484, %c0_485], %829 {strides = array<i32>} : memref<2x32x256xf32, #tpu.memory_space<vmem>>, vector<2x1x256xf32>,
    %c0_486 = arith.constant 0 : index
    %c27_487 = arith.constant 27 : index
    %c0_488 = arith.constant 0 : index
    %830 = vector.load %arg1[%c0_486, %c27_487, %c0_488] : memref<2x32x256xf32, #tpu.memory_space<vmem>>, vector<2x1x256xf32>
    %831 = vector.shape_cast %830 : vector<2x1x256xf32> to vector<2x256xf32>
    %832 = arith.mulf %831, %666 : vector<2x256xf32>
    %c0_489 = arith.constant 0 : index
    %c27_490 = arith.constant 27 : index
    %c0_491 = arith.constant 0 : index
    %833 = vector.load %arg6[%c0_489, %c27_490, %c0_491] : memref<2x32x256xf32, #tpu.memory_space<vmem>>, vector<2x1x256xf32>
    %834 = vector.shape_cast %833 : vector<2x1x256xf32> to vector<2x256xf32>
    %835 = vector.shape_cast %832 : vector<2x256xf32> to vector<2x1x256xf32>
    tpu.vector_store %arg6[%c0_489, %c27_490, %c0_491], %835 {strides = array<i32>} : memref<2x32x256xf32, #tpu.memory_space<vmem>>, vector<2x1x256xf32>,
    %c0_492 = arith.constant 0 : index
    %c28_493 = arith.constant 28 : index
    %c0_494 = arith.constant 0 : index
    %836 = vector.load %arg1[%c0_492, %c28_493, %c0_494] : memref<2x32x256xf32, #tpu.memory_space<vmem>>, vector<2x1x256xf32>
    %837 = vector.shape_cast %836 : vector<2x1x256xf32> to vector<2x256xf32>
    %838 = arith.mulf %837, %666 : vector<2x256xf32>
    %c0_495 = arith.constant 0 : index
    %c28_496 = arith.constant 28 : index
    %c0_497 = arith.constant 0 : index
    %839 = vector.load %arg6[%c0_495, %c28_496, %c0_497] : memref<2x32x256xf32, #tpu.memory_space<vmem>>, vector<2x1x256xf32>
    %840 = vector.shape_cast %839 : vector<2x1x256xf32> to vector<2x256xf32>
    %841 = vector.shape_cast %838 : vector<2x256xf32> to vector<2x1x256xf32>
    tpu.vector_store %arg6[%c0_495, %c28_496, %c0_497], %841 {strides = array<i32>} : memref<2x32x256xf32, #tpu.memory_space<vmem>>, vector<2x1x256xf32>,
    %c0_498 = arith.constant 0 : index
    %c29_499 = arith.constant 29 : index
    %c0_500 = arith.constant 0 : index
    %842 = vector.load %arg1[%c0_498, %c29_499, %c0_500] : memref<2x32x256xf32, #tpu.memory_space<vmem>>, vector<2x1x256xf32>
    %843 = vector.shape_cast %842 : vector<2x1x256xf32> to vector<2x256xf32>
    %844 = arith.mulf %843, %666 : vector<2x256xf32>
    %c0_501 = arith.constant 0 : index
    %c29_502 = arith.constant 29 : index
    %c0_503 = arith.constant 0 : index
    %845 = vector.load %arg6[%c0_501, %c29_502, %c0_503] : memref<2x32x256xf32, #tpu.memory_space<vmem>>, vector<2x1x256xf32>
    %846 = vector.shape_cast %845 : vector<2x1x256xf32> to vector<2x256xf32>
    %847 = vector.shape_cast %844 : vector<2x256xf32> to vector<2x1x256xf32>
    tpu.vector_store %arg6[%c0_501, %c29_502, %c0_503], %847 {strides = array<i32>} : memref<2x32x256xf32, #tpu.memory_space<vmem>>, vector<2x1x256xf32>,
    %c0_504 = arith.constant 0 : index
    %c30_505 = arith.constant 30 : index
    %c0_506 = arith.constant 0 : index
    %848 = vector.load %arg1[%c0_504, %c30_505, %c0_506] : memref<2x32x256xf32, #tpu.memory_space<vmem>>, vector<2x1x256xf32>
    %849 = vector.shape_cast %848 : vector<2x1x256xf32> to vector<2x256xf32>
    %850 = arith.mulf %849, %666 : vector<2x256xf32>
    %c0_507 = arith.constant 0 : index
    %c30_508 = arith.constant 30 : index
    %c0_509 = arith.constant 0 : index
    %851 = vector.load %arg6[%c0_507, %c30_508, %c0_509] : memref<2x32x256xf32, #tpu.memory_space<vmem>>, vector<2x1x256xf32>
    %852 = vector.shape_cast %851 : vector<2x1x256xf32> to vector<2x256xf32>
    %853 = vector.shape_cast %850 : vector<2x256xf32> to vector<2x1x256xf32>
    tpu.vector_store %arg6[%c0_507, %c30_508, %c0_509], %853 {strides = array<i32>} : memref<2x32x256xf32, #tpu.memory_space<vmem>>, vector<2x1x256xf32>,
    %c0_510 = arith.constant 0 : index
    %c31_511 = arith.constant 31 : index
    %c0_512 = arith.constant 0 : index
    %854 = vector.load %arg1[%c0_510, %c31_511, %c0_512] : memref<2x32x256xf32, #tpu.memory_space<vmem>>, vector<2x1x256xf32>
    %855 = vector.shape_cast %854 : vector<2x1x256xf32> to vector<2x256xf32>
    %856 = arith.mulf %855, %666 : vector<2x256xf32>
    %c0_513 = arith.constant 0 : index
    %c31_514 = arith.constant 31 : index
    %c0_515 = arith.constant 0 : index
    %857 = vector.load %arg6[%c0_513, %c31_514, %c0_515] : memref<2x32x256xf32, #tpu.memory_space<vmem>>, vector<2x1x256xf32>
    %858 = vector.shape_cast %857 : vector<2x1x256xf32> to vector<2x256xf32>
    %859 = vector.shape_cast %856 : vector<2x256xf32> to vector<2x1x256xf32>
    tpu.vector_store %arg6[%c0_513, %c31_514, %c0_515], %859 {strides = array<i32>} : memref<2x32x256xf32, #tpu.memory_space<vmem>>, vector<2x1x256xf32>,
    return
  }
  func.func @transform_0(%arg0: i32) -> (i32, i32, i32) {
    %c0_i32 = arith.constant 0 : i32
    %c0_i32_0 = arith.constant 0 : i32
    %c0_i32_1 = arith.constant 0 : i32
    return %arg0, %c0_i32, %c0_i32_0 : i32, i32, i32
  }
  func.func @transform_1(%arg0: i32) -> (i32, i32) {
    %c0_i32 = arith.constant 0 : i32
    %c0_i32_0 = arith.constant 0 : i32
    %c0_i32_1 = arith.constant 0 : i32
    return %c0_i32, %c0_i32_0 : i32, i32
  }
  func.func @transform_2(%arg0: i32) -> i32 {
    %c0_i32 = arith.constant 0 : i32
    %c0_i32_0 = arith.constant 0 : i32
    return %c0_i32 : i32
  }
  func.func @transform_3(%arg0: i32) -> i32 {
    %c0_i32 = arith.constant 0 : i32
    %c0_i32_0 = arith.constant 0 : i32
    return %c0_i32 : i32
  }
  func.func @transform_4(%arg0: i32) -> (i32, i32) {
    %c0_i32 = arith.constant 0 : i32
    %c0_i32_0 = arith.constant 0 : i32
    return %arg0, %c0_i32 : i32, i32
  }
  func.func @transform_5(%arg0: i32) -> (i32, i32, i32) {
    %c0_i32 = arith.constant 0 : i32
    %c0_i32_0 = arith.constant 0 : i32
    %c0_i32_1 = arith.constant 0 : i32
    return %arg0, %c0_i32, %c0_i32_0 : i32, i32, i32
  }
}

</mosaic_0001>

<bundles_post_ra>
// kernel: tpu_custom_call.1
= control target key start
LH: loop header
LB: loop body
LE: loop exit
PB: predicated region body
PF: predicated region fallthrough
CT: control target
= control target key end

     0   :  { %12 = vsyncpa [#allocation6], 0  ;;  %s3025_s0 = inlined_call_operand.hbm [shape: f32[2,32,256], index: 0, kind: input, shape index: {}]   ;;  %s3026_s1 = inlined_call_operand.hbm [shape: f32[7,256], index: 1, kind: input, shape index: {}]   ;;  %s3027_s2 = inlined_call_operand.vmem [shape: f32[98], index: 2, kind: input, shape index: {}]   ;;  %s3028_s3 = inlined_call_operand.<no memory space> [shape: f32[1], index: 3, kind: input, shape index: {}]   ;;  %s3029_s4 = inlined_call_operand.hbm [shape: f32[2,256], index: 4, kind: output, shape index: {0}]   ;;  %s3030_s5 = inlined_call_operand.hbm [shape: f32[2,32,256], index: 5, kind: output, shape index: {1}]  }
   0x1   :  { %13 = vsyncpa [#allocation10], 0 }
   0x2   :  { %14 = vsyncpa [#allocation8], 0 }
   0x3   :  { %15 = vsyncpa [#allocation7], 0 }
   0x4   :  { %16 = vsyncpa [#allocation14], 0  ;;  %s2119_s18 = smov [#allocation5]   ;;  %s2009_s22 = scalar_lea.hbm %s3025_s0, 2048 }
   0x5   :  { %s22_s19 = sshll.u32 %s2119_s18, 4  ;;  %p2010_p0 = scmp.ne.s32.totalorder %s3025_s0, %s2009_s22  ;;  %s23_s19 = int_to_ptr.vmem [resolvable:$true] %s22_s19 }
   0x6   :  { %p2013_p1 = scmp.lt.u32.totalorder %s2009_s22, %s3025_s0 }
   0x8   :  { %p2015_p2 = pnand %p2013_p1, %p2010_p0 }
   0xa   :  { %2018 = shalt.err (!%p2015_p2)
}
   0xb   :  { %s2019_s27 = scalar_lea.vmem %s23_s19, 2048  ;;  %p2024_p4 = scmp.lt.s32.totalorder %s23_s19, %s23_s19 }
   0xc   :  { %p2020_p3 = scmp.ne.s32.totalorder %s23_s19, %s2019_s27  ;;  %p2025_p5 = scmp.lt.s32.totalorder %s2019_s27, %s2019_s27 }
   0xe   :  { %p2026_p6 = por %p2025_p5, %p2024_p4 }
  0x10   :  { %p2027_p7 = pnand %p2026_p6, %p2020_p3 }
  0x12   :  { %2030 = shalt.err (!%p2027_p7)
}
  0x13   :  { %s2120_s28 = smov 256   ;;  %s2121_s29 = smov 16  }
  0x14   :  { %28 = dma.hbm_to_vmem [thread:$0]  %s3025_s0, 2048, %s23_s19, [#allocation6], %s2120_s28, %s2120_s28, %s2121_s29  }
  0x15   :  { %s2122_s7 = smov [#allocation9]   ;;  %s45_s11 = sshll.u32 %s3027_s2, 4  ;;  %s46_s11 = int_to_ptr.vmem [resolvable:$true] %s45_s11 }
  0x16   :  { %s35_s8 = sshll.u32 %s2122_s7, 4  ;;  %s2031_s14 = scalar_lea.hbm %s3026_s1, 256  ;;  %s36_s8 = int_to_ptr.vmem [resolvable:$true] %s35_s8 }
  0x17   :  { %p2032_p8 = scmp.ne.s32.totalorder %s3026_s1, %s2031_s14  ;;  %p2035_p9 = scmp.lt.u32.totalorder %s2031_s14, %s3026_s1 }
  0x19   :  { %p2037_p10 = pnand %p2035_p9, %p2032_p8 }
  0x1b   :  { %2040 = shalt.err (!%p2037_p10)
}
  0x1c   :  { %s2041_s0 = scalar_lea.vmem %s36_s8, 256  ;;  %p2046_p12 = scmp.lt.s32.totalorder %s36_s8, %s36_s8 }
  0x1d   :  { %p2042_p11 = scmp.ne.s32.totalorder %s36_s8, %s2041_s0  ;;  %p2047_p13 = scmp.lt.s32.totalorder %s2041_s0, %s2041_s0 }
  0x1f   :  { %p2048_p0 = por %p2047_p13, %p2046_p12 }
  0x21   :  { %p2049_p1 = pnand %p2048_p0, %p2042_p11 }
  0x23   :  { %2052 = shalt.err (!%p2049_p1)
}
  0x24   :  { %38 = dma.hbm_to_vmem [thread:$0]  %s3026_s1, 256, %s36_s8, [#allocation10]  }
  0x25   :  { %s2053_s20 = scalar_lea.vmem %s46_s11, 16  ;;  %p2058_p3 = scmp.lt.s32.totalorder %s46_s11, %s46_s11 }
  0x26   :  { %p2054_p2 = scmp.ne.s32.totalorder %s46_s11, %s2053_s20  ;;  %p2059_p4 = scmp.lt.s32.totalorder %s2053_s20, %s2053_s20 }
  0x28   :  { %p2060_p5 = por %p2059_p4, %p2058_p3 }
  0x2a   :  { %p2061_p6 = pnand %p2060_p5, %p2054_p2 }
  0x2c   :  { %2064 = shalt.err (!%p2061_p6)
}
  0x2d   :  { %s2123_s21 = smov [#allocation11]  }
  0x2e   :  { %48 = dma.vmem_to_smem %s46_s11, 16, %s2123_s21, [#allocation8]  }
  0x2f   :  { %2109 = dma.done.wait [#allocation6], 2048  }
  0x30   :  { %2110 = vsyncadd [#allocation6], 4294965248 }
  0x31   :  { %2111 = dma.done.wait [#allocation10], 256  }
  0x32   :  { %2112 = vsyncadd [#allocation10], 4294967040 }
  0x33   :  { %2113 = dma.done.wait [#allocation8], 16  }
  0x34   :  { %2114 = vsyncadd [#allocation8], 4294967280 }
  0x35   :  { %60 = sfence }
  0x36   :  { %v3031_v0 = vlaneseq  ;;  %v2124_v1 = vmov 1983009808   ;;  %v848_v3 = vld [vmem:[#allocation9 + $0x3] ss:$8 sm:$0x3]  ;;  %s2125_s1 = smov 3  }
  0x37   :  { %v510_v2 = vunpack.c.l.s4 %v2124_v1  ;;  %v1012_v5 = vld [vmem:[#allocation9 + $0x4] ss:$8 sm:$0x3]  ;;  %v61_v7 = vld [vmem:[#allocation5] ss:$8 sm:$0x3] }
  0x38   :  { %v2210_v4 = vshrl.u32 %v3031_v0, 7  ;;  %v63_v8 = vld [vmem:[#allocation5 + $0x40] ss:$8 sm:$0x3]  ;;  %s2126_s22 = smov 4   ;;  %vm314_vm0 = vcmask 410624  }
  0x39   :  { %v511_v6 = vunpack.c.0.s8 %v510_v2  ;;  %v65_v11 = vld [vmem:[#allocation5 + $0x1] ss:$8 sm:$0x3]  ;;  %v69_v13 = vld [vmem:[#allocation5 + $0x2] ss:$8 sm:$0x3] }
  0x3a   :  { %3037 = vst [vmem:[#allocation20_spill] sm:$0xff] %v2210_v4  ;;  %v2213_v9 = vsub.s32 0, %v2210_v4  ;;  %v2216_v10 = vsub.s32 1, %v2210_v4  ;;  %v67_v12 = vld [vmem:[#allocation5 + $0x41] ss:$8 sm:$0x3] }
  0x3b   :  { %v71_v14 = vld [vmem:[#allocation5 + $0x42] ss:$8 sm:$0x3]  ;;  %v2219_v15 = vsub.s32 %v511_v6, %v2210_v4  ;;  %v73_v19 = vld [vmem:[#allocation5 + $0x3] ss:$8 sm:$0x3] }
  0x3c   :  { %3038 = vst [vmem:[#allocation21_spill] sm:$0xff] %v2213_v9  ;;  %3039 = vst [vmem:[#allocation22_spill] sm:$0xff] %v2216_v10  ;;  %v983_v16 = vrot.slane %v848_v3, %v2213_v9  ;;  %v987_v17 = vrot.slane %v848_v3, %v2216_v10  ;;  %v1147_v18 = vrot.slane %v1012_v5, %v2213_v9  ;;  %v75_v20 = vld [vmem:[#allocation5 + $0x43] ss:$8 sm:$0x3]  ;;  %vm316_vm1 = vcmask 828824  }
  0x3d   :  { %3040 = vst [vmem:[#allocation23_spill] sm:$0xff] %v2219_v15  ;;  %v1151_v21 = vrot.slane %v1012_v5, %v2216_v10  ;;  %v77_v22 = vld [vmem:[#allocation5 + $0x4] ss:$8 sm:$0x3]  ;;  %s2129_s23 = smov 51   ;;  %s2130_s24 = smov 1  }
  0x3e   :  { %v79_v23 = vld [vmem:[#allocation5 + $0x44] ss:$8 sm:$0x3]  ;;  %v988_v24 = vcombine.low %v983_v16, %v987_v17  ;;  %v82_v25 = vmax.f32 %v61_v7, %v77_v22  ;;  %v85_v27 = vld [vmem:[#allocation5 + $0x5] ss:$8 sm:$0x3]  ;;  %v80_v29 = vadd.f32 %v77_v22, %v61_v7 }
  0x3f   :  { %v83_v26 = vmax.f32 %v63_v8, %v79_v23  ;;  %v87_v28 = vld [vmem:[#allocation5 + $0x45] ss:$8 sm:$0x3]  ;;  %v1152_v30 = vcombine.low %v1147_v18, %v1151_v21  ;;  %v90_v31 = vmax.f32 %v65_v11, %v85_v27  ;;  %v93_v33 = vld [vmem:[#allocation5 + $0x6] ss:$8 sm:$0x3]  ;;  %v81_v35 = vadd.f32 %v79_v23, %v63_v8 }
  0x40   :  { %v91_v32 = vmax.f32 %v67_v12, %v87_v28  ;;  %v95_v34 = vld [vmem:[#allocation5 + $0x46] ss:$8 sm:$0x3]  ;;  %v995_v36 = vrot.slane %v988_v24, %v2219_v15  ;;  %v98_v37 = vmax.f32 %v69_v13, %v93_v33  ;;  %v101_v39 = vld [vmem:[#allocation5 + $0x7] ss:$8 sm:$0x3]  ;;  %v88_v41 = vadd.f32 %v85_v27, %v65_v11 }
  0x41   :  { %v99_v38 = vmax.f32 %v71_v14, %v95_v34  ;;  %v103_v40 = vld [vmem:[#allocation5 + $0x47] ss:$8 sm:$0x3]  ;;  %v1159_v42 = vrot.slane %v1152_v30, %v2219_v15  ;;  %v106_v43 = vmax.f32 %v73_v19, %v101_v39  ;;  %v109_v45 = vld [vmem:[#allocation5 + $0x10] ss:$8 sm:$0x3]  ;;  %v89_v47 = vadd.f32 %v87_v28, %v67_v12 }
  0x42   :  { %v107_v44 = vmax.f32 %v75_v20, %v103_v40  ;;  %v111_v46 = vld [vmem:[#allocation5 + $0x50] ss:$8 sm:$0x3]  ;;  %996 = vrot.lane.b32.xlu0 %v995_v36, %s2125_s1  ;;  %v114_v48 = vmax.f32 %v82_v25, %v109_v45  ;;  %v117_v50 = vld [vmem:[#allocation5 + $0x11] ss:$8 sm:$0x3]  ;;  %v96_v52 = vadd.f32 %v93_v33, %v69_v13  ;;  %v97_v53 = vadd.f32 %v95_v34, %v71_v14 }
  0x43   :  { %v115_v49 = vmax.f32 %v83_v26, %v111_v46  ;;  %v119_v51 = vld [vmem:[#allocation5 + $0x51] ss:$8 sm:$0x3]  ;;  %v122_v54 = vmax.f32 %v90_v31, %v117_v50  ;;  %v125_v56 = vld [vmem:[#allocation5 + $0x12] ss:$8 sm:$0x3]  ;;  %v104_v58 = vadd.f32 %v101_v39, %v73_v19  ;;  %v105_v59 = vadd.f32 %v103_v40, %v75_v20 }
  0x44   :  { %v123_v55 = vmax.f32 %v91_v32, %v119_v51  ;;  %v127_v57 = vld [vmem:[#allocation5 + $0x52] ss:$8 sm:$0x3]  ;;  %v130_v60 = vmax.f32 %v98_v37, %v125_v56  ;;  %v133_v62 = vld [vmem:[#allocation5 + $0x13] ss:$8 sm:$0x3]  ;;  %v112_v1 = vadd.f32 %v109_v45, %v80_v29  ;;  %v113_v2 = vadd.f32 %v111_v46, %v81_v35 }
  0x45   :  { %v131_v61 = vmax.f32 %v99_v38, %v127_v57  ;;  %v135_v63 = vld [vmem:[#allocation5 + $0x53] ss:$8 sm:$0x3]  ;;  %v138_v3 = vmax.f32 %v106_v43, %v133_v62  ;;  %v141_v6 = vld [vmem:[#allocation5 + $0x14] ss:$8 sm:$0x3]  ;;  %v120_v8 = vadd.f32 %v117_v50, %v88_v41  ;;  %v121_v11 = vadd.f32 %v119_v51, %v89_v47 }
  0x46   :  { %v139_v5 = vmax.f32 %v107_v44, %v135_v63  ;;  %v143_v7 = vld [vmem:[#allocation5 + $0x54] ss:$8 sm:$0x3]  ;;  %1160 = vrot.lane.b32.xlu0 %v1159_v42, %s2126_s22  ;;  %v146_v12 = vmax.f32 %v114_v48, %v141_v6  ;;  %v149_v14 = vld [vmem:[#allocation5 + $0x15] ss:$8 sm:$0x3]  ;;  %v128_v17 = vadd.f32 %v125_v56, %v96_v52  ;;  %v129_v18 = vadd.f32 %v127_v57, %v97_v53 }
  0x47   :  { %v147_v13 = vmax.f32 %v115_v49, %v143_v7  ;;  %v151_v16 = vld [vmem:[#allocation5 + $0x55] ss:$8 sm:$0x3]  ;;  %v154_v19 = vmax.f32 %v122_v54, %v149_v14  ;;  %v157_v21 = vld [vmem:[#allocation5 + $0x16] ss:$8 sm:$0x3]  ;;  %v136_v23 = vadd.f32 %v133_v62, %v104_v58  ;;  %v137_v24 = vadd.f32 %v135_v63, %v105_v59 }
  0x48   :  { %v155_v20 = vmax.f32 %v123_v55, %v151_v16  ;;  %v159_v22 = vld [vmem:[#allocation5 + $0x56] ss:$8 sm:$0x3]  ;;  %v162_v25 = vmax.f32 %v130_v60, %v157_v21  ;;  %v165_v27 = vld [vmem:[#allocation5 + $0x17] ss:$8 sm:$0x3]  ;;  %v144_v29 = vadd.f32 %v141_v6, %v112_v1  ;;  %v145_v30 = vadd.f32 %v143_v7, %v113_v2 }
  0x49   :  { %v163_v26 = vmax.f32 %v131_v61, %v159_v22  ;;  %v167_v28 = vld [vmem:[#allocation5 + $0x57] ss:$8 sm:$0x3]  ;;  %v170_v31 = vmax.f32 %v138_v3, %v165_v27  ;;  %v173_v33 = vld [vmem:[#allocation5 + $0x20] ss:$8 sm:$0x3]  ;;  %v152_v35 = vadd.f32 %v149_v14, %v120_v8  ;;  %v153_v36 = vadd.f32 %v151_v16, %v121_v11 }
  0x4a   :  { %v171_v32 = vmax.f32 %v139_v5, %v167_v28  ;;  %v175_v34 = vld [vmem:[#allocation5 + $0x60] ss:$8 sm:$0x3]  ;;  %v178_v37 = vmax.f32 %v146_v12, %v173_v33  ;;  %v181_v39 = vld [vmem:[#allocation5 + $0x21] ss:$8 sm:$0x3]  ;;  %v160_v41 = vadd.f32 %v157_v21, %v128_v17  ;;  %v161_v42 = vadd.f32 %v159_v22, %v129_v18 }
  0x4b   :  { %v179_v38 = vmax.f32 %v147_v13, %v175_v34  ;;  %v183_v40 = vld [vmem:[#allocation5 + $0x61] ss:$8 sm:$0x3]  ;;  %v186_v43 = vmax.f32 %v154_v19, %v181_v39  ;;  %v189_v45 = vld [vmem:[#allocation5 + $0x22] ss:$8 sm:$0x3]  ;;  %v168_v47 = vadd.f32 %v165_v27, %v136_v23  ;;  %v169_v48 = vadd.f32 %v167_v28, %v137_v24 }
  0x4c   :  { %v187_v44 = vmax.f32 %v155_v20, %v183_v40  ;;  %v191_v46 = vld [vmem:[#allocation5 + $0x62] ss:$8 sm:$0x3]  ;;  %v194_v49 = vmax.f32 %v162_v25, %v189_v45  ;;  %v197_v51 = vld [vmem:[#allocation5 + $0x23] ss:$8 sm:$0x3]  ;;  %v176_v53 = vadd.f32 %v173_v33, %v144_v29  ;;  %v177_v54 = vadd.f32 %v175_v34, %v145_v30 }
  0x4d   :  { %v195_v50 = vmax.f32 %v163_v26, %v191_v46  ;;  %v199_v52 = vld [vmem:[#allocation5 + $0x63] ss:$8 sm:$0x3]  ;;  %v202_v55 = vmax.f32 %v170_v31, %v197_v51  ;;  %v205_v57 = vld [vmem:[#allocation5 + $0x24] ss:$8 sm:$0x3]  ;;  %v184_v59 = vadd.f32 %v181_v39, %v152_v35  ;;  %v185_v60 = vadd.f32 %v183_v40, %v153_v36 }
  0x4e   :  { %v203_v56 = vmax.f32 %v171_v32, %v199_v52  ;;  %v207_v58 = vld [vmem:[#allocation5 + $0x64] ss:$8 sm:$0x3]  ;;  %v210_v61 = vmax.f32 %v178_v37, %v205_v57  ;;  %v213_v63 = vld [vmem:[#allocation5 + $0x25] ss:$8 sm:$0x3]  ;;  %v192_v2 = vadd.f32 %v189_v45, %v160_v41  ;;  %v193_v3 = vadd.f32 %v191_v46, %v161_v42 }
  0x4f   :  { %v211_v62 = vmax.f32 %v179_v38, %v207_v58  ;;  %v215_v1 = vld [vmem:[#allocation5 + $0x65] ss:$8 sm:$0x3]  ;;  %v218_v5 = vmax.f32 %v186_v43, %v213_v63  ;;  %v221_v7 = vld [vmem:[#allocation5 + $0x26] ss:$8 sm:$0x3]  ;;  %v200_v11 = vadd.f32 %v197_v51, %v168_v47  ;;  %v201_v12 = vadd.f32 %v199_v52, %v169_v48 }
  0x50   :  { %v219_v6 = vmax.f32 %v187_v44, %v215_v1  ;;  %v223_v8 = vld [vmem:[#allocation5 + $0x66] ss:$8 sm:$0x3]  ;;  %v226_v13 = vmax.f32 %v194_v49, %v221_v7  ;;  %v229_v16 = vld [vmem:[#allocation5 + $0x27] ss:$8 sm:$0x3]  ;;  %v208_v18 = vadd.f32 %v205_v57, %v176_v53  ;;  %v209_v19 = vadd.f32 %v207_v58, %v177_v54 }
  0x51   :  { %v227_v14 = vmax.f32 %v195_v50, %v223_v8  ;;  %v231_v17 = vld [vmem:[#allocation5 + $0x67] ss:$8 sm:$0x3]  ;;  %v234_v20 = vmax.f32 %v202_v55, %v229_v16  ;;  %v237_v22 = vld [vmem:[#allocation5 + $0x30] ss:$8 sm:$0x3]  ;;  %v216_v24 = vadd.f32 %v213_v63, %v184_v59  ;;  %v217_v25 = vadd.f32 %v215_v1, %v185_v60 }
  0x52   :  { %v235_v21 = vmax.f32 %v203_v56, %v231_v17  ;;  %v239_v23 = vld [vmem:[#allocation5 + $0x70] ss:$8 sm:$0x3]  ;;  %v242_v26 = vmax.f32 %v210_v61, %v237_v22  ;;  %v245_v28 = vld [vmem:[#allocation5 + $0x31] ss:$8 sm:$0x3]  ;;  %v224_v30 = vadd.f32 %v221_v7, %v192_v2  ;;  %v225_v31 = vadd.f32 %v223_v8, %v193_v3 }
  0x53   :  { %v243_v27 = vmax.f32 %v211_v62, %v239_v23  ;;  %v247_v29 = vld [vmem:[#allocation5 + $0x71] ss:$8 sm:$0x3]  ;;  %v250_v32 = vmax.f32 %v218_v5, %v245_v28  ;;  %v253_v34 = vld [vmem:[#allocation5 + $0x32] ss:$8 sm:$0x3]  ;;  %v232_v36 = vadd.f32 %v229_v16, %v200_v11  ;;  %v233_v37 = vadd.f32 %v231_v17, %v201_v12 }
  0x54   :  { %v251_v33 = vmax.f32 %v219_v6, %v247_v29  ;;  %v255_v35 = vld [vmem:[#allocation5 + $0x72] ss:$8 sm:$0x3]  ;;  %v258_v38 = vmax.f32 %v226_v13, %v253_v34  ;;  %v261_v40 = vld [vmem:[#allocation5 + $0x33] ss:$8 sm:$0x3]  ;;  %v240_v42 = vadd.f32 %v237_v22, %v208_v18  ;;  %v241_v43 = vadd.f32 %v239_v23, %v209_v19 }
  0x55   :  { %v259_v39 = vmax.f32 %v227_v14, %v255_v35  ;;  %v263_v41 = vld [vmem:[#allocation5 + $0x73] ss:$8 sm:$0x3]  ;;  %v266_v44 = vmax.f32 %v234_v20, %v261_v40  ;;  %v269_v46 = vld [vmem:[#allocation5 + $0x34] ss:$8 sm:$0x3]  ;;  %v248_v48 = vadd.f32 %v245_v28, %v216_v24  ;;  %v249_v49 = vadd.f32 %v247_v29, %v217_v25 }
  0x56   :  { %v267_v45 = vmax.f32 %v235_v21, %v263_v41  ;;  %v271_v47 = vld [vmem:[#allocation5 + $0x74] ss:$8 sm:$0x3]  ;;  %v274_v50 = vmax.f32 %v242_v26, %v269_v46  ;;  %v277_v52 = vld [vmem:[#allocation5 + $0x35] ss:$8 sm:$0x3]  ;;  %v256_v54 = vadd.f32 %v253_v34, %v224_v30  ;;  %v257_v55 = vadd.f32 %v255_v35, %v225_v31 }
  0x57   :  { %v275_v51 = vmax.f32 %v243_v27, %v271_v47  ;;  %v279_v53 = vld [vmem:[#allocation5 + $0x75] ss:$8 sm:$0x3]  ;;  %v282_v56 = vmax.f32 %v250_v32, %v277_v52  ;;  %v285_v58 = vld [vmem:[#allocation5 + $0x36] ss:$8 sm:$0x3]  ;;  %v264_v60 = vadd.f32 %v261_v40, %v232_v36  ;;  %v265_v61 = vadd.f32 %v263_v41, %v233_v37 }
  0x58   :  { %v283_v57 = vmax.f32 %v251_v33, %v279_v53  ;;  %v287_v59 = vld [vmem:[#allocation5 + $0x76] ss:$8 sm:$0x3]  ;;  %v290_v62 = vmax.f32 %v258_v38, %v285_v58  ;;  %v293_v1 = vld [vmem:[#allocation5 + $0x37] ss:$8 sm:$0x3]  ;;  %v272_v3 = vadd.f32 %v269_v46, %v240_v42  ;;  %v273_v5 = vadd.f32 %v271_v47, %v241_v43 }
  0x59   :  { %v291_v63 = vmax.f32 %v259_v39, %v287_v59  ;;  %v295_v2 = vld [vmem:[#allocation5 + $0x77] ss:$8 sm:$0x3]  ;;  %v298_v6 = vmax.f32 %v266_v44, %v293_v1  ;;  %v302_v8 = vmax.f32 %v274_v50, %v282_v56  ;;  %v280_v12 = vadd.f32 %v277_v52, %v248_v48  ;;  %v520_v30 = vld [vmem:[#allocation9 + $0x1] ss:$8 sm:$0x3] }
  0x5a   :  { %v299_v7 = vmax.f32 %v267_v45, %v295_v2  ;;  %v303_v11 = vmax.f32 %v275_v51, %v283_v57  ;;  %v281_v13 = vadd.f32 %v279_v53, %v249_v49  ;;  %v288_v14 = vadd.f32 %v285_v58, %v256_v54  ;;  %v684_v34 = vld [vmem:[#allocation9 + $0x2] ss:$8 sm:$0x3]  ;;  %s2131_s25 = smov 2   ;;  %s1893_s26 = sld [smem:[#allocation11 + $0x39]] }
  0x5b   :  { %v306_v16 = vmax.f32 %v302_v8, %v290_v62  ;;  %v2127_v18 = vmov 1935823168   ;;  %v289_v20 = vadd.f32 %v287_v59, %v257_v55  ;;  %v296_v21 = vadd.f32 %v293_v1, %v264_v60  ;;  %s1907_s27 = sld [smem:[#allocation11 + $0x3a]]  ;;  %s1909_s30 = sld [smem:[#allocation11 + $0x41]] }
  0x5c   :  { %v307_v17 = vmax.f32 %v303_v11, %v291_v63  ;;  %v324_v19 = vunpack.c.l.s4 %v2127_v18  ;;  %v297_v22 = vadd.f32 %v295_v2, %v265_v61  ;;  %v300_v23 = vadd.f32 %v280_v12, %v272_v3  ;;  %s1895_s6 = sld [smem:[#allocation11 + $0x40]]  ;;  %s1935_s7 = sld [smem:[#allocation11 + $0x3c]] }
  0x5d   :  { %v301_v24 = vadd.f32 %v281_v13, %v273_v5  ;;  %v310_v25 = vmax.f32 %v306_v16, %v298_v6  ;;  %v2128_v33 = vmov 0.0   ;;  %v655_v38 = vrot.slane %v520_v30, %v2213_v9  ;;  %s1921_s8 = sld [smem:[#allocation11 + $0x3b]]  ;;  %s2244_s9 = sld [smem:[#allocation11 + $0x47]] }
  0x5e   :  { %v311_v26 = vmax.f32 %v307_v17, %v299_v7  ;;  %v325_v27 = vunpack.c.0.s8 %v324_v19  ;;  %v304_v28 = vadd.f32 %v300_v23, %v288_v14  ;;  %318 = vst.msk [vmem:[#allocation3] sm:$0x3] %vm314_vm0, %v2128_v33  ;;  %315 = vst.msk [vmem:[#allocation2] sm:$0x3] %vm314_vm0, %v2128_v33  ;;  %v659_v39 = vrot.slane %v520_v30, %v2216_v10  ;;  %s2246_s10 = sld [smem:[#allocation11 + $0x48]]  ;;  %s2132_s11 = smov 112  }
  0x5f   :  { %v305_v29 = vadd.f32 %v301_v24, %v289_v20  ;;  %319 = vst.msk [vmem:[#allocation3 + $0x4] sm:$0x3] %vm316_vm1, %v2128_v33  ;;  %317 = vst.msk [vmem:[#allocation2 + $0x4] sm:$0x3] %vm316_vm1, %v2128_v33  ;;  %v819_v42 = vrot.slane %v684_v34, %v2213_v9  ;;  %v823_v43 = vrot.slane %v684_v34, %v2216_v10  ;;  %vm336_vm2 = vcmask 1041816   ;;  %s2252_s12 = sld [smem:[#allocation11 + $0x42]] }
  0x60   :  { %v328_v31 = vsub.s32 %v325_v27, %v2210_v4  ;;  %v344_v32 = vcombine.low %v310_v25, %v311_v26  ;;  %v308_v35 = vadd.f32 %v304_v28, %v296_v21  ;;  %v660_v44 = vcombine.low %v655_v38, %v659_v39  ;;  %s2258_s13 = sld [smem:[#allocation11 + $0x43]]  ;;  %s2133_s14 = smov 96  }
  0x61   :  { %v309_v36 = vadd.f32 %v305_v29, %v297_v22  ;;  %v824_v46 = vcombine.low %v819_v42, %v823_v43  ;;  %vm337_vm3 = vcmask 1043458   ;;  %vm339_vm5 = vcmask 414724   ;;  %s2262_s15 = sld [smem:[#allocation11 + $0x3d]]  ;;  %s2264_s16 = sld [smem:[#allocation11 + $0x3e]] }
  0x62   :  { %v351_v37 = vrot.slane %v344_v32, %v328_v31  ;;  %v312_v40 = vmul.f32 0.03125, %v308_v35  ;;  %v667_v47 = vrot.slane %v660_v44, %v2219_v15  ;;  %vm338_vm4 = vmor %vm337_vm3, %vm336_vm2  ;;  %vm333_vm6 = vcmask 416768   ;;  %s2268_s17 = sld [smem:[#allocation11 + $0x4e]]  ;;  %s2270_s18 = sld [smem:[#allocation11 + $0x4f]] }
  0x63   :  { %v313_v41 = vmul.f32 0.03125, %v309_v36  ;;  %v831_v49 = vrot.slane %v824_v46, %v2219_v15  ;;  %vm340_vm7 = vmor %vm339_vm5, %vm338_vm4  ;;  %v542_v58 = vstv %s1893_s26  ;;  %v706_v59 = vstv %s1907_s27  ;;  %s2274_s0 = sld [smem:[#allocation11 + $0x49]]  ;;  %s2276_s2 = sld [smem:[#allocation11 + $0x4a]] }
  0x64   :  { %352 = vrot.lane.b32.xlu0 %v351_v37, %s2129_s23  ;;  %668 = vrot.lane.b32.xlu1 %v667_v47, %s2130_s24  ;;  %v726_v1 = vstv %s1909_s30  ;;  %v562_v2 = vstv %s1895_s6  ;;  %s2280_s19 = sld [smem:[#allocation11 + $0x33]]  ;;  %s2282_s20 = sld [smem:[#allocation11 + $0x32]]  ;;  %vm379_vm8 = vcmask 916480   ;;  %vm401_vm9 = vcmask 785408  }
  0x65   :  { %v322_v45 = vcombine.low %v312_v40, %v313_v41  ;;  %v1034_v7 = vstv %s1935_s7  ;;  %v870_v11 = vstv %s1921_s8  ;;  %v582_v14 = vstv %s2244_s9  ;;  %s2284_s21 = sld [smem:[#allocation11 + $0x34]]  ;;  %s2288_s1 = sld [smem:[#allocation11 + $0x2]] }
  0x66   :  { %v746_v16 = vstv %s2246_s10  ;;  %s2290_s22 = sld [smem:[#allocation11 + $0x36]]  ;;  %v890_v19 = vstv %s2252_s12  ;;  %v1054_v20 = vstv %s2258_s13  ;;  %s2296_s24 = sld [smem:[#allocation11 + $0x35]]  ;;  %vm422_vm10 = vcmask 654336  }
  0x67   :  { %v329_v48 = vrot.slane %v322_v45, %v328_v31  ;;  %s2300_s26 = sld [smem:[#allocation11 + $0x3]]  ;;  %s2302_s27 = sld [smem:[#allocation11 + $0x37]]  ;;  %v1198_v24 = vstv %s2262_s15  ;;  %v1362_v26 = vstv %s2264_s16  ;;  %vm443_vm11 = vcmask 523264  }
  0x68   :  { %832 = vrot.lane.b32.xlu1 %v831_v49, %s2131_s25  ;;  %s2134_s25 = smov 80   ;;  %s2304_s30 = sld [smem:[#allocation11 + $0x5]]  ;;  %v602_v27 = vstv %s2268_s17  ;;  %v766_v28 = vstv %s2270_s18  ;;  %vm464_vm12 = vcmask 392192   ;;  %vm485_vm13 = vcmask 261120  }
  0x69   :  { %330 = vrot.lane.b32.xlu0 %v329_v48, %s2129_s23  ;;  %s2294_s23 = sld [smem:[#allocation11 + $0x1]]  ;;  %s2306_s6 = sld [smem:[#allocation11 + $0x4]]  ;;  %v910_v29 = vstv %s2274_s0  ;;  %v1074_v30 = vstv %s2276_s2  ;;  %vm671_vm14 = vcmask 7168   ;;  %vm835_vm15 = vcmask 15360  }
  0x6a   :  { %s2310_s7 = sld [smem:[#allocation11 + $0x6]]  ;;  %v692_v31 = vstv %s2280_s19  ;;  %v528_v36 = vstv %s2282_s20  ;;  %s2331_s8 = sld [smem:[#allocation11 + $0x44]]  ;;  %vm999_vm0 = vcmask 23552   ;;  %vm1163_vm1 = vcmask 31744  }
  0x6b   :  { %v687_v35 = vstv %s2288_s1  ;;  %s2333_s9 = sld [smem:[#allocation11 + $0x45]]  ;;  %v856_v38 = vstv %s2284_s21  ;;  %s2361_s12 = sld [smem:[#allocation11 + $0x56]]  ;;  %vm1327_vm2 = vcmask 39936   ;;  %vm1491_vm3 = vcmask 48128  }
  0x6c   :  { %v1184_v39 = vstv %s2290_s22  ;;  %v1020_v40 = vstv %s2296_s24  ;;  %s2359_s10 = sld [smem:[#allocation11 + $0x55]]  ;;  %s2135_s13 = smov 64   ;;  %vm679_vm4 = vcmask 1039360   ;;  %vm843_vm5 = vcmask 1031168  }
  0x6d   :  { %v851_v43 = vstv %s2300_s26  ;;  %v1348_v44 = vstv %s2302_s27  ;;  %s1927_s15 = sld [smem:[#allocation11 + $0x50]]  ;;  %s1941_s16 = sld [smem:[#allocation11 + $0x51]] }
  0x6e   :  { %v1179_v48 = vstv %s2304_s30  ;;  %s1953_s17 = sld [smem:[#allocation11 + $0x4b]]  ;;  %s1967_s18 = sld [smem:[#allocation11 + $0x4c]] }
  0x6f   :  { %v523_v37 = vstv %s2294_s23  ;;  %v1015_v49 = vstv %s2306_s6  ;;  %s1903_s0 = sld [smem:[#allocation11 + $0x5c]]  ;;  %s1917_s2 = sld [smem:[#allocation11 + $0x5d]] }
  0x70   :  { %s2136_s19 = smov 48   ;;  %s1929_s20 = sld [smem:[#allocation11 + $0x57]] }
  0x71   :  { %s1943_s21 = sld [smem:[#allocation11 + $0x58]]  ;;  %s1955_s1 = sld [smem:[#allocation11 + $0x52]] }
  0x72   :  { %s1969_s22 = sld [smem:[#allocation11 + $0x53]]  ;;  %s1945_s23 = sld [smem:[#allocation11 + $0x5f]] }
  0x73   :  { %s1931_s24 = sld [smem:[#allocation11 + $0x5e]]  ;;  %s2137_s26 = smov 32  }
  0x74   :  { %s1971_s27 = sld [smem:[#allocation11 + $0x5a]]  ;;  %s1957_s30 = sld [smem:[#allocation11 + $0x59]] }
  0x75   :  { %s1906_s6 = sld [smem:[#allocation11 + $0x9]] }
  0xb4   :  { %v2234_v50 = vpop.permute.xlu0 %996 }
  0xb8   :  { %v2236_v51 = vpop.permute.xlu0 %1160 }
  0xd6   :  { %v353_v52 = vpop.permute.xlu0 %352 }
  0xd7   :  { %v354_v53 = vrot.slane %v353_v52, 6 }
  0xd9   :  { %v355_v54 = vsel %vm333_vm6, %v354_v53, %v353_v52 }
  0xda   :  { %357 = vst.msk [vmem:[#allocation3] sm:$0x3f] %vm340_vm7, %v355_v54 }
  0xdb   :  { %v331_v55 = vpop.permute.xlu0 %330 }
  0xdc   :  { %v332_v56 = vrot.slane %v331_v55, 6 }
  0xde   :  { %v334_v57 = vsel %vm333_vm6, %v332_v56, %v331_v55  ;;  %v1343_v56 = vstv %s2310_s7  ;;  %s1959_s7 = sld [smem:[#allocation11 + $0x60]]  ;;  %vm1007_vm6 = vcmask 1022976  }
  0xdf   :  { %341 = vst.msk [vmem:[#allocation2] sm:$0x3f] %vm340_vm7, %v334_v57  ;;  %vm1171_vm7 = vcmask 1014784  }
  0xe1   :  { %v2238_v60 = vld [vmem:[#allocation3] sm:$0x3f] }
  0xe2   :  { %v2240_v61 = vld [vmem:[#allocation3] sm:$0x3f]  ;;  %v543_v62 = vmul.f32 %v542_v58, %v2238_v60  ;;  %v563_v5 = vmul.f32 %v562_v2, %v2238_v60  ;;  %v583_v17 = vmul.f32 %v582_v14, %v2238_v60  ;;  %v603_v52 = vmul.f32 %v602_v27, %v2238_v60 }
  0xe3   :  { %v707_v63 = vmul.f32 %v706_v59, %v2240_v61  ;;  %v727_v3 = vmul.f32 %v726_v1, %v2240_v61  ;;  %v2254_v6 = vld [vmem:[#allocation3] sm:$0x3f]  ;;  %v747_v18 = vmul.f32 %v746_v16, %v2240_v61  ;;  %v693_v47 = vmul.f32 %v692_v31, %v2240_v61 }
  0xe4   :  { %545 = vrot.lane.b32.xlu1 %v543_v62, %s2132_s11  ;;  %v2256_v8 = vld [vmem:[#allocation3] sm:$0x3f]  ;;  %v1035_v12 = vmul.f32 %v1034_v7, %v2254_v6  ;;  %v1055_v22 = vmul.f32 %v1054_v20, %v2254_v6  ;;  %v767_v53 = vmul.f32 %v766_v28, %v2240_v61  ;;  %v529_v55 = vmul.f32 %v528_v36, %v2238_v60 }
  0xe5   :  { %709 = vrot.lane.b32.xlu0 %v707_v63, %s2132_s11  ;;  %v871_v13 = vmul.f32 %v870_v11, %v2256_v8  ;;  %v891_v21 = vmul.f32 %v890_v19, %v2256_v8  ;;  %v2312_v23 = vld [vmem:[#allocation3] sm:$0x3f]  ;;  %v857_v63 = vmul.f32 %v856_v38, %v2256_v8  ;;  %v911_v1 = vmul.f32 %v910_v29, %v2256_v8 }
  0xe6   :  { %v2315_v25 = vld [vmem:[#allocation3] sm:$0x3f]  ;;  %v1199_v32 = vmul.f32 %v1198_v24, %v2312_v23  ;;  %v2327_v34 = vld [vmem:[#allocation2] sm:$0x3f]  ;;  %v1382_v19 = vstv %s2333_s9  ;;  %v786_v27 = vstv %s2361_s12  ;;  %v1094_v31 = vstv %s1941_s16  ;;  %s1892_s9 = sld [smem:[#allocation11 + $0x8]]  ;;  %s1894_s12 = sld [smem:[#allocation11 + $0xf]] }
  0xe7   :  { %v1363_v33 = vmul.f32 %v1362_v26, %v2315_v25  ;;  %v2341_v41 = vld [vmem:[#allocation2] sm:$0x3f]  ;;  %v688_v46 = vmul.f32 %v687_v35, %v2327_v34  ;;  %v1383_v24 = vmul.f32 %v1382_v19, %v2315_v25  ;;  %v622_v26 = vstv %s2359_s10  ;;  %s1922_s10 = sld [smem:[#allocation11 + $0x11]]  ;;  %s1920_s16 = sld [smem:[#allocation11 + $0xa]] }
  0xe8   :  { %729 = vrot.lane.b32.xlu1 %v727_v3, %s2133_s14  ;;  %v2343_v42 = vld [vmem:[#allocation2] sm:$0x3f]  ;;  %v524_v59 = vmul.f32 %v523_v37, %v2341_v41  ;;  %v1185_v3 = vmul.f32 %v1184_v39, %v2312_v23  ;;  %v623_v28 = vmul.f32 %v622_v26, %v2238_v60  ;;  %v787_v29 = vmul.f32 %v786_v27, %v2240_v61 }
  0xe9   :  { %565 = vrot.lane.b32.xlu0 %v563_v5, %s2133_s14  ;;  %v2347_v45 = vld [vmem:[#allocation2] sm:$0x3f]  ;;  %v2365_v58 = vadd.f32 %v693_v47, %v688_v46  ;;  %v852_v62 = vmul.f32 %v851_v43, %v2343_v42  ;;  %v1238_v35 = vstv %s1953_s17  ;;  %v1402_v36 = vstv %s1967_s18  ;;  %s1910_s17 = sld [smem:[#allocation11 + $0x17]]  ;;  %s1908_s18 = sld [smem:[#allocation11 + $0x10]] }
  0xea   :  { %v2355_v54 = vld [vmem:[#allocation2] sm:$0x3f]  ;;  %v1180_v2 = vmul.f32 %v1179_v48, %v2347_v45  ;;  %v2375_v5 = vadd.f32 %v529_v55, %v524_v59  ;;  %v1239_v37 = vmul.f32 %v1238_v35, %v2312_v23  ;;  %v1403_v38 = vmul.f32 %v1402_v36, %v2315_v25 }
  0xeb   :  { %v2363_v57 = vld [vmem:[#allocation2] sm:$0x3f]  ;;  %v2377_v7 = vadd.f32 %v857_v63, %v852_v62  ;;  %v1016_v11 = vmul.f32 %v1015_v49, %v2355_v54  ;;  %v642_v39 = vstv %s1903_s0  ;;  %v950_v46 = vstv %s1929_s20  ;;  %s1936_s0 = sld [smem:[#allocation11 + $0x12]]  ;;  %s1962_s20 = sld [smem:[#allocation11 + $0xd]] }
  0xec   :  { %1037 = vrot.lane.b32.xlu1 %v1035_v12, %s2132_s11  ;;  %v1021_v12 = vmul.f32 %v1020_v40, %v2254_v6  ;;  %v2382_v14 = vadd.f32 %v1185_v3, %v1180_v2  ;;  %v1344_v16 = vmul.f32 %v1343_v56, %v2363_v57  ;;  %v806_v40 = vstv %s1917_s2  ;;  %s1934_s2 = sld [smem:[#allocation11 + $0xb]] }
  0xed   :  { %873 = vrot.lane.b32.xlu0 %v871_v13, %s2132_s11  ;;  %v1075_v13 = vmul.f32 %v1074_v30, %v2254_v6  ;;  %v930_v30 = vstv %s1927_s15  ;;  %v643_v43 = vmul.f32 %v642_v39, %v2238_v60  ;;  %v1114_v47 = vstv %s1943_s21  ;;  %s1948_s15 = sld [smem:[#allocation11 + $0xc]]  ;;  %s1898_s21 = sld [smem:[#allocation11 + $0x1d]] }
  0xee   :  { %v2388_v20 = vadd.f32 %v1021_v12, %v1016_v11  ;;  %v951_v48 = vmul.f32 %v950_v46, %v2256_v8  ;;  %v1115_v49 = vmul.f32 %v1114_v47, %v2254_v6  ;;  %v1134_v55 = vstv %s1945_s23  ;;  %s1938_s23 = sld [smem:[#allocation11 + $0x19]] }
  0xef   :  { %v970_v56 = vstv %s1931_s24  ;;  %v1135_v59 = vmul.f32 %v1134_v55, %v2254_v6  ;;  %v1442_v63 = vstv %s1971_s27  ;;  %v696_v2 = vstv %s1906_s6  ;;  %s1950_s24 = sld [smem:[#allocation11 + $0x13]]  ;;  %s1964_s27 = sld [smem:[#allocation11 + $0x14]] }
  0xf0   :  { %585 = vrot.lane.b32.xlu1 %v583_v17, %s2134_s25  ;;  %v1349_v17 = vmul.f32 %v1348_v44, %v2315_v25  ;;  %v807_v44 = vmul.f32 %v806_v40, %v2240_v61  ;;  %v971_v62 = vmul.f32 %v970_v56, %v2256_v8  ;;  %v1443_v3 = vmul.f32 %v1442_v63, %v2315_v25  ;;  %s1914_s6 = sld [smem:[#allocation11 + $0x25]] }
  0xf1   :  { %749 = vrot.lane.b32.xlu0 %v747_v18, %s2134_s25  ;;  %v1218_v18 = vstv %s2331_s8  ;;  %s1896_s8 = sld [smem:[#allocation11 + $0x16]]  ;;  %v1298_v12 = vstv %s1959_s7  ;;  %v880_v19 = vstv %s1922_s10  ;;  %s1926_s7 = sld [smem:[#allocation11 + $0x1f]] }
  0xf2   :  { %v860_v27 = vstv %s1920_s16  ;;  %v1044_v35 = vstv %s1936_s0  ;;  %v1024_v36 = vstv %s1934_s2  ;;  %v1352_v39 = vstv %s1962_s20  ;;  %s1966_s10 = sld [smem:[#allocation11 + $0x1b]]  ;;  %s1928_s16 = sld [smem:[#allocation11 + $0x26]] }
  0xf3   :  { %v1188_v26 = vstv %s1948_s15  ;;  %v592_v40 = vstv %s1898_s21  ;;  %s1916_s15 = sld [smem:[#allocation11 + $0x2c]]  ;;  %s1968_s0 = sld [smem:[#allocation11 + $0x22]] }
  0xf4   :  { %893 = vrot.lane.b32.xlu1 %v891_v21, %s2133_s14  ;;  %v2392_v21 = vadd.f32 %v1349_v17, %v1344_v16  ;;  %v532_v16 = vstv %s1892_s9  ;;  %s1952_s9 = sld [smem:[#allocation11 + $0x1a]]  ;;  %s1930_s2 = sld [smem:[#allocation11 + $0x2d]] }
  0xf5   :  { %1057 = vrot.lane.b32.xlu0 %v1055_v22, %s2133_s14  ;;  %v1219_v22 = vmul.f32 %v1218_v18, %v2312_v23  ;;  %v533_v18 = vmul.f32 %v532_v16, %v2341_v41  ;;  %v1372_v55 = vstv %s1964_s27  ;;  %s1958_s20 = sld [smem:[#allocation11 + $0x2f]]  ;;  %s1956_s21 = sld [smem:[#allocation11 + $0x28]] }
  0xf6   :  { %v776_v63 = vstv %s1914_s6  ;;  %s2526_s27 = sld [smem:[#allocation11 + $0x7]]  ;;  %s1879_s6 = sld [smem:[#allocation11 + $0x38]] }
  0xf8   :  { %1201 = vrot.lane.b32.xlu1 %v1199_v32, %s2132_s11  ;;  %v931_v32 = vmul.f32 %v930_v30, %v2256_v8  ;;  %v1299_v8 = vmul.f32 %v1298_v12, %v2312_v23  ;;  %v736_v30 = vstv %s1910_s17  ;;  %s1942_s17 = sld [smem:[#allocation11 + $0x27]] }
  0xf9   :  { %1365 = vrot.lane.b32.xlu0 %v1363_v33, %s2132_s11  ;;  %v1095_v33 = vmul.f32 %v1094_v31, %v2254_v6  ;;  %v697_v6 = vmul.f32 %v696_v2, %v2327_v34  ;;  %v716_v31 = vstv %s1908_s18  ;;  %v2470_v2 = vpop.permute.xlu1 %668  ;;  %s1954_s18 = sld [smem:[#allocation11 + $0x21]] }
  0xfc   :  { %605 = vrot.lane.b32.xlu1 %v603_v52, %s2135_s13  ;;  %v1258_v52 = vstv %s1955_s1  ;;  %s1912_s1 = sld [smem:[#allocation11 + $0x1e]] }
  0xfd   :  { %769 = vrot.lane.b32.xlu0 %v767_v53, %s2135_s13  ;;  %v1422_v53 = vstv %s1969_s22  ;;  %v1259_v60 = vmul.f32 %v1258_v52, %v2312_v23  ;;  %s1924_s22 = sld [smem:[#allocation11 + $0x18]]  ;;  %v1064_v52 = vstv %s1938_s23  ;;  %s2514_s23 = sld [smem:[#allocation11 + $0x61]] }
  0xfe   :  { %v1423_v61 = vmul.f32 %v1422_v53, %v2315_v25  ;;  %v1208_v53 = vstv %s1950_s24  ;;  %s2516_s24 = sld [smem:[#allocation11 + $0x29]] }
 0x100   :  { %913 = vrot.lane.b32.xlu1 %v911_v1, %s2134_s25  ;;  %v1278_v1 = vstv %s1957_s30  ;;  %s1900_s30 = sld [smem:[#allocation11 + $0x24]] }
 0x101   :  { %1077 = vrot.lane.b32.xlu0 %v1075_v13, %s2134_s25  ;;  %v1279_v11 = vmul.f32 %v1278_v1, %v2312_v23  ;;  %v572_v13 = vstv %s1896_s8  ;;  %v881_v23 = vmul.f32 %v880_v19, %v2343_v42  ;;  %s1940_s8 = sld [smem:[#allocation11 + $0x20]]  ;;  %v920_v1 = vstv %s1926_s7  ;;  %s1882_s7 = sld [smem:[#allocation11 + $0x15]] }
 0x102   :  { %v573_v17 = vmul.f32 %v572_v13, %v2341_v41  ;;  %v756_v46 = vstv %s1912_s1  ;;  %s1972_s1 = sld [smem:[#allocation11 + $0x30]] }
 0x103   :  { %v900_v47 = vstv %s1924_s22  ;;  %s1944_s22 = sld [smem:[#allocation11 + $0x2e]] }
 0x104   :  { %1221 = vrot.lane.b32.xlu1 %v1219_v22, %s2133_s14  ;;  %v552_v22 = vstv %s1894_s12  ;;  %s1902_s12 = sld [smem:[#allocation11 + $0x2b]] }
 0x105   :  { %1385 = vrot.lane.b32.xlu0 %v1383_v24, %s2133_s14  ;;  %v553_v24 = vmul.f32 %v552_v22, %v2341_v41 }
 0x106   :  { %v612_v56 = vstv %s1900_s30  ;;  %s1880_s30 = sld [smem:[#allocation11 + $0xe]] }
 0x107   :  { %v1084_v12 = vstv %s1940_s8  ;;  %s1881_s8 = sld [smem:[#allocation11 + $0x3f]] }
 0x108   :  { %625 = vrot.lane.b32.xlu1 %v623_v28, %s2136_s19  ;;  %v1189_v28 = vmul.f32 %v1188_v26, %v2347_v45  ;;  %v1085_v13 = vmul.f32 %v1084_v12, %v2355_v54  ;;  %v796_v26 = vstv %s1916_s15  ;;  %s1886_s15 = sld [smem:[#allocation11 + $0x23]] }
 0x109   :  { %789 = vrot.lane.b32.xlu0 %v787_v29, %s2136_s19  ;;  %v861_v29 = vmul.f32 %v860_v27, %v2343_v42  ;;  %v940_v27 = vstv %s1928_s16  ;;  %s2139_s16 = smov 6  }
 0x10c   :  { %933 = vrot.lane.b32.xlu1 %v931_v32, %s2135_s13  ;;  %v737_v32 = vmul.f32 %v736_v30, %v2327_v34  ;;  %v797_v30 = vmul.f32 %v796_v26, %v2327_v34 }
 0x10d   :  { %1097 = vrot.lane.b32.xlu0 %v1095_v33, %s2135_s13  ;;  %v717_v33 = vmul.f32 %v716_v31, %v2327_v34  ;;  %v941_v31 = vmul.f32 %v940_v27, %v2343_v42 }
 0x110   :  { %1241 = vrot.lane.b32.xlu1 %v1239_v37, %s2134_s25  ;;  %v1045_v37 = vmul.f32 %v1044_v35, %v2355_v54 }
 0x111   :  { %1405 = vrot.lane.b32.xlu0 %v1403_v38, %s2134_s25  ;;  %v1025_v38 = vmul.f32 %v1024_v36, %v2355_v54 }
 0x114   :  { %645 = vrot.lane.b32.xlu1 %v643_v43, %s2137_s26  ;;  %v1353_v43 = vmul.f32 %v1352_v39, %v2363_v57 }
 0x115   :  { %809 = vrot.lane.b32.xlu0 %v807_v44, %s2137_s26  ;;  %v593_v44 = vmul.f32 %v592_v40, %v2341_v41 }
 0x118   :  { %953 = vrot.lane.b32.xlu1 %v951_v48, %s2136_s19  ;;  %v757_v48 = vmul.f32 %v756_v46, %v2327_v34  ;;  %v1288_v46 = vstv %s1958_s20  ;;  %s361_s20 = sld [smem:[#allocation11]] }
 0x119   :  { %1117 = vrot.lane.b32.xlu0 %v1115_v49, %s2136_s19  ;;  %v901_v49 = vmul.f32 %v900_v47, %v2343_v42  ;;  %v1268_v47 = vstv %s1956_s21  ;;  %s1877_s21 = sld [smem:[#allocation11 + $0x31]] }
 0x11c   :  { %1261 = vrot.lane.b32.xlu1 %v1259_v60, %s2135_s13  ;;  %v1065_v60 = vmul.f32 %v1064_v52, %v2355_v54 }
 0x11d   :  { %1425 = vrot.lane.b32.xlu0 %v1423_v61, %s2135_s13  ;;  %v1209_v61 = vmul.f32 %v1208_v53, %v2347_v45  ;;  %v1289_v53 = vmul.f32 %v1288_v46, %v2347_v45 }
 0x120   :  { %1137 = vrot.lane.b32.xlu1 %v1135_v59, %s2137_s26  ;;  %v1373_v59 = vmul.f32 %v1372_v55, %v2363_v57 }
 0x121   :  { %973 = vrot.lane.b32.xlu0 %v971_v62, %s2137_s26  ;;  %v613_v62 = vmul.f32 %v612_v56, %v2341_v41 }
 0x124   :  { %1445 = vrot.lane.b32.xlu1 %v1443_v3, %s2136_s19  ;;  %v777_v3 = vmul.f32 %v776_v63, %v2327_v34  ;;  %v960_v34 = vstv %s1930_s2  ;;  %s2145_s2 = smov 122  }
 0x125   :  { %1281 = vrot.lane.b32.xlu0 %v1279_v11, %s2136_s19  ;;  %v921_v11 = vmul.f32 %v920_v1, %v2343_v42 }
 0x128   :  { %1301 = vrot.lane.b32.xlu1 %v1299_v8, %s2137_s26  ;;  %v2478_v8 = vpop.permute.xlu1 %832 }
 0x129   :  { %699 = vrot.lane.b32.xlu0 %v697_v6, %s2132_s11  ;;  %v1228_v6 = vstv %s1952_s9  ;;  %s1884_s9 = sld [smem:[#allocation11 + $0x1c]] }
 0x12a   :  { %v1229_v16 = vmul.f32 %v1228_v6, %v2347_v45 }
 0x12c   :  { %535 = vrot.lane.b32.xlu1 %v533_v18, %s2132_s11  ;;  %v632_v18 = vstv %s1902_s12  ;;  %s1883_s12 = sld [smem:[#allocation11 + $0x46]] }
 0x12d   :  { %575 = vrot.lane.b32.xlu0 %v573_v17, %s2134_s25  ;;  %v1392_v17 = vstv %s1966_s10  ;;  %s2138_s10 = smov 5  }
 0x130   :  { %555 = vrot.lane.b32.xlu1 %v553_v24, %s2133_s14  ;;  %v633_v24 = vmul.f32 %v632_v18, %v2341_v41 }
 0x131   :  { %883 = vrot.lane.b32.xlu0 %v881_v23, %s2133_s14  ;;  %v1393_v23 = vmul.f32 %v1392_v17, %v2363_v57 }
 0x134   :  { %863 = vrot.lane.b32.xlu1 %v861_v29, %s2132_s11 }
 0x135   :  { %1191 = vrot.lane.b32.xlu0 %v1189_v28, %s2132_s11 }
 0x138   :  { %719 = vrot.lane.b32.xlu1 %v717_v33, %s2133_s14  ;;  %v1248_v33 = vstv %s1954_s18  ;;  %s1888_s18 = sld [smem:[#allocation11 + $0x2a]] }
 0x139   :  { %739 = vrot.lane.b32.xlu0 %v737_v32, %s2134_s25  ;;  %v1104_v32 = vstv %s1942_s17  ;;  %s1885_s17 = sld [smem:[#allocation11 + $0x4d]] }
 0x13a   :  { %v1105_v36 = vmul.f32 %v1104_v32, %v2355_v54 }
 0x13c   :  { %1027 = vrot.lane.b32.xlu1 %v1025_v38, %s2132_s11  ;;  %v1412_v38 = vstv %s1968_s0  ;;  %s1887_s0 = sld [smem:[#allocation11 + $0x54]] }
 0x13d   :  { %1047 = vrot.lane.b32.xlu0 %v1045_v37, %s2133_s14  ;;  %v1249_v37 = vmul.f32 %v1248_v33, %v2347_v45  ;;  %v395_v33 = vstv %s1880_s30 }
 0x140   :  { %595 = vrot.lane.b32.xlu1 %v593_v44, %s2135_s13  ;;  %v961_v44 = vmul.f32 %v960_v34, %v2343_v42  ;;  %v1269_v42 = vmul.f32 %v1268_v47, %v2347_v45  ;;  %v385_v34 = vstv %s1879_s6 }
 0x141   :  { %1355 = vrot.lane.b32.xlu0 %v1353_v43, %s2132_s11  ;;  %v1413_v43 = vmul.f32 %v1412_v38, %v2363_v57  ;;  %v384_v38 = vld [vmem:[#allocation3] sm:$0x3f] }
 0x142   :  { %v386_v47 = vmul.f32 %v385_v34, %v384_v38 }
 0x144   :  { %903 = vrot.lane.b32.xlu1 %v901_v49, %s2134_s25 }
 0x145   :  { %759 = vrot.lane.b32.xlu0 %v757_v48, %s2135_s13  ;;  %v1176_v48 = vld [vmem:[#allocation9 + $0x5] ss:$8 sm:$0x3] }
 0x146   :  { %v1311_v55 = vrot.slane %v1176_v48, %v2213_v9  ;;  %v1315_v56 = vrot.slane %v1176_v48, %v2216_v10 }
 0x148   :  { %1211 = vrot.lane.b32.xlu1 %v1209_v61, %s2133_s14  ;;  %v1124_v61 = vstv %s1944_s22  ;;  %v1316_v12 = vcombine.low %v1311_v55, %v1315_v56 }
 0x149   :  { %1067 = vrot.lane.b32.xlu0 %v1065_v60, %s2134_s25  ;;  %v1452_v60 = vstv %s1972_s1  ;;  %v1125_v1 = vmul.f32 %v1124_v61, %v2355_v54 }
 0x14a   :  { %v1453_v45 = vmul.f32 %v1452_v60, %v2363_v57  ;;  %v1323_v26 = vrot.slane %v1316_v12, %v2219_v15 }
 0x14c   :  { %615 = vrot.lane.b32.xlu1 %v613_v62, %s2136_s19 }
 0x14d   :  { %1375 = vrot.lane.b32.xlu0 %v1373_v59, %s2133_s14  ;;  %v1340_v59 = vld [vmem:[#allocation9 + $0x6] ss:$8 sm:$0x3] }
 0x14e   :  { %v1475_v6 = vrot.slane %v1340_v59, %v2213_v9 }
 0x150   :  { %923 = vrot.lane.b32.xlu1 %v921_v11, %s2135_s13  ;;  %v1432_v11 = vstv %s2516_s24 }
 0x151   :  { %779 = vrot.lane.b32.xlu0 %v777_v3, %s2136_s19  ;;  %v1462_v3 = vstv %s2514_s23  ;;  %v1433_v54 = vmul.f32 %v1432_v11, %v2363_v57 }
 0x152   :  { %v1463_v18 = vmul.f32 %v1462_v3, %v2315_v25 }
 0x154   :  { %1231 = vrot.lane.b32.xlu1 %v1229_v16, %s2134_s25 }
 0x155   :  { %1087 = vrot.lane.b32.xlu0 %v1085_v13, %s2135_s13  ;;  %v1479_v13 = vrot.slane %v1340_v59, %v2216_v10  ;;  %v427_v59 = vstv %s1883_s12 }
 0x156   :  { %v2484_v19 = vpop.permute.xlu1 %545  ;;  %v428_v11 = vmul.f32 %v427_v59, %v384_v38 }
 0x157   :  { %v2486_v22 = vpop.permute.xlu0 %709  ;;  %v1480_v27 = vcombine.low %v1475_v6, %v1479_v13  ;;  %v448_v6 = vstv %s1885_s17  ;;  %v479_v13 = vstv %s1888_s18 }
 0x158   :  { %635 = vrot.lane.b32.xlu1 %v633_v24, %s2137_s26  ;;  %v373_v24 = vstv %s2526_s27  ;;  %v711_v59 = vrot.slane %v2486_v22, 2 }
 0x159   :  { %1395 = vrot.lane.b32.xlu0 %v1393_v23, %s2134_s25  ;;  %v372_v23 = vld [vmem:[#allocation2] sm:$0x3f]  ;;  %v1487_v25 = vrot.slane %v1480_v27, %v2219_v15  ;;  %v469_v27 = vstv %s1887_s0 }
 0x15a   :  { %v2492_v28 = vpop.permute.xlu1 %729  ;;  %v374_v32 = vmul.f32 %v373_v24, %v372_v23  ;;  %v449_v24 = vmul.f32 %v448_v6, %v384_v38 }
 0x15b   :  { %v2494_v29 = vpop.permute.xlu0 %565 }
 0x15c   :  { %943 = vrot.lane.b32.xlu1 %v941_v31, %s2136_s19 }
 0x15d   :  { %799 = vrot.lane.b32.xlu0 %v797_v30, %s2137_s26 }
 0x15e   :  { %v2500_v41 = vpop.permute.xlu1 %1037 }
 0x15f   :  { %v2502_v35 = vpop.permute.xlu0 %873 }
 0x160   :  { %1251 = vrot.lane.b32.xlu1 %v1249_v37, %s2135_s13  ;;  %v396_v37 = vmul.f32 %v395_v33, %v372_v23 }
 0x161   :  { %1107 = vrot.lane.b32.xlu0 %v1105_v36, %s2136_s19 }
 0x162   :  { %v2508_v39 = vpop.permute.xlu1 %585 }
 0x163   :  { %v2510_v40 = vpop.permute.xlu0 %749 }
 0x164   :  { %963 = vrot.lane.b32.xlu1 %v961_v44, %s2137_s26 }
 0x165   :  { %1415 = vrot.lane.b32.xlu0 %v1413_v43, %s2135_s13  ;;  %v416_v43 = vstv %s1882_s7 }
 0x166   :  { %v2520_v49 = vpop.permute.xlu1 %893  ;;  %v417_v48 = vmul.f32 %v416_v43, %v372_v23 }
 0x167   :  { %v2522_v52 = vpop.permute.xlu0 %1057 }
 0x168   :  { %1271 = vrot.lane.b32.xlu1 %v1269_v42, %s2136_s19  ;;  %v437_v42 = vstv %s1884_s9 }
 0x169   :  { %1291 = vrot.lane.b32.xlu0 %v1289_v53, %s2137_s26  ;;  %v406_v53 = vstv %s1881_s8  ;;  %v438_v56 = vmul.f32 %v437_v42, %v372_v23 }
 0x16a   :  { %v2532_v62 = vpop.permute.xlu1 %1201  ;;  %v407_v55 = vmul.f32 %v406_v53, %v384_v38 }
 0x16b   :  { %v2534_v63 = vpop.permute.xlu0 %1365 }
 0x16c   :  { %1127 = vrot.lane.b32.xlu1 %v1125_v1, %s2137_s26 }
 0x16d   :  { %1455 = vrot.lane.b32.xlu0 %v1453_v45, %s2137_s26  ;;  %v458_v45 = vstv %s1886_s15 }
 0x16e   :  { %v2544_v16 = vpop.permute.xlu1 %605  ;;  %v459_v12 = vmul.f32 %v458_v45, %v372_v23 }
 0x16f   :  { %v2546_v17 = vpop.permute.xlu0 %769 }
 0x170   :  { %1435 = vrot.lane.b32.xlu1 %v1433_v54, %s2136_s19 }
 0x171   :  { %1465 = vrot.lane.b32.xlu0 %v1463_v18, %s2137_s26 }
 0x172   :  { %v2554_v30 = vpop.permute.xlu1 %913 }
 0x173   :  { %v2556_v31 = vpop.permute.xlu0 %1077 }
 0x174   :  { %1324 = vrot.lane.b32.xlu1 %v1323_v26, %s2138_s10  ;;  %v480_v26 = vmul.f32 %v479_v13, %v372_v23  ;;  %v547_v13 = vrot.slane %v2484_v19, 2 }
 0x175   :  { %376 = vrot.lane.b32.xlu0 %v374_v32, %s2132_s11 }
 0x176   :  { %v2560_v57 = vpop.permute.xlu1 %1221 }
 0x177   :  { %v2562_v36 = vpop.permute.xlu0 %1385 }
 0x178   :  { %1488 = vrot.lane.b32.xlu1 %v1487_v25, %s2139_s16  ;;  %v470_v25 = vmul.f32 %v469_v27, %v384_v38 }
 0x179   :  { %398 = vrot.lane.b32.xlu0 %v396_v37, %s2133_s14 }
 0x17a   :  { %v2565_v44 = vpop.permute.xlu1 %625 }
 0x17b   :  { %v2567_v46 = vpop.permute.xlu0 %789 }
 0x17c   :  { %388 = vrot.lane.b32.xlu1 %v386_v47, %s2132_s11  ;;  %s1889_s11 = sld [smem:[#allocation11 + $0x5b]] }
 0x17d   :  { %419 = vrot.lane.b32.xlu0 %v417_v48, %s2134_s25 }
 0x17e   :  { %v2571_v60 = vpop.permute.xlu1 %933 }
 0x17f   :  { %v2573_v61 = vpop.permute.xlu0 %1097 }
 0x180   :  { %409 = vrot.lane.b32.xlu1 %v407_v55, %s2133_s14  ;;  %s2140_s14 = smov 127  }
 0x181   :  { %440 = vrot.lane.b32.xlu0 %v438_v56, %s2135_s13 }
 0x182   :  { %v2577_v1 = vpop.permute.xlu1 %1241  ;;  %v490_v37 = vstv %s1889_s11 }
 0x183   :  { %v2579_v3 = vpop.permute.xlu0 %1405  ;;  %v491_v47 = vmul.f32 %v490_v37, %v384_v38  ;;  %v567_v37 = vrot.slane %v2494_v29, 2 }
 0x184   :  { %430 = vrot.lane.b32.xlu1 %v428_v11, %s2134_s25  ;;  %s2141_s25 = smov 126  }
 0x185   :  { %461 = vrot.lane.b32.xlu0 %v459_v12, %s2136_s19 }
 0x186   :  { %v2583_v18 = vpop.permute.xlu1 %645 }
 0x187   :  { %v2585_v54 = vpop.permute.xlu0 %809 }
 0x188   :  { %451 = vrot.lane.b32.xlu1 %v449_v24, %s2135_s13  ;;  %v712_v24 = vsel %vm379_vm8, %v2486_v22, %v711_v59  ;;  %v568_v22 = vsel %vm401_vm9, %v2494_v29, %v567_v37  ;;  %v875_v59 = vrot.slane %v2502_v35, 2  ;;  %s2142_s13 = smov 125  }
 0x189   :  { %482 = vrot.lane.b32.xlu0 %v480_v26, %s2137_s26 }
 0x18a   :  { %v2589_v32 = vpop.permute.xlu1 %953 }
 0x18b   :  { %v2591_v33 = vpop.permute.xlu0 %1117 }
 0x18c   :  { %472 = vrot.lane.b32.xlu1 %v470_v25, %s2136_s19  ;;  %s2143_s19 = smov 124  }
 0x18e   :  { %v2594_v34 = vpop.permute.xlu1 %1261 }
 0x18f   :  { %v2596_v43 = vpop.permute.xlu0 %1425 }
 0x190   :  { %493 = vrot.lane.b32.xlu1 %v491_v47, %s2137_s26  ;;  %s2144_s26 = smov 123  }
 0x192   :  { %v2599_v23 = vpop.permute.xlu1 %1137 }
 0x193   :  { %v2601_v48 = vpop.permute.xlu0 %973 }
 0x196   :  { %v2603_v53 = vpop.permute.xlu1 %1445 }
 0x197   :  { %3041 = vst [vmem:[#allocation24_spill] sm:$0xff] %v2603_v53  ;;  %v2605_v42 = vpop.permute.xlu0 %1281 }
 0x19a   :  { %v2607_v55 = vpop.permute.xlu1 %1301 }
 0x19b   :  { %v700_v56 = vpop.permute.xlu0 %699 }
 0x19c   :  { %v701_v45 = vrot.slane %v700_v56, 2 }
 0x19e   :  { %v702_v11 = vsel %vm379_vm8, %v700_v56, %v701_v45  ;;  %v536_v12 = vpop.permute.xlu1 %535 }
 0x19f   :  { %v704_v38 = vadd.f32 %v702_v11, %v2365_v58  ;;  %v576_v6 = vpop.permute.xlu0 %575  ;;  %v537_v26 = vrot.slane %v536_v12, 2  ;;  %v548_v58 = vsel %vm379_vm8, %v2484_v19, %v547_v13  ;;  %v731_v13 = vrot.slane %v2492_v28, 2 }
 0x1a0   :  { %v577_v11 = vrot.slane %v576_v6, 2 }
 0x1a1   :  { %v714_v27 = vadd.f32 %v712_v24, %v704_v38  ;;  %v538_v25 = vsel %vm379_vm8, %v536_v12, %v537_v26  ;;  %v1203_v26 = vrot.slane %v2532_v62, 2 }
 0x1a2   :  { %v540_v47 = vadd.f32 %v538_v25, %v2375_v5  ;;  %v556_v0 = vpop.permute.xlu1 %555  ;;  %v587_v5 = vrot.slane %v2508_v39, 2 }
 0x1a3   :  { %v884_v4 = vpop.permute.xlu0 %883  ;;  %v557_v56 = vrot.slane %v556_v0, 2 }
 0x1a4   :  { %v550_v45 = vadd.f32 %v548_v58, %v540_v47  ;;  %v885_v58 = vrot.slane %v884_v4, 2 }
 0x1a5   :  { %v558_v15 = vsel %vm401_vm9, %v556_v0, %v557_v56  ;;  %v578_v0 = vsel %vm422_vm10, %v576_v6, %v577_v11  ;;  %v895_v6 = vrot.slane %v2520_v49, 2  ;;  %v1204_v11 = vsel %vm379_vm8, %v2532_v62, %v1203_v26 }
 0x1a6   :  { %v560_v38 = vadd.f32 %v558_v15, %v550_v45  ;;  %v864_v12 = vpop.permute.xlu1 %863  ;;  %v876_v15 = vsel %vm379_vm8, %v2502_v35, %v875_v59  ;;  %v1039_v59 = vrot.slane %v2500_v41, 2  ;;  %v751_v62 = vrot.slane %v2510_v40, 2 }
 0x1a7   :  { %v1192_v24 = vpop.permute.xlu0 %1191  ;;  %v865_v25 = vrot.slane %v864_v12, 2 }
 0x1a8   :  { %v1193_v19 = vrot.slane %v1192_v24, 2  ;;  %v570_v47 = vadd.f32 %v568_v22, %v560_v38  ;;  %v588_v22 = vsel %vm422_vm10, %v2508_v39, %v587_v5 }
 0x1a9   :  { %v866_v29 = vsel %vm379_vm8, %v864_v12, %v865_v25 }
 0x1aa   :  { %v1194_v37 = vsel %vm379_vm8, %v1192_v24, %v1193_v19  ;;  %v868_v56 = vadd.f32 %v866_v29, %v2377_v7  ;;  %v720_v10 = vpop.permute.xlu1 %719  ;;  %v580_v53 = vadd.f32 %v578_v0, %v570_v47  ;;  %v886_v7 = vsel %vm401_vm9, %v884_v4, %v885_v58 }
 0x1ab   :  { %v1196_v45 = vadd.f32 %v1194_v37, %v2382_v14  ;;  %v740_v9 = vpop.permute.xlu0 %739  ;;  %v721_v38 = vrot.slane %v720_v10, 2  ;;  %v732_v0 = vsel %vm401_vm9, %v2492_v28, %v731_v13  ;;  %v1059_v4 = vrot.slane %v2522_v52, 2 }
 0x1ac   :  { %v878_v12 = vadd.f32 %v876_v15, %v868_v56  ;;  %v590_v24 = vadd.f32 %v588_v22, %v580_v53  ;;  %v741_v35 = vrot.slane %v740_v9, 2  ;;  %v896_v53 = vsel %vm401_vm9, %v2520_v49, %v895_v6 }
 0x1ad   :  { %v2639_v25 = vadd.f32 %v1204_v11, %v1196_v45  ;;  %v722_v14 = vsel %vm401_vm9, %v720_v10, %v721_v38  ;;  %v1367_v29 = vrot.slane %v2534_v63, 2  ;;  %v1040_v28 = vsel %vm379_vm8, %v2500_v41, %v1039_v59 }
 0x1ae   :  { %v724_v19 = vadd.f32 %v722_v14, %v714_v27  ;;  %v1028_v47 = vpop.permute.xlu1 %1027  ;;  %v888_v5 = vadd.f32 %v886_v7, %v878_v12  ;;  %v742_v27 = vsel %vm422_vm10, %v740_v9, %v741_v35  ;;  %v752_v22 = vsel %vm422_vm10, %v2510_v40, %v751_v62 }
 0x1af   :  { %v1048_v39 = vpop.permute.xlu0 %1047  ;;  %v1029_v26 = vrot.slane %v1028_v47, 2  ;;  %v607_v6 = vrot.slane %v2544_v16, 2  ;;  %v1060_v9 = vsel %vm401_vm9, %v2522_v52, %v1059_v4  ;;  %v1368_v41 = vsel %vm379_vm8, %v2534_v63, %v1367_v29 }
 0x1b0   :  { %v734_v58 = vadd.f32 %v732_v0, %v724_v19  ;;  %v898_v10 = vadd.f32 %v896_v53, %v888_v5  ;;  %v1049_v15 = vrot.slane %v1048_v39, 2  ;;  %v771_v40 = vrot.slane %v2546_v17, 2 }
 0x1b1   :  { %v1030_v37 = vsel %vm379_vm8, %v1028_v47, %v1029_v26  ;;  %v608_v0 = vsel %vm443_vm11, %v2544_v16, %v607_v6  ;;  %v915_v62 = vrot.slane %v2554_v30, 2 }
 0x1b2   :  { %v744_v13 = vadd.f32 %v742_v27, %v734_v58  ;;  %v1032_v56 = vadd.f32 %v1030_v37, %v2388_v20  ;;  %v596_v45 = vpop.permute.xlu1 %595  ;;  %v1050_v20 = vsel %vm401_vm9, %v1048_v39, %v1049_v15 }
 0x1b3   :  { %v1356_v49 = vpop.permute.xlu0 %1355  ;;  %v597_v11 = vrot.slane %v596_v45, 2 }
 0x1b4   :  { %v1357_v38 = vrot.slane %v1356_v49, 2  ;;  %v1042_v12 = vadd.f32 %v1040_v28, %v1032_v56  ;;  %v754_v7 = vadd.f32 %v752_v22, %v744_v13  ;;  %v916_v28 = vsel %vm422_vm10, %v2554_v30, %v915_v62 }
 0x1b5   :  { %v598_v14 = vsel %vm443_vm11, %v596_v45, %v597_v11  ;;  %v1223_v13 = vrot.slane %v2560_v57, 2  ;;  %v935_v62 = vrot.slane %v2571_v60, 2 }
 0x1b6   :  { %v1358_v35 = vsel %vm379_vm8, %v1356_v49, %v1357_v38  ;;  %v1052_v59 = vadd.f32 %v1050_v20, %v1042_v12  ;;  %v600_v19 = vadd.f32 %v598_v14, %v590_v24  ;;  %v904_v5 = vpop.permute.xlu1 %903  ;;  %v772_v24 = vsel %vm443_vm11, %v2546_v17, %v771_v40 }
 0x1b7   :  { %v1360_v47 = vadd.f32 %v1358_v35, %v2392_v21  ;;  %v760_v52 = vpop.permute.xlu0 %759  ;;  %v905_v63 = vrot.slane %v904_v5, 2  ;;  %v1079_v21 = vrot.slane %v2556_v31, 2 }
 0x1b8   :  { %v761_v53 = vrot.slane %v760_v52, 2  ;;  %v1062_v39 = vadd.f32 %v1060_v9, %v1052_v59  ;;  %v610_v26 = vadd.f32 %v608_v0, %v600_v19  ;;  %v791_v19 = vrot.slane %v2567_v46, 2 }
 0x1b9   :  { %v1370_v4 = vadd.f32 %v1368_v41, %v1360_v47  ;;  %v906_v58 = vsel %vm422_vm10, %v904_v5, %v905_v63  ;;  %v1080_v17 = vsel %vm422_vm10, %v2556_v31, %v1079_v21  ;;  %v627_v41 = vrot.slane %v2565_v44, 2 }
 0x1ba   :  { %v762_v29 = vsel %vm443_vm11, %v760_v52, %v761_v53  ;;  %v908_v27 = vadd.f32 %v906_v58, %v898_v10  ;;  %v1212_v15 = vpop.permute.xlu1 %1211  ;;  %v1387_v10 = vrot.slane %v2562_v36, 2 }
 0x1bb   :  { %v764_v37 = vadd.f32 %v762_v29, %v754_v7  ;;  %v1068_v16 = vpop.permute.xlu0 %1067  ;;  %v1213_v56 = vrot.slane %v1212_v15, 2  ;;  %v1224_v7 = vsel %vm401_vm9, %v2560_v57, %v1223_v13  ;;  %v628_v0 = vsel %vm464_vm12, %v2565_v44, %v627_v41 }
 0x1bc   :  { %v1069_v45 = vrot.slane %v1068_v16, 2  ;;  %v918_v49 = vadd.f32 %v916_v28, %v908_v27  ;;  %v936_v44 = vsel %vm443_vm11, %v2571_v60, %v935_v62  ;;  %v1119_v62 = vrot.slane %v2591_v33, 2 }
 0x1bd   :  { %v774_v22 = vadd.f32 %v772_v24, %v764_v37  ;;  %v1214_v6 = vsel %vm401_vm9, %v1212_v15, %v1213_v56  ;;  %v1243_v15 = vrot.slane %v2577_v1, 2 }
 0x1be   :  { %v1070_v11 = vsel %vm422_vm10, %v1068_v16, %v1069_v45  ;;  %v1216_v38 = vadd.f32 %v1214_v6, %v2639_v25  ;;  %v616_v12 = vpop.permute.xlu1 %615  ;;  %v1388_v25 = vsel %vm401_vm9, %v2562_v36, %v1387_v10  ;;  %v792_v36 = vsel %vm464_vm12, %v2567_v46, %v791_v19 }
 0x1bf   :  { %v1072_v9 = vadd.f32 %v1070_v11, %v1062_v39  ;;  %v1376_v30 = vpop.permute.xlu0 %1375  ;;  %v617_v20 = vrot.slane %v616_v12, 2  ;;  %v1244_v60 = vsel %vm422_vm10, %v2577_v1, %v1243_v15  ;;  %v955_v19 = vrot.slane %v2589_v32, 2 }
 0x1c0   :  { %v1377_v14 = vrot.slane %v1376_v30, 2  ;;  %v1226_v35 = vadd.f32 %v1224_v7, %v1216_v38  ;;  %v647_v38 = vrot.slane %v2583_v18, 2 }
 0x1c1   :  { %v1082_v40 = vadd.f32 %v1080_v17, %v1072_v9  ;;  %v618_v59 = vsel %vm464_vm12, %v616_v12, %v617_v20 }
 0x1c2   :  { %v1378_v31 = vsel %vm401_vm9, %v1376_v30, %v1377_v14  ;;  %v620_v47 = vadd.f32 %v618_v59, %v610_v26  ;;  %v924_v52 = vpop.permute.xlu1 %923  ;;  %v1099_v26 = vrot.slane %v2573_v61, 2  ;;  %v670_v30 = vrot.slane %v2470_v2, 6 }
 0x1c3   :  { %v1380_v5 = vadd.f32 %v1378_v31, %v1370_v4  ;;  %v780_v57 = vpop.permute.xlu0 %779  ;;  %v925_v63 = vrot.slane %v924_v52, 2 }
 0x1c4   :  { %v781_v53 = vrot.slane %v780_v57, 2  ;;  %v630_v39 = vadd.f32 %v628_v0, %v620_v47  ;;  %v1100_v46 = vsel %vm443_vm11, %v2573_v61, %v1099_v26  ;;  %v1263_v26 = vrot.slane %v2594_v34, 2 }
 0x1c5   :  { %v1390_v58 = vadd.f32 %v1388_v25, %v1380_v5  ;;  %v926_v29 = vsel %vm443_vm11, %v924_v52, %v925_v63  ;;  %v648_v25 = vsel %vm485_vm13, %v2583_v18, %v647_v38  ;;  %v672_v52 = vsel %vm671_vm14, %v670_v30, %v2470_v2 }
 0x1c6   :  { %v782_v24 = vsel %vm464_vm12, %v780_v57, %v781_v53  ;;  %v928_v4 = vadd.f32 %v926_v29, %v918_v49  ;;  %v1232_v27 = vpop.permute.xlu1 %1231  ;;  %v1407_v49 = vrot.slane %v2579_v3, 2  ;;  %v956_v2 = vsel %vm464_vm12, %v2589_v32, %v955_v19 }
 0x1c7   :  { %v784_v21 = vadd.f32 %v782_v24, %v774_v22  ;;  %v1088_v37 = vpop.permute.xlu0 %1087  ;;  %v1233_v16 = vrot.slane %v1232_v27, 2  ;;  %v1427_v32 = vrot.slane %v2596_v43, 2 }
 0x1c8   :  { %v1089_v28 = vrot.slane %v1088_v37, 2  ;;  %v938_v13 = vadd.f32 %v936_v44, %v928_v4  ;;  %v1408_v14 = vsel %vm422_vm10, %v2579_v3, %v1407_v49  ;;  %v834_v3 = vrot.slane %v2478_v8, 6 }
 0x1c9   :  { %v794_v56 = vadd.f32 %v792_v36, %v784_v21  ;;  %v1234_v45 = vsel %vm422_vm10, %v1232_v27, %v1233_v16  ;;  %v975_v49 = vrot.slane %v2601_v48, 2 }
 0x1ca   :  { %v1090_v6 = vsel %vm443_vm11, %v1088_v37, %v1089_v28  ;;  %v1236_v22 = vadd.f32 %v1234_v45, %v1226_v35  ;;  %v636_v17 = vpop.permute.xlu1 %635  ;;  %v811_v35 = vrot.slane %v2585_v54, 2  ;;  %v836_v44 = vsel %vm835_vm15, %v834_v3, %v2478_v8 }
 0x1cb   :  { %v1092_v11 = vadd.f32 %v1090_v6, %v1082_v40  ;;  %v1396_v10 = vpop.permute.xlu0 %1395  ;;  %v637_v9 = vrot.slane %v636_v17, 2 }
 0x1cc   :  { %v1397_v12 = vrot.slane %v1396_v10, 2  ;;  %v1246_v7 = vadd.f32 %v1244_v60, %v1236_v22  ;;  %v812_v18 = vsel %vm485_vm13, %v2585_v54, %v811_v35  ;;  %v1120_v54 = vsel %vm464_vm12, %v2591_v33, %v1119_v62 }
 0x1cd   :  { %v1102_v41 = vadd.f32 %v1100_v46, %v1092_v11  ;;  %v638_v61 = vsel %vm485_vm13, %v636_v17, %v637_v9  ;;  %v1264_v46 = vsel %vm443_vm11, %v2594_v34, %v1263_v26  ;;  %v998_v17 = vrot.slane %v2234_v50, 6 }
 0x1ce   :  { %v1398_v20 = vsel %vm422_vm10, %v1396_v10, %v1397_v12  ;;  %v640_v1 = vadd.f32 %v638_v61, %v630_v39  ;;  %v944_v59 = vpop.permute.xlu1 %943  ;;  %v1428_v34 = vsel %vm443_vm11, %v2596_v43, %v1427_v32 }
 0x1cf   :  { %v1400_v40 = vadd.f32 %v1398_v20, %v1390_v58  ;;  %v800_v31 = vpop.permute.xlu0 %799  ;;  %v945_v47 = vrot.slane %v944_v59, 2  ;;  %v1000_v35 = vsel %vm999_vm0, %v998_v17, %v2234_v50  ;;  %v1162_v50 = vrot.slane %v2236_v51, 6 }
 0x1d0   :  { %v801_v5 = vrot.slane %v800_v31, 2  ;;  %v650_v57 = vadd.f32 %v648_v25, %v640_v1  ;;  %v368_v17 = vstv %s1877_s21 }
 0x1d1   :  { %v1410_v0 = vadd.f32 %v1408_v14, %v1400_v40  ;;  %v946_v63 = vsel %vm464_vm12, %v944_v59, %v945_v47  ;;  %v1139_v47 = vrot.slane %v2599_v23, 2 }
 0x1d2   :  { %v802_v53 = vsel %vm485_vm13, %v800_v31, %v801_v5  ;;  %v948_v39 = vadd.f32 %v946_v63, %v938_v13  ;;  %v1252_v29 = vpop.permute.xlu1 %1251  ;;  %v674_v36 = vmul.f32 %v672_v52, %v650_v57 }
 0x1d3   :  { %v804_v58 = vadd.f32 %v802_v53, %v794_v56  ;;  %v1108_v24 = vpop.permute.xlu0 %1107  ;;  %v1253_v4 = vrot.slane %v1252_v29, 2  ;;  %v1140_v53 = vsel %vm485_vm13, %v2599_v23, %v1139_v47 }
 0x1d4   :  { %v1109_v21 = vrot.slane %v1108_v24, 2  ;;  %676 = vrot.lane.b32.xlu0 %v674_v36, %s2140_s14  ;;  %v958_v37 = vadd.f32 %v956_v2, %v948_v39  ;;  %v1164_v2 = vsel %vm1163_vm1, %v1162_v50, %v2236_v51 }
 0x1d5   :  { %v814_v27 = vadd.f32 %v812_v18, %v804_v58  ;;  %v1254_v15 = vsel %vm443_vm11, %v1252_v29, %v1253_v4 }
 0x1d6   :  { %v1110_v16 = vsel %vm464_vm12, %v1108_v24, %v1109_v21  ;;  %v1256_v28 = vadd.f32 %v1254_v15, %v1246_v7  ;;  %v964_v56 = vpop.permute.xlu1 %963  ;;  %v976_v7 = vsel %vm485_vm13, %v2601_v48, %v975_v49  ;;  %v1303_v48 = vrot.slane %v2607_v55, 2 }
 0x1d7   :  { %v1112_v13 = vadd.f32 %v1110_v16, %v1102_v41  ;;  %v1416_v45 = vpop.permute.xlu0 %1415  ;;  %v838_v6 = vmul.f32 %v836_v44, %v814_v27  ;;  %v965_v8 = vrot.slane %v964_v56, 2  ;;  %v1283_v41 = vrot.slane %v2605_v42, 2 }
 0x1d8   :  { %v1417_v22 = vrot.slane %v1416_v45, 2  ;;  %v1266_v33 = vadd.f32 %v1264_v46, %v1256_v28  ;;  %v1304_v39 = vsel %vm485_vm13, %v2607_v55, %v1303_v48 }
 0x1d9   :  { %840 = vrot.lane.b32.xlu1 %v838_v6, %s2141_s25  ;;  %v1122_v11 = vadd.f32 %v1120_v54, %v1112_v13  ;;  %v966_v10 = vsel %vm485_vm13, %v964_v56, %v965_v8  ;;  %v1284_v43 = vsel %vm464_vm12, %v2605_v42, %v1283_v41  ;;  %v3042_v42 = vld [vmem:[#allocation24_spill] sm:$0xff] }
 0x1da   :  { %v1418_v60 = vsel %vm443_vm11, %v1416_v45, %v1417_v22  ;;  %v968_v38 = vadd.f32 %v966_v10, %v958_v37  ;;  %v1272_v12 = vpop.permute.xlu1 %1271  ;;  %v1447_v18 = vrot.slane %v3042_v42, 2  ;;  %v362_v8 = vld [vmem:[#allocation2] sm:$0xf]  ;;  %v363_v22 = vstv %s361_s20 }
 0x1db   :  { %v1420_v9 = vadd.f32 %v1418_v60, %v1410_v0  ;;  %v1292_v30 = vpop.permute.xlu0 %1291  ;;  %v1273_v61 = vrot.slane %v1272_v12, 2  ;;  %v364_v60 = vmul.f32 %v363_v22, %v362_v8 }
 0x1dc   :  { %v978_v20 = vadd.f32 %v976_v7, %v968_v38  ;;  %v1293_v40 = vrot.slane %v1292_v30, 2  ;;  %v1448_v23 = vsel %vm464_vm12, %v3042_v42, %v1447_v18 }
 0x1dd   :  { %v1430_v14 = vadd.f32 %v1428_v34, %v1420_v9  ;;  %v1274_v1 = vsel %vm464_vm12, %v1272_v12, %v1273_v61 }
 0x1de   :  { %v1276_v59 = vadd.f32 %v1274_v1, %v1266_v33  ;;  %v1128_v31 = vpop.permute.xlu1 %1127  ;;  %v1002_v19 = vmul.f32 %v1000_v35, %v978_v20  ;;  %v1294_v57 = vsel %vm485_vm13, %v1292_v30, %v1293_v40 }
 0x1df   :  { %v1456_v25 = vpop.permute.xlu0 %1455  ;;  %v1129_v5 = vrot.slane %v1128_v31, 2 }
 0x1e0   :  { %v1286_v52 = vadd.f32 %v1284_v43, %v1276_v59  ;;  %1004 = vrot.lane.b32.xlu0 %v1002_v19, %s2142_s13  ;;  %v1457_v26 = vrot.slane %v1456_v25, 2 }
 0x1e1   :  { %v1130_v0 = vsel %vm485_vm13, %v1128_v31, %v1129_v5 }
 0x1e2   :  { %v1296_v3 = vadd.f32 %v1294_v57, %v1286_v52  ;;  %v1132_v62 = vadd.f32 %v1130_v0, %v1122_v11  ;;  %v1436_v63 = vpop.permute.xlu1 %1435  ;;  %v1458_v55 = vsel %vm485_vm13, %v1456_v25, %v1457_v26  ;;  %v367_v11 = vld [vmem:[#allocation3] sm:$0xf] }
 0x1e3   :  { %v1437_v58 = vrot.slane %v1436_v63, 2  ;;  %v1466_v24 = vpop.permute.xlu0 %1465  ;;  %v369_v9 = vmul.f32 %v368_v17, %v367_v11  ;;  %v359_v11 = vstv %s3028_s3  ;;  %s2147_s3 = smov [#allocation12]  }
 0x1e4   :  { %v1142_v29 = vadd.f32 %v1140_v53, %v1132_v62  ;;  %v1306_v36 = vadd.f32 %v1304_v39, %v1296_v3  ;;  %v1467_v44 = vrot.slane %v1466_v24, 2  ;;  %s1850_s23 = sshll.u32 %s2147_s3, 4  ;;  %s2788_s23 = int_to_ptr.vmem [resolvable:$true] %s1850_s23 }
 0x1e5   :  { %v1438_v4 = vsel %vm464_vm12, %v1436_v63, %v1437_v58  ;;  %v370_v30 = vadd.f32 %v369_v9, %v364_v60  ;;  %s2065_s24 = scalar_lea.vmem %s2788_s23, 64  ;;  %p2070_p8 = scmp.lt.s32.totalorder %s2788_s23, %s2788_s23 }
 0x1e6   :  { %v1440_v21 = vadd.f32 %v1438_v4, %v1430_v14  ;;  %v1325_v27 = vpop.permute.xlu1 %1324  ;;  %v1166_v37 = vmul.f32 %v1164_v2, %v1142_v29  ;;  %v1468_v13 = vsel %vm485_vm13, %v1466_v24, %v1467_v44  ;;  %v3043_v44 = vld [vmem:[#allocation21_spill] sm:$0xff]  ;;  %p2066_p7 = scmp.ne.s32.totalorder %s2788_s23, %s2065_s24  ;;  %p2071_p9 = scmp.lt.s32.totalorder %s2065_s24, %s2065_s24 }
 0x1e7   :  { %v1326_v54 = vrot.slane %v1325_v27, 6  ;;  %v377_v49 = vpop.permute.xlu0 %376 }
 0x1e8   :  { %v1450_v15 = vadd.f32 %v1448_v23, %v1440_v21  ;;  %1168 = vrot.lane.b32.xlu1 %v1166_v37, %s2143_s19  ;;  %v378_v10 = vrot.slane %v377_v49, 2  ;;  %v360_v21 = vld [vmem:[#allocation9] ss:$8 sm:$0x3]  ;;  %p2072_p10 = por %p2071_p9, %p2070_p8 }
 0x1e9   :  { %v1328_v16 = vsel %vm1327_vm2, %v1326_v54, %v1325_v27  ;;  %v503_v54 = vrot.slane %v360_v21, %v3043_v44  ;;  %v3047_v44 = vlaneseq }
 0x1ea   :  { %v1460_v32 = vadd.f32 %v1458_v55, %v1450_v15  ;;  %v1330_v51 = vmul.f32 %v1328_v16, %v1306_v36  ;;  %v1489_v28 = vpop.permute.xlu1 %1488  ;;  %v380_v12 = vsel %vm379_vm8, %v377_v49, %v378_v10  ;;  %v3044_v15 = vld [vmem:[#allocation22_spill] sm:$0xff]  ;;  %p2073_p11 = pnand %p2072_p10, %p2066_p7 }
 0x1eb   :  { %v1490_v56 = vrot.slane %v1489_v28, 6  ;;  %v399_v34 = vpop.permute.xlu0 %398  ;;  %v382_v41 = vadd.f32 %v380_v12, %v370_v30  ;;  %v507_v55 = vrot.slane %v360_v21, %v3044_v15  ;;  %v1565_v21 = vld [vmem:[#allocation5 + $0x44] ss:$8 sm:$0x3] }
 0x1ec   :  { %v1470_v45 = vadd.f32 %v1468_v13, %v1460_v32  ;;  %1332 = vrot.lane.b32.xlu0 %v1330_v51, %s2144_s26  ;;  %v400_v20 = vrot.slane %v399_v34, 2 }
 0x1ed   :  { %v1492_v6 = vsel %vm1491_vm3, %v1490_v56, %v1489_v28  ;;  %v508_v51 = vcombine.low %v503_v54, %v507_v55  ;;  %v3045_v56 = vld [vmem:[#allocation23_spill] sm:$0xff] }
 0x1ee   :  { %v1494_v46 = vmul.f32 %v1492_v6, %v1470_v45  ;;  %v389_v33 = vpop.permute.xlu1 %388  ;;  %v402_v1 = vsel %vm401_vm9, %v399_v34, %v400_v20 }
 0x1ef   :  { %v390_v38 = vrot.slane %v389_v33, 2  ;;  %v420_v40 = vpop.permute.xlu0 %419  ;;  %v515_v45 = vrot.slane %v508_v51, %v3045_v56 }
 0x1f0   :  { %1496 = vrot.lane.b32.xlu1 %v1494_v46, %s2145_s2  ;;  %v421_v19 = vrot.slane %v420_v40, 2 }
 0x1f1   :  { %v391_v7 = vsel %vm379_vm8, %v389_v33, %v390_v38  ;;  %vm1335_vm8 = vcmask 1006592  }
 0x1f2   :  { %v410_v61 = vpop.permute.xlu1 %409  ;;  %v393_v14 = vadd.f32 %v391_v7, %v382_v41  ;;  %v423_v48 = vsel %vm422_vm10, %v420_v40, %v421_v19 }
 0x1f3   :  { %v411_v35 = vrot.slane %v410_v61, 2  ;;  %v441_v5 = vpop.permute.xlu0 %440 }
 0x1f4   :  { %v404_v59 = vadd.f32 %v402_v1, %v393_v14  ;;  %v442_v0 = vrot.slane %v441_v5, 2 }
 0x1f5   :  { %v412_v31 = vsel %vm401_vm9, %v410_v61, %v411_v35  ;;  %vm1499_vm9 = vcmask 998400  }
 0x1f6   :  { %v431_v25 = vpop.permute.xlu1 %430  ;;  %v414_v47 = vadd.f32 %v412_v31, %v404_v59  ;;  %v444_v63 = vsel %vm443_vm11, %v441_v5, %v442_v0  ;;  %v3046_v0 = vld [vmem:[#allocation20_spill] sm:$0xff] }
 0x1f7   :  { %v432_v43 = vrot.slane %v431_v25, 2  ;;  %v462_v53 = vpop.permute.xlu0 %461 }
 0x1f8   :  { %v425_v52 = vadd.f32 %v423_v48, %v414_v47  ;;  %v463_v58 = vrot.slane %v462_v53, 2 }
 0x1f9   :  { %v433_v50 = vsel %vm422_vm10, %v431_v25, %v432_v43  ;;  %vm2793_vm10 = vcmp.lt.s32.totalorder %v3047_v44, 256 }
 0x1fa   :  { %v452_v57 = vpop.permute.xlu1 %451  ;;  %v435_v3 = vadd.f32 %v433_v50, %v425_v52  ;;  %v465_v36 = vsel %vm464_vm12, %v462_v53, %v463_v58  ;;  %v2146_v52 = vmov 1966171168   ;;  %v1544_v53 = vld [vmem:[#allocation5 + $0x2] ss:$8 sm:$0x3] }
 0x1fb   :  { %v453_v62 = vrot.slane %v452_v57, 2  ;;  %v483_v2 = vpop.permute.xlu0 %482  ;;  %v1514_v50 = vunpack.c.l.s4 %v2146_v52  ;;  %v1511_v58 = vld [vmem:[#allocation5 + $0x40] ss:$8 sm:$0x3] }
 0x1fc   :  { %v446_v42 = vadd.f32 %v444_v63, %v435_v3  ;;  %v484_v37 = vrot.slane %v483_v2, 2  ;;  %v1534_v63 = vld [vmem:[#allocation5 + $0x1] ss:$8 sm:$0x3] }
 0x1fd   :  { %v454_v18 = vsel %vm443_vm11, %v452_v57, %v453_v62  ;;  %v1515_v57 = vunpack.c.0.s8 %v1514_v50  ;;  %v1510_v62 = vld [vmem:[#allocation5] ss:$8 sm:$0x3] }
 0x1fe   :  { %v473_v39 = vpop.permute.xlu1 %472  ;;  %v456_v29 = vadd.f32 %v454_v18, %v446_v42  ;;  %v486_v32 = vsel %vm485_vm13, %v483_v2, %v484_v37  ;;  %v1554_v42 = vld [vmem:[#allocation5 + $0x3] ss:$8 sm:$0x3]  ;;  %v1564_v18 = vld [vmem:[#allocation5 + $0x4] ss:$8 sm:$0x3] }
 0x1ff   :  { %v474_v24 = vrot.slane %v473_v39, 2  ;;  %v1518_v3 = vsub.s32 %v1515_v57, %v3046_v0  ;;  %v1574_v2 = vld [vmem:[#allocation5 + $0x5] ss:$8 sm:$0x3] }
 0x200   :  { %v467_v26 = vadd.f32 %v465_v36, %v456_v29  ;;  %v1535_v29 = vld [vmem:[#allocation5 + $0x41] ss:$8 sm:$0x3]  ;;  %v1555_v36 = vld [vmem:[#allocation5 + $0x43] ss:$8 sm:$0x3] }
 0x201   :  { %v475_v4 = vsel %vm464_vm12, %v473_v39, %v474_v24  ;;  %v1545_v24 = vld [vmem:[#allocation5 + $0x42] ss:$8 sm:$0x3]  ;;  %v1585_v37 = vld [vmem:[#allocation5 + $0x46] ss:$8 sm:$0x3] }
 0x202   :  { %v494_v27 = vpop.permute.xlu1 %493  ;;  %v477_v23 = vadd.f32 %v475_v4, %v467_v26  ;;  %v1584_v26 = vld [vmem:[#allocation5 + $0x6] ss:$8 sm:$0x3] }
 0x203   :  { %v495_v16 = vrot.slane %v494_v27, 2 }
 0x204   :  { %v488_v28 = vadd.f32 %v486_v32, %v477_v23  ;;  %v1594_v23 = vld [vmem:[#allocation5 + $0x7] ss:$8 sm:$0x3] }
 0x205   :  { %v496_v13 = vsel %vm485_vm13, %v494_v27, %v495_v16  ;;  %v1575_v27 = vld [vmem:[#allocation5 + $0x45] ss:$8 sm:$0x3] }
 0x206   :  { %v498_v6 = vadd.f32 %v496_v13, %v488_v28 }
 0x208   :  { %v517_v22 = vmul.f32 %v515_v45, %v498_v6 }
 0x20a   :  { %v518_v38 = vadd.f32 %v517_v22, %v359_v11 }
 0x246   :  { %v677_v46 = vpop.permute.xlu0 %676 }
 0x247   :  { %v678_v8 = vrot.slane %v677_v46, 2 }
 0x249   :  { %v680_v10 = vsel %vm679_vm4, %v677_v46, %v678_v8 }
 0x24a   :  { %v682_v34 = vadd.f32 %v680_v10, %v518_v38 }
 0x24b   :  { %v841_v49 = vpop.permute.xlu1 %840 }
 0x24c   :  { %v842_v17 = vrot.slane %v841_v49, 2 }
 0x24e   :  { %v844_v12 = vsel %vm843_vm5, %v841_v49, %v842_v17 }
 0x24f   :  { %v846_v41 = vadd.f32 %v844_v12, %v682_v34 }
 0x252   :  { %v1005_v33 = vpop.permute.xlu0 %1004 }
 0x253   :  { %v1006_v60 = vrot.slane %v1005_v33, 2 }
 0x255   :  { %v1008_v7 = vsel %vm1007_vm6, %v1005_v33, %v1006_v60 }
 0x256   :  { %v1010_v35 = vadd.f32 %v1008_v7, %v846_v41 }
 0x25a   :  { %v1169_v9 = vpop.permute.xlu1 %1168 }
 0x25b   :  { %v1170_v30 = vrot.slane %v1169_v9, 2 }
 0x25d   :  { %v1172_v20 = vsel %vm1171_vm7, %v1169_v9, %v1170_v30 }
 0x25e   :  { %v1333_v61 = vpop.permute.xlu0 %1332  ;;  %v1174_v40 = vadd.f32 %v1172_v20, %v1010_v35 }
 0x25f   :  { %v1334_v14 = vrot.slane %v1333_v61, 2 }
 0x261   :  { %v1336_v1 = vsel %vm1335_vm8, %v1333_v61, %v1334_v14 }
 0x262   :  { %v1497_v59 = vpop.permute.xlu1 %1496  ;;  %v1338_v25 = vadd.f32 %v1336_v1, %v1174_v40 }
 0x263   :  { %v1498_v31 = vrot.slane %v1497_v59, 2 }
 0x265   :  { %v1500_v19 = vsel %vm1499_vm9, %v1497_v59, %v1498_v31 }
 0x266   :  { %v1502_v47 = vadd.f32 %v1500_v19, %v1338_v25 }
 0x268   :  { %v1974_v43 = vmul.f32 -1.442695, %v1502_v47 }
 0x26a   :  { %2005 = vpow2.f32 %v1974_v43 }
 0x274   :  { %v2006_v48 = vpop.eup %2005 }
 0x275   :  { %v1506_v5 = vadd.f32 1.0, %v2006_v48 }
 0x277   :  { %2007 = vrcp.f32 %v1506_v5 }
 0x281   :  { %v2008_v39 = vpop.eup %2007 }
 0x282   :  { %v2790_v4 = vrot.slane %v2008_v39, %v1518_v3  ;;  %1509 = vst [vmem:[#allocation12] sm:$0xf] %v2008_v39 }
 0x283   :  { %2076 = shalt.err (!%p2073_p11)
}
 0x284   :  { %s2077_s6 = scalar_lea.hbm %s3029_s4, 64 }
 0x285   :  { %p2078_p12 = scmp.ne.s32.totalorder %s3029_s4, %s2077_s6  ;;  %p2081_p13 = scmp.lt.u32.totalorder %s2077_s6, %s3029_s4 }
 0x287   :  { %p2083_p0 = pnand %p2081_p13, %p2078_p12 }
 0x289   :  { %2086 = shalt.err (!%p2083_p0)
}
 0x28a   :  { %1853 = dma.vmem_to_hbm [thread:$0]  %s2788_s23, 64, %s3029_s4, [#allocation7]   ;;  %v1595_v15 = vld [vmem:[#allocation5 + $0x47] ss:$8 sm:$0x3]  ;;  %v2816_v51 = vcombine.high %v2790_v4, %v2790_v4  ;;  %v1523_v28 = vmul.f32 %v2790_v4, %v1510_v62  ;;  %v1536_v13 = vmul.f32 %v1534_v63, %v2790_v4  ;;  %v1546_v56 = vmul.f32 %v1544_v53, %v2790_v4 }
 0x28b   :  { %v1604_v55 = vld [vmem:[#allocation5 + $0x10] ss:$8 sm:$0x3]  ;;  %v1614_v32 = vld [vmem:[#allocation5 + $0x11] ss:$8 sm:$0x3]  ;;  %v1556_v8 = vmul.f32 %v1554_v42, %v2790_v4  ;;  %v1566_v22 = vmul.f32 %v1564_v18, %v2790_v4  ;;  %v1576_v33 = vmul.f32 %v1574_v2, %v2790_v4  ;;  %v1586_v11 = vmul.f32 %v1584_v26, %v2790_v4 }
 0x28c   :  { %v1605_v16 = vld [vmem:[#allocation5 + $0x50] ss:$8 sm:$0x3]  ;;  %v1615_v45 = vld [vmem:[#allocation5 + $0x51] ss:$8 sm:$0x3]  ;;  %v1524_v9 = vmul.f32 %v2816_v51, %v1511_v58  ;;  %v1537_v12 = vmul.f32 %v1535_v29, %v2816_v51  ;;  %v1547_v30 = vmul.f32 %v1545_v24, %v2816_v51  ;;  %v1557_v34 = vmul.f32 %v1555_v36, %v2816_v51 }
 0x28d   :  { %v1624_v6 = vld [vmem:[#allocation5 + $0x12] ss:$8 sm:$0x3]  ;;  %v1634_v49 = vld [vmem:[#allocation5 + $0x13] ss:$8 sm:$0x3]  ;;  %v1567_v14 = vmul.f32 %v1565_v21, %v2816_v51  ;;  %v1577_v35 = vmul.f32 %v1575_v27, %v2816_v51  ;;  %v1587_v1 = vmul.f32 %v1585_v37, %v2816_v51  ;;  %v1596_v40 = vmul.f32 %v1594_v23, %v2790_v4 }
 0x28e   :  { %v1625_v46 = vld [vmem:[#allocation5 + $0x52] ss:$8 sm:$0x3]  ;;  %v1635_v17 = vld [vmem:[#allocation5 + $0x53] ss:$8 sm:$0x3]  ;;  %v1597_v47 = vmul.f32 %v1595_v15, %v2816_v51  ;;  %v1606_v43 = vmul.f32 %v1604_v55, %v2790_v4  ;;  %v1607_v48 = vmul.f32 %v1605_v16, %v2816_v51  ;;  %v1616_v5 = vmul.f32 %v1614_v32, %v2790_v4 }
 0x28f   :  { %v1644_v10 = vld [vmem:[#allocation5 + $0x14] ss:$8 sm:$0x3]  ;;  %v1654_v38 = vld [vmem:[#allocation5 + $0x15] ss:$8 sm:$0x3]  ;;  %v1617_v3 = vmul.f32 %v1615_v45, %v2816_v51  ;;  %v1626_v62 = vmul.f32 %v1624_v6, %v2790_v4  ;;  %v1627_v63 = vmul.f32 %v1625_v46, %v2816_v51  ;;  %v1636_v53 = vmul.f32 %v1634_v49, %v2790_v4 }
 0x290   :  { %v1645_v60 = vld [vmem:[#allocation5 + $0x54] ss:$8 sm:$0x3]  ;;  %1529 = vst.msk [vmem:[#allocation13] ss:$8 sm:$0x3] %vm2793_vm10, %v1523_v28  ;;  %v1637_v29 = vmul.f32 %v1635_v17, %v2816_v51  ;;  %v1646_v24 = vmul.f32 %v1644_v10, %v2790_v4  ;;  %v1656_v2 = vmul.f32 %v1654_v38, %v2790_v4 }
 0x291   :  { %1539 = vst.msk [vmem:[#allocation13 + $0x1] ss:$8 sm:$0x3] %vm2793_vm10, %v1536_v13  ;;  %1549 = vst.msk [vmem:[#allocation13 + $0x2] ss:$8 sm:$0x3] %vm2793_vm10, %v1546_v56  ;;  %v1647_v36 = vmul.f32 %v1645_v60, %v2816_v51 }
 0x292   :  { %v1655_v7 = vld [vmem:[#allocation5 + $0x55] ss:$8 sm:$0x3]  ;;  %v1664_v41 = vld [vmem:[#allocation5 + $0x16] ss:$8 sm:$0x3] }
 0x293   :  { %v1665_v61 = vld [vmem:[#allocation5 + $0x56] ss:$8 sm:$0x3]  ;;  %v1674_v20 = vld [vmem:[#allocation5 + $0x17] ss:$8 sm:$0x3]  ;;  %v1657_v23 = vmul.f32 %v1655_v7, %v2816_v51  ;;  %v1666_v44 = vmul.f32 %v1664_v41, %v2790_v4 }
 0x294   :  { %1559 = vst.msk [vmem:[#allocation13 + $0x3] ss:$8 sm:$0x3] %vm2793_vm10, %v1556_v8  ;;  %1569 = vst.msk [vmem:[#allocation13 + $0x4] ss:$8 sm:$0x3] %vm2793_vm10, %v1566_v22  ;;  %v1667_v15 = vmul.f32 %v1665_v61, %v2816_v51  ;;  %v1676_v55 = vmul.f32 %v1674_v20, %v2790_v4 }
 0x295   :  { %1579 = vst.msk [vmem:[#allocation13 + $0x5] ss:$8 sm:$0x3] %vm2793_vm10, %v1576_v33  ;;  %1589 = vst.msk [vmem:[#allocation13 + $0x6] ss:$8 sm:$0x3] %vm2793_vm10, %v1586_v11 }
 0x296   :  { %v1675_v59 = vld [vmem:[#allocation5 + $0x57] ss:$8 sm:$0x3]  ;;  %v1684_v31 = vld [vmem:[#allocation5 + $0x20] ss:$8 sm:$0x3] }
 0x297   :  { %v1685_v25 = vld [vmem:[#allocation5 + $0x60] ss:$8 sm:$0x3]  ;;  %v1694_v19 = vld [vmem:[#allocation5 + $0x21] ss:$8 sm:$0x3]  ;;  %v1677_v56 = vmul.f32 %v1675_v59, %v2816_v51  ;;  %v1686_v45 = vmul.f32 %v1684_v31, %v2790_v4 }
 0x298   :  { %1532 = vst.msk [vmem:[#allocation13 + $0x40] ss:$8 sm:$0x3] %vm2793_vm10, %v1524_v9  ;;  %1542 = vst.msk [vmem:[#allocation13 + $0x41] ss:$8 sm:$0x3] %vm2793_vm10, %v1537_v12  ;;  %v1687_v6 = vmul.f32 %v1685_v25, %v2816_v51  ;;  %v1696_v46 = vmul.f32 %v1694_v19, %v2790_v4 }
 0x299   :  { %1552 = vst.msk [vmem:[#allocation13 + $0x42] ss:$8 sm:$0x3] %vm2793_vm10, %v1547_v30  ;;  %1562 = vst.msk [vmem:[#allocation13 + $0x43] ss:$8 sm:$0x3] %vm2793_vm10, %v1557_v34 }
 0x29a   :  { %v1695_v52 = vld [vmem:[#allocation5 + $0x61] ss:$8 sm:$0x3]  ;;  %v1704_v50 = vld [vmem:[#allocation5 + $0x22] ss:$8 sm:$0x3] }
 0x29b   :  { %v1705_v57 = vld [vmem:[#allocation5 + $0x62] ss:$8 sm:$0x3]  ;;  %v1714_v0 = vld [vmem:[#allocation5 + $0x23] ss:$8 sm:$0x3]  ;;  %v1697_v11 = vmul.f32 %v1695_v52, %v2816_v51  ;;  %v1706_v17 = vmul.f32 %v1704_v50, %v2790_v4 }
 0x29c   :  { %1572 = vst.msk [vmem:[#allocation13 + $0x44] ss:$8 sm:$0x3] %vm2793_vm10, %v1567_v14  ;;  %1582 = vst.msk [vmem:[#allocation13 + $0x45] ss:$8 sm:$0x3] %vm2793_vm10, %v1577_v35  ;;  %v1707_v10 = vmul.f32 %v1705_v57, %v2816_v51  ;;  %v1716_v60 = vmul.f32 %v1714_v0, %v2790_v4 }
 0x29d   :  { %1592 = vst.msk [vmem:[#allocation13 + $0x46] ss:$8 sm:$0x3] %vm2793_vm10, %v1587_v1  ;;  %1599 = vst.msk [vmem:[#allocation13 + $0x7] ss:$8 sm:$0x3] %vm2793_vm10, %v1596_v40 }
 0x29e   :  { %v1715_v42 = vld [vmem:[#allocation5 + $0x63] ss:$8 sm:$0x3]  ;;  %v1724_v18 = vld [vmem:[#allocation5 + $0x24] ss:$8 sm:$0x3] }
 0x29f   :  { %v1725_v39 = vld [vmem:[#allocation5 + $0x64] ss:$8 sm:$0x3]  ;;  %v1734_v58 = vld [vmem:[#allocation5 + $0x25] ss:$8 sm:$0x3]  ;;  %v1717_v30 = vmul.f32 %v1715_v42, %v2816_v51  ;;  %v1726_v34 = vmul.f32 %v1724_v18, %v2790_v4 }
 0x2a0   :  { %1602 = vst.msk [vmem:[#allocation13 + $0x47] ss:$8 sm:$0x3] %vm2793_vm10, %v1597_v47  ;;  %1609 = vst.msk [vmem:[#allocation13 + $0x10] ss:$8 sm:$0x3] %vm2793_vm10, %v1606_v43  ;;  %v1727_v7 = vmul.f32 %v1725_v39, %v2816_v51  ;;  %v1736_v41 = vmul.f32 %v1734_v58, %v2790_v4 }
 0x2a1   :  { %1612 = vst.msk [vmem:[#allocation13 + $0x50] ss:$8 sm:$0x3] %vm2793_vm10, %v1607_v48  ;;  %1619 = vst.msk [vmem:[#allocation13 + $0x11] ss:$8 sm:$0x3] %vm2793_vm10, %v1616_v5 }
 0x2a2   :  { %v1735_v26 = vld [vmem:[#allocation5 + $0x65] ss:$8 sm:$0x3]  ;;  %v1744_v21 = vld [vmem:[#allocation5 + $0x26] ss:$8 sm:$0x3] }
 0x2a3   :  { %v1745_v27 = vld [vmem:[#allocation5 + $0x66] ss:$8 sm:$0x3]  ;;  %v1754_v37 = vld [vmem:[#allocation5 + $0x27] ss:$8 sm:$0x3]  ;;  %v1737_v20 = vmul.f32 %v1735_v26, %v2816_v51  ;;  %v1746_v14 = vmul.f32 %v1744_v21, %v2790_v4 }
 0x2a4   :  { %1622 = vst.msk [vmem:[#allocation13 + $0x51] ss:$8 sm:$0x3] %vm2793_vm10, %v1617_v3  ;;  %1629 = vst.msk [vmem:[#allocation13 + $0x12] ss:$8 sm:$0x3] %vm2793_vm10, %v1626_v62  ;;  %v1747_v35 = vmul.f32 %v1745_v27, %v2816_v51  ;;  %v1756_v1 = vmul.f32 %v1754_v37, %v2790_v4 }
 0x2a5   :  { %1632 = vst.msk [vmem:[#allocation13 + $0x52] ss:$8 sm:$0x3] %vm2793_vm10, %v1627_v63  ;;  %1639 = vst.msk [vmem:[#allocation13 + $0x13] ss:$8 sm:$0x3] %vm2793_vm10, %v1636_v53 }
 0x2a6   :  { %v1755_v16 = vld [vmem:[#allocation5 + $0x67] ss:$8 sm:$0x3]  ;;  %v1764_v32 = vld [vmem:[#allocation5 + $0x30] ss:$8 sm:$0x3] }
 0x2a7   :  { %v1765_v28 = vld [vmem:[#allocation5 + $0x70] ss:$8 sm:$0x3]  ;;  %v1774_v13 = vld [vmem:[#allocation5 + $0x31] ss:$8 sm:$0x3]  ;;  %v1757_v31 = vmul.f32 %v1755_v16, %v2816_v51  ;;  %v1766_v25 = vmul.f32 %v1764_v32, %v2790_v4 }
 0x2a8   :  { %1642 = vst.msk [vmem:[#allocation13 + $0x53] ss:$8 sm:$0x3] %vm2793_vm10, %v1637_v29  ;;  %1649 = vst.msk [vmem:[#allocation13 + $0x14] ss:$8 sm:$0x3] %vm2793_vm10, %v1646_v24  ;;  %v1767_v19 = vmul.f32 %v1765_v28, %v2816_v51  ;;  %v1776_v47 = vmul.f32 %v1774_v13, %v2790_v4 }
 0x2a9   :  { %1652 = vst.msk [vmem:[#allocation13 + $0x54] ss:$8 sm:$0x3] %vm2793_vm10, %v1647_v36  ;;  %1659 = vst.msk [vmem:[#allocation13 + $0x15] ss:$8 sm:$0x3] %vm2793_vm10, %v1656_v2 }
 0x2aa   :  { %v1775_v49 = vld [vmem:[#allocation5 + $0x71] ss:$8 sm:$0x3]  ;;  %v1784_v8 = vld [vmem:[#allocation5 + $0x32] ss:$8 sm:$0x3] }
 0x2ab   :  { %v1785_v22 = vld [vmem:[#allocation5 + $0x72] ss:$8 sm:$0x3]  ;;  %v1794_v33 = vld [vmem:[#allocation5 + $0x33] ss:$8 sm:$0x3]  ;;  %v1777_v5 = vmul.f32 %v1775_v49, %v2816_v51  ;;  %v1786_v52 = vmul.f32 %v1784_v8, %v2790_v4 }
 0x2ac   :  { %1662 = vst.msk [vmem:[#allocation13 + $0x55] ss:$8 sm:$0x3] %vm2793_vm10, %v1657_v23  ;;  %1669 = vst.msk [vmem:[#allocation13 + $0x16] ss:$8 sm:$0x3] %vm2793_vm10, %v1666_v44  ;;  %v1787_v50 = vmul.f32 %v1785_v22, %v2816_v51  ;;  %v1796_v57 = vmul.f32 %v1794_v33, %v2790_v4 }
 0x2ad   :  { %1672 = vst.msk [vmem:[#allocation13 + $0x56] ss:$8 sm:$0x3] %vm2793_vm10, %v1667_v15  ;;  %1679 = vst.msk [vmem:[#allocation13 + $0x17] ss:$8 sm:$0x3] %vm2793_vm10, %v1676_v55 }
 0x2ae   :  { %v1795_v38 = vld [vmem:[#allocation5 + $0x73] ss:$8 sm:$0x3]  ;;  %v1804_v9 = vld [vmem:[#allocation5 + $0x34] ss:$8 sm:$0x3] }
 0x2af   :  { %v1805_v12 = vld [vmem:[#allocation5 + $0x74] ss:$8 sm:$0x3]  ;;  %1682 = vst.msk [vmem:[#allocation13 + $0x57] ss:$8 sm:$0x3] %vm2793_vm10, %v1677_v56  ;;  %v1797_v3 = vmul.f32 %v1795_v38, %v2816_v51  ;;  %v1806_v62 = vmul.f32 %v1804_v9, %v2790_v4 }
 0x2b0   :  { %1689 = vst.msk [vmem:[#allocation13 + $0x20] ss:$8 sm:$0x3] %vm2793_vm10, %v1686_v45  ;;  %1692 = vst.msk [vmem:[#allocation13 + $0x60] ss:$8 sm:$0x3] %vm2793_vm10, %v1687_v6  ;;  %v1807_v63 = vmul.f32 %v1805_v12, %v2816_v51 }
 0x2b1   :  { %1699 = vst.msk [vmem:[#allocation13 + $0x21] ss:$8 sm:$0x3] %vm2793_vm10, %v1696_v46  ;;  %v1814_v61 = vld [vmem:[#allocation5 + $0x35] ss:$8 sm:$0x3] }
 0x2b2   :  { %1702 = vst.msk [vmem:[#allocation13 + $0x61] ss:$8 sm:$0x3] %vm2793_vm10, %v1697_v11  ;;  %1709 = vst.msk [vmem:[#allocation13 + $0x22] ss:$8 sm:$0x3] %vm2793_vm10, %v1706_v17  ;;  %v1816_v53 = vmul.f32 %v1814_v61, %v2790_v4 }
 0x2b3   :  { %1712 = vst.msk [vmem:[#allocation13 + $0x62] ss:$8 sm:$0x3] %vm2793_vm10, %v1707_v10  ;;  %1719 = vst.msk [vmem:[#allocation13 + $0x23] ss:$8 sm:$0x3] %vm2793_vm10, %v1716_v60 }
 0x2b4   :  { %v1815_v40 = vld [vmem:[#allocation5 + $0x75] ss:$8 sm:$0x3]  ;;  %v1824_v59 = vld [vmem:[#allocation5 + $0x36] ss:$8 sm:$0x3] }
 0x2b5   :  { %1722 = vst.msk [vmem:[#allocation13 + $0x63] ss:$8 sm:$0x3] %vm2793_vm10, %v1717_v30  ;;  %1729 = vst.msk [vmem:[#allocation13 + $0x24] ss:$8 sm:$0x3] %vm2793_vm10, %v1726_v34  ;;  %v1817_v42 = vmul.f32 %v1815_v40, %v2816_v51  ;;  %v1826_v18 = vmul.f32 %v1824_v59, %v2790_v4 }
 0x2b6   :  { %1732 = vst.msk [vmem:[#allocation13 + $0x64] ss:$8 sm:$0x3] %vm2793_vm10, %v1727_v7  ;;  %1739 = vst.msk [vmem:[#allocation13 + $0x25] ss:$8 sm:$0x3] %vm2793_vm10, %v1736_v41 }
 0x2b7   :  { %v1825_v43 = vld [vmem:[#allocation5 + $0x76] ss:$8 sm:$0x3]  ;;  %v1834_v48 = vld [vmem:[#allocation5 + $0x37] ss:$8 sm:$0x3] }
 0x2b8   :  { %1742 = vst.msk [vmem:[#allocation13 + $0x65] ss:$8 sm:$0x3] %vm2793_vm10, %v1737_v20  ;;  %1749 = vst.msk [vmem:[#allocation13 + $0x26] ss:$8 sm:$0x3] %vm2793_vm10, %v1746_v14  ;;  %v1827_v39 = vmul.f32 %v1825_v43, %v2816_v51  ;;  %v1836_v58 = vmul.f32 %v1834_v48, %v2790_v4 }
 0x2b9   :  { %1752 = vst.msk [vmem:[#allocation13 + $0x66] ss:$8 sm:$0x3] %vm2793_vm10, %v1747_v35  ;;  %1759 = vst.msk [vmem:[#allocation13 + $0x27] ss:$8 sm:$0x3] %vm2793_vm10, %v1756_v1 }
 0x2ba   :  { %v1835_v0 = vld [vmem:[#allocation5 + $0x77] ss:$8 sm:$0x3]  ;;  %s2148_s4 = smov [#allocation13]  }
 0x2bb   :  { %s1859_s16 = sshll.u32 %s2148_s4, 4  ;;  %1762 = vst.msk [vmem:[#allocation13 + $0x67] ss:$8 sm:$0x3] %vm2793_vm10, %v1757_v31  ;;  %v1837_v29 = vmul.f32 %v1835_v0, %v2816_v51  ;;  %s1860_s16 = int_to_ptr.vmem [resolvable:$true] %s1859_s16 }
 0x2bc   :  { %1769 = vst.msk [vmem:[#allocation13 + $0x30] ss:$8 sm:$0x3] %vm2793_vm10, %v1766_v25  ;;  %1772 = vst.msk [vmem:[#allocation13 + $0x70] ss:$8 sm:$0x3] %vm2793_vm10, %v1767_v19  ;;  %p2092_p2 = scmp.lt.s32.totalorder %s1860_s16, %s1860_s16 }
 0x2bd   :  { %1779 = vst.msk [vmem:[#allocation13 + $0x31] ss:$8 sm:$0x3] %vm2793_vm10, %v1776_v47  ;;  %1782 = vst.msk [vmem:[#allocation13 + $0x71] ss:$8 sm:$0x3] %vm2793_vm10, %v1777_v5 }
 0x2be   :  { %1789 = vst.msk [vmem:[#allocation13 + $0x32] ss:$8 sm:$0x3] %vm2793_vm10, %v1786_v52  ;;  %1792 = vst.msk [vmem:[#allocation13 + $0x72] ss:$8 sm:$0x3] %vm2793_vm10, %v1787_v50 }
 0x2bf   :  { %1799 = vst.msk [vmem:[#allocation13 + $0x33] ss:$8 sm:$0x3] %vm2793_vm10, %v1796_v57  ;;  %1802 = vst.msk [vmem:[#allocation13 + $0x73] ss:$8 sm:$0x3] %vm2793_vm10, %v1797_v3 }
 0x2c0   :  { %1809 = vst.msk [vmem:[#allocation13 + $0x34] ss:$8 sm:$0x3] %vm2793_vm10, %v1806_v62  ;;  %1812 = vst.msk [vmem:[#allocation13 + $0x74] ss:$8 sm:$0x3] %vm2793_vm10, %v1807_v63 }
 0x2c1   :  { %1819 = vst.msk [vmem:[#allocation13 + $0x35] ss:$8 sm:$0x3] %vm2793_vm10, %v1816_v53  ;;  %1822 = vst.msk [vmem:[#allocation13 + $0x75] ss:$8 sm:$0x3] %vm2793_vm10, %v1817_v42 }
 0x2c2   :  { %1829 = vst.msk [vmem:[#allocation13 + $0x36] ss:$8 sm:$0x3] %vm2793_vm10, %v1826_v18  ;;  %1832 = vst.msk [vmem:[#allocation13 + $0x76] ss:$8 sm:$0x3] %vm2793_vm10, %v1827_v39 }
 0x2c3   :  { %1839 = vst.msk [vmem:[#allocation13 + $0x37] ss:$8 sm:$0x3] %vm2793_vm10, %v1836_v58  ;;  %1842 = vst.msk [vmem:[#allocation13 + $0x77] ss:$8 sm:$0x3] %vm2793_vm10, %v1837_v29 }
 0x2c4   :  { %s2087_s17 = scalar_lea.vmem %s1860_s16, 2048 }
 0x2c5   :  { %p2088_p1 = scmp.ne.s32.totalorder %s1860_s16, %s2087_s17  ;;  %p2093_p3 = scmp.lt.s32.totalorder %s2087_s17, %s2087_s17 }
 0x2c7   :  { %p2094_p4 = por %p2093_p3, %p2092_p2 }
 0x2c9   :  { %p2095_p5 = pnand %p2094_p4, %p2088_p1 }
 0x2cb   :  { %2098 = shalt.err (!%p2095_p5)
}
 0x2cc   :  { %s2099_s11 = scalar_lea.hbm %s3030_s5, 2048 }
 0x2cd   :  { %p2100_p6 = scmp.ne.s32.totalorder %s3030_s5, %s2099_s11  ;;  %p2103_p7 = scmp.lt.u32.totalorder %s2099_s11, %s3030_s5 }
 0x2cf   :  { %p2105_p8 = pnand %p2103_p7, %p2100_p6 }
 0x2d1   :  { %2108 = shalt.err (!%p2105_p8)
}
 0x2d2   :  { %1865 = dma.vmem_to_hbm [thread:$0]  %s1860_s16, 2048, %s3030_s5, [#allocation14], %s2120_s28, %s2120_s28, %s2121_s29  }
 0x2d3   :  { %2115 = dma.done.wait [#allocation7], 64  }
 0x2d4   :  { %2116 = vsyncadd [#allocation7], 4294967232 }
 0x2d5   :  { %2117 = dma.done.wait [#allocation14], 2048  }
 0x2d6   :  { %2118 = vsyncadd [#allocation14], 4294965248 }
 0x2d7   :  { %1872 = vsyncpa [#allocation6], 1 }
 0x2d8   :  { %1873 = vsyncpa [#allocation10], 1 }
 0x2d9   :  { %1874 = vsyncpa [#allocation7], 1 }
 0x2da   :  { %1875 = vsyncpa [#allocation14], 1 }
 0x2db   :  { %1876 = vsyncpa [#allocation8], 1 }

</bundles_post_ra>
